<compile_context>
chip_gen: v7x
topology: tpu7x:2x2x1
jax: 0.10.0
libtpu: 0.0.40
codegen_flags: <defaults>
</compile_context>

<pallas_src>
import functools
import math

import jax
import jax.numpy as jnp
from jax import lax
from jax.experimental import pallas as pl
from jax.experimental.pallas import tpu as pltpu

_INV_SQRT2 = 1.0 / math.sqrt(2.0)
_VMEM_LIMIT = 48 * 1024 * 1024   # < v7x 64 MiB physical; > v5e/v6e default scoped limit
_TM_DEFAULT = 512                # row tile (both stages)
_TV_DEFAULT = 2048               # vocab tile (stage 2)


def _round_up(x, m):
    return (x + m - 1) // m * m


# ---------------------------------------------------------------------------
# Kernel 1: fused dense (H->H, bf16 MXU / f32 acc) + exact GELU + LayerNorm.
# Input tile already bf16; normalized activations written back as bf16.
# ---------------------------------------------------------------------------
def _dense_gelu_ln_kernel(x_ref, w_ref, b_ref, g_ref, beta_ref, o_ref, *, eps):
    h = jnp.dot(x_ref[...], w_ref[...], preferred_element_type=jnp.float32) + b_ref[...]

    # torch.nn.GELU() default == exact erf formulation
    h = 0.5 * h * (1.0 + lax.erf(h * _INV_SQRT2))

    # LayerNorm over last dim (biased variance, eps inside sqrt), all f32
    mean = jnp.mean(h, axis=-1, keepdims=True)
    c = h - mean
    var = jnp.mean(c * c, axis=-1, keepdims=True)
    y = c * lax.rsqrt(var + eps) * g_ref[...] + beta_ref[...]
    o_ref[...] = y.astype(o_ref.dtype)                        # bf16 writeback


# ---------------------------------------------------------------------------
# Kernel 2: decoder matmul (H -> tv vocab slice, bf16 MXU / f32 acc) + bias.
# ---------------------------------------------------------------------------
def _decoder_kernel(y_ref, w_ref, b_ref, o_ref):
    o_ref[...] = (
        jnp.dot(y_ref[...], w_ref[...], preferred_element_type=jnp.float32)
        + b_ref[...]
    ).astype(o_ref.dtype)


def prepare_decoder(decoder_w, decoder_b, *, tv=_TV_DEFAULT):
    """Pad decoder weight/bias ONCE (at init time) to a tile-aligned vocab dim.

    Avoids re-materializing the full padded weight in HBM on every forward.
    """
    V = decoder_w.shape[1]
    tv_pad = min(tv, _round_up(V, 128))
    Vp = _round_up(V, tv_pad)
    if Vp != V:
        decoder_w = jnp.pad(decoder_w, ((0, 0), (0, Vp - V)))
        decoder_b = jnp.pad(decoder_b, ((0, 0), (0, Vp - V)))
    return decoder_w, decoder_b


def mlm_head_forward(hidden_states, params, *, vocab_size=None, eps=1e-12,
                     tm=_TM_DEFAULT, tv=_TV_DEFAULT, logits_dtype=jnp.bfloat16):
    """hidden_states: (B, S, H) -> logits (B, S, V) in `logits_dtype`."""
    B, S, H = hidden_states.shape
    M = B * S

    dec_w = params["decoder_w"]
    dec_b = params["decoder_b"]
    Vp = dec_w.shape[1]
    V = int(vocab_size) if vocab_size is not None else Vp
    if Vp % 128 != 0:
        # Fallback only: prefer prepare_decoder() at init so this per-call
        # full-weight copy never happens.
        new_vp = _round_up(Vp, 128)
        dec_w = jnp.pad(dec_w, ((0, 0), (0, new_vp - Vp)))
        dec_b = jnp.pad(dec_b, ((0, 0), (0, new_vp - Vp)))
        Vp = new_vp

    # ---- aligned, adaptive tiles ----
    # bf16 min tile is (16,128) -> round row tile to 16; adapt to small M so
    # padded rows (pure waste on compute-bound v5e) stay minimal.
    tm_eff = min(tm, _round_up(M, 16))
    Mp = _round_up(M, tm_eff)
    tv_eff = min(tv, Vp)
    if Vp % tv_eff != 0:
        tv_eff = math.gcd(Vp, tv_eff)        # both multiples of 128

    n_row = Mp // tm_eff
    n_voc = Vp // tv_eff

    # bf16 input: halves stage-1 HBM reads and the x-tile VMEM footprint.
    x = hidden_states.reshape(M, H).astype(jnp.bfloat16)
    if Mp != M:
        x = jnp.pad(x, ((0, Mp - M), (0, 0)))

    # ---- stage 1: dense + GELU + LayerNorm, tiled over rows ----
    y = pl.pallas_call(
        functools.partial(_dense_gelu_ln_kernel, eps=eps),
        out_shape=jax.ShapeDtypeStruct((Mp, H), jnp.bfloat16),
        grid=(n_row,),
        in_specs=[
            pl.BlockSpec((tm_eff, H), lambda i: (i, 0)),   # x (bf16)
            pl.BlockSpec((H, H), lambda i: (0, 0)),        # dense_w (bf16)
            pl.BlockSpec((1, H), lambda i: (0, 0)),        # dense_b (f32)
            pl.BlockSpec((1, H), lambda i: (0, 0)),        # ln_gamma (f32)
            pl.BlockSpec((1, H), lambda i: (0, 0)),        # ln_beta (f32)
        ],
        out_specs=pl.BlockSpec((tm_eff, H), lambda i: (i, 0)),
        compiler_params=pltpu.CompilerParams(
            dimension_semantics=("parallel",),
            vmem_limit_bytes=_VMEM_LIMIT,
        ),
        cost_estimate=pl.CostEstimate(
            flops=2 * Mp * H * H,
            transcendentals=Mp * H,
            bytes_accessed=Mp * H * 2 + H * H * 2 + 3 * H * 4 + Mp * H * 2,
        ),
    )(x, params["dense_w"], params["dense_b"], params["ln_gamma"], params["ln_beta"])

    # ---- stage 2: decoder matmul + bias ----
    # Vocab OUTER, rows INNER: the (H, tv) weight tile stays resident across all
    # row tiles, so the full H x V weight is streamed from HBM exactly once.
    # If n_row == 1 the y block index is also constant -> y fetched once (small-M
    # fast path).  Logits stored as bf16 to halve the dominant output stream.
    out_itemsize = jnp.dtype(logits_dtype).itemsize
    y_stream = Mp * H * 2 * (1 if n_row == 1 else n_voc)
    logits = pl.pallas_call(
        _decoder_kernel,
        out_shape=jax.ShapeDtypeStruct((Mp, Vp), logits_dtype),
        grid=(n_voc, n_row),
        in_specs=[
            pl.BlockSpec((tm_eff, H), lambda j, i: (i, 0)),     # y (bf16)
            pl.BlockSpec((H, tv_eff), lambda j, i: (0, j)),     # decoder_w (bf16)
            pl.BlockSpec((1, tv_eff), lambda j, i: (0, j)),     # decoder_b (f32)
        ],
        out_specs=pl.BlockSpec((tm_eff, tv_eff), lambda j, i: (i, j)),
        compiler_params=pltpu.CompilerParams(
            dimension_semantics=("parallel", "parallel"),
            vmem_limit_bytes=_VMEM_LIMIT,
        ),
        cost_estimate=pl.CostEstimate(
            flops=2 * Mp * H * Vp,
            transcendentals=0,
            bytes_accessed=y_stream + H * Vp * 2 + Vp * 4 + Mp * Vp * out_itemsize,
        ),
    )(y, dec_w, dec_b)

    return logits[:M, :V].reshape(B, S, V)


def init_params(key, hidden_size, vocab_size, *, tv=_TV_DEFAULT):
    k1, k2, k3 = jax.random.split(key, 3)
    bound = 1.0 / math.sqrt(hidden_size)
    # decoder: torch Linear(H, V, bias=False) + separate zero bias param,
    # stored transposed (H, V) in bf16, padded ONCE to a tile-aligned vocab.
    decoder_w = jax.random.uniform(
        k3, (hidden_size, vocab_size), jnp.float32, -bound, bound
    ).astype(jnp.bfloat16)
    decoder_b = jnp.zeros((1, vocab_size), jnp.float32)
    decoder_w, decoder_b = prepare_decoder(decoder_w, decoder_b, tv=tv)
    return {
        # dense: torch Linear(H, H); stored transposed for x @ W, bf16 weights
        "dense_w": jax.random.uniform(
            k1, (hidden_size, hidden_size), jnp.float32, -bound, bound
        ).astype(jnp.bfloat16),
        "dense_b": jax.random.uniform(
            k2, (1, hidden_size), jnp.float32, -bound, bound
        ),
        "ln_gamma": jnp.ones((1, hidden_size), jnp.float32),
        "ln_beta": jnp.zeros((1, hidden_size), jnp.float32),
        "decoder_w": decoder_w,
        "decoder_b": decoder_b,
    }


def _reference(hidden_states, params, *, vocab_size, eps=1e-12,
               logits_dtype=jnp.bfloat16):
    """Pure-JAX reference mirroring the kernel's mixed-precision policy."""
    B, S, H = hidden_states.shape
    x = hidden_states.reshape(-1, H).astype(jnp.bfloat16)
    h = jnp.dot(x, params["dense_w"], preferred_element_type=jnp.float32)
    h = h + params["dense_b"]
    h = 0.5 * h * (1.0 + lax.erf(h * _INV_SQRT2))
    mean = jnp.mean(h, axis=-1, keepdims=True)
    c = h - mean
    var = jnp.mean(c * c, axis=-1, keepdims=True)
    y = c * lax.rsqrt(var + eps) * params["ln_gamma"] + params["ln_beta"]
    y = y.astype(jnp.bfloat16)
    out = jnp.dot(y, params["decoder_w"], preferred_element_type=jnp.float32)
    out = (out + params["decoder_b"]).astype(logits_dtype)
    return out[:, :vocab_size].reshape(B, S, vocab_size)


if __name__ == "__main__":
    # small but tile-exercising config: batch=2, seq=200 (M=400, 16-aligned so
    # no row padding), hidden=256, vocab=1000 (pre-padded once to 1024 at init,
    # lane-dense output tiles).
    B, S, H, V = 2, 200, 256, 1000
    key = jax.random.PRNGKey(0)
    kx, kp = jax.random.split(key)

    hidden_states = jax.random.normal(kx, (B, S, H), jnp.float32)
    params = init_params(kp, H, V)

    out = mlm_head_forward(hidden_states, params, vocab_size=V, eps=1e-12)
    out = jax.block_until_ready(out)

    ref = _reference(hidden_states, params, vocab_size=V, eps=1e-12)
    assert out.shape == (B, S, V)
    err = float(jnp.max(jnp.abs(out.astype(jnp.float32) - ref.astype(jnp.float32))))
    assert err < 2e-2, err

    print("KERNEL_OK")
</pallas_src>

<mosaic_0001>
module attributes {stable_mosaic.version = 11 : i64} {
  func.func @_dense_gelu_ln_kernel(%arg0: i32, %arg1: memref<400x256xbf16, #tpu.memory_space<vmem>>, %arg2: memref<256x256xbf16, #tpu.memory_space<vmem>>, %arg3: memref<1x256xf32, #tpu.memory_space<vmem>>, %arg4: memref<1x256xf32, #tpu.memory_space<vmem>>, %arg5: memref<1x256xf32, #tpu.memory_space<vmem>>, %arg6: memref<400x256xbf16, #tpu.memory_space<vmem>>) attributes {dimension_semantics = [#tpu.dimension_semantics<parallel>], iteration_bounds = array<i64: 1>, scalar_prefetch = 0 : i64, scratch_operands = 0 : i64, tpu.core_type = #tpu.core_type<tc>, window_params = [{transform_indices = @transform_0, window_bounds = array<i64: 400, 256>}, {pipeline_mode = #tpu.pipeline_mode<synchronous>, transform_indices = @transform_1, window_bounds = array<i64: 256, 256>}, {pipeline_mode = #tpu.pipeline_mode<synchronous>, transform_indices = @transform_2, window_bounds = array<i64: 1, 256>}, {pipeline_mode = #tpu.pipeline_mode<synchronous>, transform_indices = @transform_3, window_bounds = array<i64: 1, 256>}, {pipeline_mode = #tpu.pipeline_mode<synchronous>, transform_indices = @transform_4, window_bounds = array<i64: 1, 256>}, {transform_indices = @transform_5, window_bounds = array<i64: 400, 256>}]} {
    %c0 = arith.constant 0 : index
    %c0_0 = arith.constant 0 : index
    %0 = vector.load %arg1[%c0, %c0_0] : memref<400x256xbf16, #tpu.memory_space<vmem>>, vector<400x256xbf16>
    %c0_1 = arith.constant 0 : index
    %c0_2 = arith.constant 0 : index
    %1 = vector.load %arg2[%c0_1, %c0_2] : memref<256x256xbf16, #tpu.memory_space<vmem>>, vector<256x256xbf16>
    %cst = arith.constant dense<0.000000e+00> : vector<400x256xf32>
    %2 = tpu.matmul %0, %1, %cst {dimension_numbers = #tpu.dot_dimension_numbers<[1], [0], [0], [1], [0, 0, 1, 1], [], []>} : vector<400x256xbf16>, vector<256x256xbf16>, vector<400x256xf32> -> vector<400x256xf32>
    %c0_3 = arith.constant 0 : index
    %c0_4 = arith.constant 0 : index
    %3 = vector.load %arg3[%c0_3, %c0_4] : memref<1x256xf32, #tpu.memory_space<vmem>>, vector<1x256xf32>
    %4 = vector.broadcast %3 : vector<1x256xf32> to vector<400x256xf32>
    %5 = arith.addf %2, %4 : vector<400x256xf32>
    %cst_5 = arith.constant 5.000000e-01 : f32
    %6 = vector.broadcast %cst_5 : f32 to vector<400x256xf32>
    %7 = arith.mulf %6, %5 : vector<400x256xf32>
    %cst_6 = arith.constant 0.707106769 : f32
    %8 = vector.broadcast %cst_6 : f32 to vector<400x256xf32>
    %9 = arith.mulf %5, %8 : vector<400x256xf32>
    %10 = math.erf %9 : vector<400x256xf32>
    %cst_7 = arith.constant 1.000000e+00 : f32
    %11 = vector.broadcast %cst_7 : f32 to vector<400x256xf32>
    %12 = arith.addf %11, %10 : vector<400x256xf32>
    %13 = arith.mulf %7, %12 : vector<400x256xf32>
    %cst_8 = arith.constant dense<0.000000e+00> : vector<400xf32>
    %14 = vector.multi_reduction <add>, %13, %cst_8 [1] : vector<400x256xf32> to vector<400xf32>
    %15 = vector.shape_cast %14 : vector<400xf32> to vector<400x1xf32>
    %cst_9 = arith.constant 2.560000e+02 : f32
    %16 = vector.broadcast %cst_9 : f32 to vector<400x1xf32>
    %17 = arith.divf %15, %16 : vector<400x1xf32>
    %18 = vector.broadcast %17 : vector<400x1xf32> to vector<400x256xf32>
    %19 = arith.subf %13, %18 : vector<400x256xf32>
    %20 = arith.mulf %19, %19 : vector<400x256xf32>
    %cst_10 = arith.constant dense<0.000000e+00> : vector<400xf32>
    %21 = vector.multi_reduction <add>, %20, %cst_10 [1] : vector<400x256xf32> to vector<400xf32>
    %22 = vector.shape_cast %21 : vector<400xf32> to vector<400x1xf32>
    %cst_11 = arith.constant 2.560000e+02 : f32
    %23 = vector.broadcast %cst_11 : f32 to vector<400x1xf32>
    %24 = arith.divf %22, %23 : vector<400x1xf32>
    %cst_12 = arith.constant 9.99999996E-13 : f32
    %25 = vector.broadcast %cst_12 : f32 to vector<400x1xf32>
    %26 = arith.addf %24, %25 : vector<400x1xf32>
    %27 = math.rsqrt %26 : vector<400x1xf32>
    %28 = vector.broadcast %27 : vector<400x1xf32> to vector<400x256xf32>
    %29 = arith.mulf %19, %28 : vector<400x256xf32>
    %c0_13 = arith.constant 0 : index
    %c0_14 = arith.constant 0 : index
    %30 = vector.load %arg4[%c0_13, %c0_14] : memref<1x256xf32, #tpu.memory_space<vmem>>, vector<1x256xf32>
    %31 = vector.broadcast %30 : vector<1x256xf32> to vector<400x256xf32>
    %32 = arith.mulf %29, %31 : vector<400x256xf32>
    %c0_15 = arith.constant 0 : index
    %c0_16 = arith.constant 0 : index
    %33 = vector.load %arg5[%c0_15, %c0_16] : memref<1x256xf32, #tpu.memory_space<vmem>>, vector<1x256xf32>
    %34 = vector.broadcast %33 : vector<1x256xf32> to vector<400x256xf32>
    %35 = arith.addf %32, %34 : vector<400x256xf32>
    %36 = arith.truncf %35 : vector<400x256xf32> to vector<400x256xbf16>
    %c0_17 = arith.constant 0 : index
    %c0_18 = arith.constant 0 : index
    %37 = vector.load %arg6[%c0_17, %c0_18] : memref<400x256xbf16, #tpu.memory_space<vmem>>, vector<400x256xbf16>
    tpu.vector_store %arg6[%c0_17, %c0_18], %36 {strides = array<i32>} : memref<400x256xbf16, #tpu.memory_space<vmem>>, vector<400x256xbf16>,
    return
  }
  func.func @transform_0(%arg0: i32) -> (i32, i32) {
    %c0_i32 = arith.constant 0 : i32
    %c0_i32_0 = arith.constant 0 : i32
    return %arg0, %c0_i32 : i32, i32
  }
  func.func @transform_1(%arg0: i32) -> (i32, i32) {
    %c0_i32 = arith.constant 0 : i32
    %c0_i32_0 = arith.constant 0 : i32
    %c0_i32_1 = arith.constant 0 : i32
    return %c0_i32, %c0_i32_0 : i32, i32
  }
  func.func @transform_2(%arg0: i32) -> (i32, i32) {
    %c0_i32 = arith.constant 0 : i32
    %c0_i32_0 = arith.constant 0 : i32
    %c0_i32_1 = arith.constant 0 : i32
    return %c0_i32, %c0_i32_0 : i32, i32
  }
  func.func @transform_3(%arg0: i32) -> (i32, i32) {
    %c0_i32 = arith.constant 0 : i32
    %c0_i32_0 = arith.constant 0 : i32
    %c0_i32_1 = arith.constant 0 : i32
    return %c0_i32, %c0_i32_0 : i32, i32
  }
  func.func @transform_4(%arg0: i32) -> (i32, i32) {
    %c0_i32 = arith.constant 0 : i32
    %c0_i32_0 = arith.constant 0 : i32
    %c0_i32_1 = arith.constant 0 : i32
    return %c0_i32, %c0_i32_0 : i32, i32
  }
  func.func @transform_5(%arg0: i32) -> (i32, i32) {
    %c0_i32 = arith.constant 0 : i32
    %c0_i32_0 = arith.constant 0 : i32
    return %arg0, %c0_i32 : i32, i32
  }
}

</mosaic_0001>

<bundles_post_ra>
// kernel: tpu_custom_call.1
= control target key start
LH: loop header
LB: loop body
LE: loop exit
PB: predicated region body
PF: predicated region fallthrough
CT: control target
= control target key end

     0   :  { %10 = vsyncpa [#allocation3], 0  ;;  %s5806_s0 = inlined_call_operand.hbm [shape: bf16[400,256], index: 0, kind: input, shape index: {}]   ;;  %s5807_s1 = inlined_call_operand.hbm [shape: bf16[256,256], index: 1, kind: input, shape index: {}]   ;;  %s5808_s2 = inlined_call_operand.vmem [shape: f32[1,256], index: 2, kind: input, shape index: {}]   ;;  %s5809_s3 = inlined_call_operand.vmem [shape: f32[1,256], index: 3, kind: input, shape index: {}]   ;;  %s5810_s4 = inlined_call_operand.vmem [shape: f32[1,256], index: 4, kind: input, shape index: {}]   ;;  %s5811_s5 = inlined_call_operand.hbm [shape: bf16[400,256], index: 5, kind: output, shape index: {}]  }
   0x1   :  { %11 = vsyncpa [#allocation6], 0 }
   0x2   :  { %12 = vsyncpa [#allocation4], 0  ;;  %s3443_s18 = smov [#allocation2]   ;;  %s3371_s22 = scalar_lea.hbm %s5806_s0, 6400 }
   0x3   :  { %s18_s19 = sshll.u32 %s3443_s18, 4  ;;  %p3372_p0 = scmp.ne.s32.totalorder %s5806_s0, %s3371_s22  ;;  %s19_s19 = int_to_ptr.vmem [resolvable:$true] %s18_s19 }
   0x4   :  { %p3375_p1 = scmp.lt.u32.totalorder %s3371_s22, %s5806_s0 }
   0x6   :  { %p3377_p2 = pnand %p3375_p1, %p3372_p0 }
   0x8   :  { %3380 = shalt.err (!%p3377_p2)
}
   0x9   :  { %s3381_s27 = scalar_lea.vmem %s19_s19, 6400  ;;  %p3386_p4 = scmp.lt.s32.totalorder %s19_s19, %s19_s19 }
   0xa   :  { %p3382_p3 = scmp.ne.s32.totalorder %s19_s19, %s3381_s27  ;;  %p3387_p5 = scmp.lt.s32.totalorder %s3381_s27, %s3381_s27 }
   0xc   :  { %p3388_p6 = por %p3387_p5, %p3386_p4 }
   0xe   :  { %p3389_p7 = pnand %p3388_p6, %p3382_p3 }
  0x10   :  { %3392 = shalt.err (!%p3389_p7)
}
  0x11   :  { %s3444_s28 = smov 128   ;;  %s3445_s29 = smov 8  }
  0x12   :  { %24 = dma.hbm_to_vmem [thread:$0]  %s5806_s0, 6400, %s19_s19, [#allocation3], %s3444_s28, %s3444_s28, %s3445_s29  }
  0x13   :  { %s3446_s7 = smov [#allocation5]   ;;  %s3393_s11 = scalar_lea.hbm %s5807_s1, 4096 }
  0x14   :  { %s30_s8 = sshll.u32 %s3446_s7, 4  ;;  %p3394_p8 = scmp.ne.s32.totalorder %s5807_s1, %s3393_s11  ;;  %s31_s8 = int_to_ptr.vmem [resolvable:$true] %s30_s8 }
  0x15   :  { %p3397_p9 = scmp.lt.u32.totalorder %s3393_s11, %s5807_s1 }
  0x17   :  { %p3399_p10 = pnand %p3397_p9, %p3394_p8 }
  0x19   :  { %3402 = shalt.err (!%p3399_p10)
}
  0x1a   :  { %s3403_s16 = scalar_lea.vmem %s31_s8, 4096  ;;  %p3408_p12 = scmp.lt.s32.totalorder %s31_s8, %s31_s8 }
  0x1b   :  { %p3404_p11 = scmp.ne.s32.totalorder %s31_s8, %s3403_s16  ;;  %p3409_p13 = scmp.lt.s32.totalorder %s3403_s16, %s3403_s16 }
  0x1d   :  { %p3410_p0 = por %p3409_p13, %p3408_p12 }
  0x1f   :  { %p3411_p1 = pnand %p3410_p0, %p3404_p11 }
  0x21   :  { %3414 = shalt.err (!%p3411_p1)
}
  0x22   :  { %36 = dma.hbm_to_vmem [thread:$0]  %s5807_s1, 4096, %s31_s8, [#allocation6], %s3444_s28, %s3444_s28, %s3445_s29  }
  0x23   :  { %3437 = dma.done.wait [#allocation3], 6400  }
  0x24   :  { %3438 = vsyncadd [#allocation3], 4294960896 }
  0x25   :  { %3439 = dma.done.wait [#allocation6], 4096  }
  0x26   :  { %3440 = vsyncadd [#allocation6], 4294963200  ;;  %v2948_v0 = vld [vmem:[#allocation5 + $0x4] ss:$8 sps:$4 sm:$0xff]   ;;  %v2950_v1 = vld [vmem:[#allocation5] ss:$8 sps:$4 sm:$0xff]  }
  0x27   :  { %553 = vmatprep.subr.bf16.mxu0 %v2948_v0  ;;  %2911 = vmatprep.subr.bf16.mxu1 %v2948_v0  ;;  %v2951_v2 = vld [vmem:[#allocation5 + $0x14] ss:$8 sps:$4 sm:$0xff]   ;;  %v2953_v3 = vld [vmem:[#allocation5 + $0x10] ss:$8 sps:$4 sm:$0xff]   ;;  %v2954_v4 = vld [vmem:[#allocation5 + $0x24] ss:$8 sps:$4 sm:$0xff]  }
  0x28   :  { %554 = vmatpush1.bf16.msra.mxu0 %v2950_v1  ;;  %2927 = vmatpush1.bf16.msra.mxu1 %v2950_v1  ;;  %v2956_v5 = vld [vmem:[#allocation5 + $0x20] ss:$8 sps:$4 sm:$0xff]   ;;  %v2957_v6 = vld [vmem:[#allocation5 + $0x34] ss:$8 sps:$4 sm:$0xff]   ;;  %v2959_v7 = vld [vmem:[#allocation5 + $0x30] ss:$8 sps:$4 sm:$0xff]  }
  0x29   :  { %555 = vmatprep.subr.bf16.mxu0 %v2951_v2  ;;  %2912 = vmatprep.subr.bf16.mxu1 %v2951_v2  ;;  %v2960_v8 = vld [vmem:[#allocation5 + $0x44] ss:$8 sps:$4 sm:$0xff]   ;;  %v2962_v9 = vld [vmem:[#allocation5 + $0x40] ss:$8 sps:$4 sm:$0xff]   ;;  %v2963_v10 = vld [vmem:[#allocation5 + $0x54] ss:$8 sps:$4 sm:$0xff]  }
  0x2a   :  { %v2965_v11 = vld [vmem:[#allocation5 + $0x50] ss:$8 sps:$4 sm:$0xff]   ;;  %v2966_v12 = vld [vmem:[#allocation5 + $0x64] ss:$8 sps:$4 sm:$0xff]   ;;  %v2998_v13 = vld [vmem:[#allocation2 + $0x4] ss:$8 sps:$4 sm:$0xff]  }
  0x2b   :  { %v2968_v14 = vld [vmem:[#allocation5 + $0x60] ss:$8 sps:$4 sm:$0xff]   ;;  %v3001_v15 = vld [vmem:[#allocation2 + $0xd4] ss:$8 sps:$4 sm:$0xff]   ;;  %v2969_v16 = vld [vmem:[#allocation5 + $0x74] ss:$8 sps:$4 sm:$0xff]   ;;  %585 = vmatprep.mubr.bf16.mxu0 %v2998_v13 }
  0x2c   :  { %556 = vmatpush1.bf16.msra.mxu0 %v2953_v3  ;;  %2928 = vmatpush1.bf16.msra.mxu1 %v2953_v3  ;;  %v2971_v17 = vld [vmem:[#allocation5 + $0x70] ss:$8 sps:$4 sm:$0xff]   ;;  %v2972_v18 = vld [vmem:[#allocation5 + $0x84] ss:$8 sps:$4 sm:$0xff]   ;;  %v2974_v19 = vld [vmem:[#allocation5 + $0x80] ss:$8 sps:$4 sm:$0xff]  }
  0x2d   :  { %557 = vmatprep.subr.bf16.mxu0 %v2954_v4  ;;  %2913 = vmatprep.subr.bf16.mxu1 %v2954_v4  ;;  %v2975_v20 = vld [vmem:[#allocation5 + $0x94] ss:$8 sps:$4 sm:$0xff]   ;;  %v2977_v21 = vld [vmem:[#allocation5 + $0x90] ss:$8 sps:$4 sm:$0xff]   ;;  %v2978_v22 = vld [vmem:[#allocation5 + $0xa4] ss:$8 sps:$4 sm:$0xff]  }
  0x2e   :  { %715 = vmatprep.mubr.bf16.mxu1 %v3001_v15  ;;  %v2980_v23 = vld [vmem:[#allocation5 + $0xa0] ss:$8 sps:$4 sm:$0xff]   ;;  %v2981_v24 = vld [vmem:[#allocation5 + $0xb4] ss:$8 sps:$4 sm:$0xff]   ;;  %v2983_v25 = vld [vmem:[#allocation5 + $0xb0] ss:$8 sps:$4 sm:$0xff]  }
  0x2f   :  { %v2984_v26 = vld [vmem:[#allocation5 + $0xc4] ss:$8 sps:$4 sm:$0xff]   ;;  %v2986_v27 = vld [vmem:[#allocation5 + $0xc0] ss:$8 sps:$4 sm:$0xff]   ;;  %v2987_v28 = vld [vmem:[#allocation5 + $0xd4] ss:$8 sps:$4 sm:$0xff]  }
  0x30   :  { %558 = vmatpush1.bf16.msra.mxu0 %v2956_v5  ;;  %2929 = vmatpush1.bf16.msra.mxu1 %v2956_v5  ;;  %v2989_v29 = vld [vmem:[#allocation5 + $0xd0] ss:$8 sps:$4 sm:$0xff]   ;;  %v2990_v30 = vld [vmem:[#allocation5 + $0xe4] ss:$8 sps:$4 sm:$0xff]   ;;  %v2992_v31 = vld [vmem:[#allocation5 + $0xe0] ss:$8 sps:$4 sm:$0xff]  }
  0x31   :  { %559 = vmatprep.subr.bf16.mxu0 %v2957_v6  ;;  %2914 = vmatprep.subr.bf16.mxu1 %v2957_v6  ;;  %v2993_v32 = vld [vmem:[#allocation5 + $0xf4] ss:$8 sps:$4 sm:$0xff]   ;;  %v2995_v33 = vld [vmem:[#allocation5 + $0xf0] ss:$8 sps:$4 sm:$0xff]   ;;  %v2999_v35 = vld [vmem:[#allocation2 + $0xd0] ss:$8 sps:$4 sm:$0xff]  }
  0x32   :  { %v2996_v34 = vld [vmem:[#allocation2] ss:$8 sps:$4 sm:$0xff]   ;;  %v3002_v36 = vld [vmem:[#allocation2 + $0x14] ss:$8 sps:$4 sm:$0xff]   ;;  %v3004_v37 = vld [vmem:[#allocation2 + $0xe4] ss:$8 sps:$4 sm:$0xff]  }
  0x33   :  { %v3006_v38 = vld [vmem:[#allocation2 + $0x10] ss:$8 sps:$4 sm:$0xff]   ;;  %v3007_v39 = vld [vmem:[#allocation2 + $0xe0] ss:$8 sps:$4 sm:$0xff]   ;;  %v3008_v40 = vld [vmem:[#allocation2 + $0x24] ss:$8 sps:$4 sm:$0xff]  }
  0x34   :  { %560 = vmatpush1.bf16.msra.mxu0 %v2959_v7  ;;  %2930 = vmatpush1.bf16.msra.mxu1 %v2959_v7  ;;  %v3010_v41 = vld [vmem:[#allocation2 + $0xf4] ss:$8 sps:$4 sm:$0xff]   ;;  %v3012_v42 = vld [vmem:[#allocation2 + $0x20] ss:$8 sps:$4 sm:$0xff]   ;;  %v3013_v43 = vld [vmem:[#allocation2 + $0xf0] ss:$8 sps:$4 sm:$0xff]  }
  0x35   :  { %561 = vmatprep.subr.bf16.mxu0 %v2960_v8  ;;  %2915 = vmatprep.subr.bf16.mxu1 %v2960_v8  ;;  %v3014_v44 = vld [vmem:[#allocation2 + $0x34] ss:$8 sps:$4 sm:$0xff]   ;;  %v3016_v45 = vld [vmem:[#allocation2 + $0x104] ss:$8 sps:$4 sm:$0xff]   ;;  %v3018_v46 = vld [vmem:[#allocation2 + $0x30] ss:$8 sps:$4 sm:$0xff]  }
  0x36   :  { %v3019_v47 = vld [vmem:[#allocation2 + $0x100] ss:$8 sps:$4 sm:$0xff]   ;;  %v3020_v48 = vld [vmem:[#allocation2 + $0x44] ss:$8 sps:$4 sm:$0xff]   ;;  %v3022_v49 = vld [vmem:[#allocation2 + $0x114] ss:$8 sps:$4 sm:$0xff]  }
  0x37   :  { %v3024_v50 = vld [vmem:[#allocation2 + $0x40] ss:$8 sps:$4 sm:$0xff]   ;;  %v3025_v51 = vld [vmem:[#allocation2 + $0x110] ss:$8 sps:$4 sm:$0xff]   ;;  %v3026_v52 = vld [vmem:[#allocation2 + $0x54] ss:$8 sps:$4 sm:$0xff]  }
  0x38   :  { %562 = vmatpush1.bf16.msra.mxu0 %v2962_v9  ;;  %2931 = vmatpush1.bf16.msra.mxu1 %v2962_v9  ;;  %v3028_v53 = vld [vmem:[#allocation2 + $0x124] ss:$8 sps:$4 sm:$0xff]   ;;  %v3030_v54 = vld [vmem:[#allocation2 + $0x50] ss:$8 sps:$4 sm:$0xff]   ;;  %v3031_v55 = vld [vmem:[#allocation2 + $0x120] ss:$8 sps:$4 sm:$0xff]  }
  0x39   :  { %563 = vmatprep.subr.bf16.mxu0 %v2963_v10  ;;  %2916 = vmatprep.subr.bf16.mxu1 %v2963_v10  ;;  %v3032_v56 = vld [vmem:[#allocation2 + $0x64] ss:$8 sps:$4 sm:$0xff]   ;;  %v3034_v57 = vld [vmem:[#allocation2 + $0x134] ss:$8 sps:$4 sm:$0xff]   ;;  %v3036_v58 = vld [vmem:[#allocation2 + $0x60] ss:$8 sps:$4 sm:$0xff]  }
  0x3a   :  { %v3037_v59 = vld [vmem:[#allocation2 + $0x130] ss:$8 sps:$4 sm:$0xff]   ;;  %v3038_v60 = vld [vmem:[#allocation2 + $0x74] ss:$8 sps:$4 sm:$0xff]   ;;  %v3040_v61 = vld [vmem:[#allocation2 + $0x144] ss:$8 sps:$4 sm:$0xff]  }
  0x3b   :  { %v3042_v62 = vld [vmem:[#allocation2 + $0x70] ss:$8 sps:$4 sm:$0xff]   ;;  %v3043_v63 = vld [vmem:[#allocation2 + $0x140] ss:$8 sps:$4 sm:$0xff]   ;;  %v3044_v0 = vld [vmem:[#allocation2 + $0x84] ss:$8 sps:$4 sm:$0xff]  }
  0x3c   :  { %564 = vmatpush1.bf16.msra.mxu0 %v2965_v11  ;;  %2932 = vmatpush1.bf16.msra.mxu1 %v2965_v11  ;;  %v3046_v1 = vld [vmem:[#allocation2 + $0x154] ss:$8 sps:$4 sm:$0xff]   ;;  %v3048_v2 = vld [vmem:[#allocation2 + $0x80] ss:$8 sps:$4 sm:$0xff]   ;;  %v3049_v3 = vld [vmem:[#allocation2 + $0x150] ss:$8 sps:$4 sm:$0xff]  }
  0x3d   :  { %565 = vmatprep.subr.bf16.mxu0 %v2966_v12  ;;  %2917 = vmatprep.subr.bf16.mxu1 %v2966_v12  ;;  %v3050_v4 = vld [vmem:[#allocation2 + $0x94] ss:$8 sps:$4 sm:$0xff]   ;;  %v3052_v5 = vld [vmem:[#allocation2 + $0x164] ss:$8 sps:$4 sm:$0xff]   ;;  %v3054_v6 = vld [vmem:[#allocation2 + $0x90] ss:$8 sps:$4 sm:$0xff]  }
  0x3e   :  { %v3055_v7 = vld [vmem:[#allocation2 + $0x160] ss:$8 sps:$4 sm:$0xff]   ;;  %v3056_v8 = vld [vmem:[#allocation2 + $0xa4] ss:$8 sps:$4 sm:$0xff]   ;;  %v3058_v9 = vld [vmem:[#allocation2 + $0x174] ss:$8 sps:$4 sm:$0xff]  }
  0x3f   :  { %v3060_v10 = vld [vmem:[#allocation2 + $0xa0] ss:$8 sps:$4 sm:$0xff]   ;;  %v3061_v11 = vld [vmem:[#allocation2 + $0x170] ss:$8 sps:$4 sm:$0xff]   ;;  %v3062_v12 = vld [vmem:[#allocation2 + $0xb4] ss:$8 sps:$4 sm:$0xff]  }
  0x40   :  { %566 = vmatpush1.bf16.msra.mxu0 %v2968_v14  ;;  %2933 = vmatpush1.bf16.msra.mxu1 %v2968_v14  ;;  %v3064_v13 = vld [vmem:[#allocation2 + $0x184] ss:$8 sps:$4 sm:$0xff]   ;;  %v3066_v14 = vld [vmem:[#allocation2 + $0xb0] ss:$8 sps:$4 sm:$0xff]   ;;  %v3067_v15 = vld [vmem:[#allocation2 + $0x180] ss:$8 sps:$4 sm:$0xff]  }
  0x41   :  { %567 = vmatprep.subr.bf16.mxu0 %v2969_v16  ;;  %2918 = vmatprep.subr.bf16.mxu1 %v2969_v16  ;;  %v3068_v16 = vld [vmem:[#allocation2 + $0xc4] ss:$8 sps:$4 sm:$0xff]  }
  0x44   :  { %568 = vmatpush1.bf16.msra.mxu0 %v2971_v17  ;;  %2934 = vmatpush1.bf16.msra.mxu1 %v2971_v17  ;;  %v3070_v17 = vld [vmem:[#allocation2 + $0xc0] ss:$8 sps:$4 sm:$0xff]  }
  0x45   :  { %569 = vmatprep.subr.bf16.mxu0 %v2972_v18  ;;  %2919 = vmatprep.subr.bf16.mxu1 %v2972_v18  ;;  %v133_v18 = vlaneseq }
  0x48   :  { %570 = vmatpush1.bf16.msra.mxu0 %v2974_v19  ;;  %2935 = vmatpush1.bf16.msra.mxu1 %v2974_v19  ;;  %v134_v19 = vshrl.u32 %v133_v18, 7 }
  0x49   :  { %571 = vmatprep.subr.bf16.mxu0 %v2975_v20  ;;  %2920 = vmatprep.subr.bf16.mxu1 %v2975_v20 }
  0x4a   :  { %v3508_v20 = vsub.s32 0, %v134_v19 }
  0x4c   :  { %572 = vmatpush1.bf16.msra.mxu0 %v2977_v21  ;;  %2936 = vmatpush1.bf16.msra.mxu1 %v2977_v21  ;;  %5941 = vst [vmem:[#allocation11_spill] sm:$0xff] %v3508_v20  ;;  %v131_v21 = vld [vmem:[%s5808_s2] sm:$0x3] }
  0x4d   :  { %573 = vmatprep.subr.bf16.mxu0 %v2978_v22  ;;  %2921 = vmatprep.subr.bf16.mxu1 %v2978_v22  ;;  %v3513_v22 = vsub.s32 1, %v134_v19 }
  0x4f   :  { %5942 = vst [vmem:[#allocation12_spill] sm:$0xff] %v3513_v22 }
  0x50   :  { %574 = vmatpush1.bf16.msra.mxu0 %v2980_v23  ;;  %2937 = vmatpush1.bf16.msra.mxu1 %v2980_v23  ;;  %v3516_v23 = vrot.slane %v131_v21, %v3508_v20 }
  0x51   :  { %575 = vmatprep.subr.bf16.mxu0 %v2981_v24  ;;  %2922 = vmatprep.subr.bf16.mxu1 %v2981_v24  ;;  %v3519_v24 = vrot.slane %v131_v21, %v3513_v22 }
  0x54   :  { %576 = vmatpush1.bf16.msra.mxu0 %v2983_v25  ;;  %2938 = vmatpush1.bf16.msra.mxu1 %v2983_v25 }
  0x55   :  { %577 = vmatprep.subr.bf16.mxu0 %v2984_v26  ;;  %2923 = vmatprep.subr.bf16.mxu1 %v2984_v26 }
  0x58   :  { %578 = vmatpush1.bf16.msra.mxu0 %v2986_v27  ;;  %2939 = vmatpush1.bf16.msra.mxu1 %v2986_v27 }
  0x59   :  { %579 = vmatprep.subr.bf16.mxu0 %v2987_v28  ;;  %2924 = vmatprep.subr.bf16.mxu1 %v2987_v28 }
  0x5c   :  { %580 = vmatpush1.bf16.msra.mxu0 %v2989_v29  ;;  %2940 = vmatpush1.bf16.msra.mxu1 %v2989_v29 }
  0x5d   :  { %581 = vmatprep.subr.bf16.mxu0 %v2990_v30  ;;  %2925 = vmatprep.subr.bf16.mxu1 %v2990_v30 }
  0x60   :  { %582 = vmatpush1.bf16.msra.mxu0 %v2992_v31  ;;  %2941 = vmatpush1.bf16.msra.mxu1 %v2992_v31 }
  0x61   :  { %583 = vmatprep.subr.bf16.mxu0 %v2993_v32  ;;  %2926 = vmatprep.subr.bf16.mxu1 %v2993_v32 }
  0x64   :  { %584 = vmatpush1.bf16.msra.mxu0 %v2995_v33  ;;  %2942 = vmatpush1.bf16.msra.mxu1 %v2995_v33 }
  0x67   :  { %586 = vmatmul.mubr.bf16.vlgmr.msra.gmra.mrb[0].mxu0 %v2996_v34  ;;  %716 = vmatmul.mubr.bf16.vlgmr.msra.gmra.mrb[0].mxu1 %v2999_v35 }
  0x68   :  { %595 = vmatprep.mubr.bf16.mxu0 %v3002_v36  ;;  %725 = vmatprep.mubr.bf16.mxu1 %v3004_v37 }
  0x6f   :  { %596 = vmatmul.mubr.bf16.gmra.mrb[4].mxu0 %v3006_v38  ;;  %726 = vmatmul.mubr.bf16.gmra.mrb[4].mxu1 %v3007_v39 }
  0x70   :  { %605 = vmatprep.mubr.bf16.mxu0 %v3008_v40  ;;  %735 = vmatprep.mubr.bf16.mxu1 %v3010_v41 }
  0x77   :  { %606 = vmatmul.mubr.bf16.gmra.mrb[8].mxu0 %v3012_v42  ;;  %736 = vmatmul.mubr.bf16.gmra.mrb[8].mxu1 %v3013_v43 }
  0x78   :  { %615 = vmatprep.mubr.bf16.mxu0 %v3014_v44  ;;  %745 = vmatprep.mubr.bf16.mxu1 %v3016_v45 }
  0x7f   :  { %616 = vmatmul.mubr.bf16.gmra.mrb[12].mxu0 %v3018_v46  ;;  %746 = vmatmul.mubr.bf16.gmra.mrb[12].mxu1 %v3019_v47 }
  0x80   :  { %625 = vmatprep.mubr.bf16.mxu0 %v3020_v48  ;;  %755 = vmatprep.mubr.bf16.mxu1 %v3022_v49 }
  0x87   :  { %626 = vmatmul.mubr.bf16.gmra.mrb[16].mxu0 %v3024_v50  ;;  %756 = vmatmul.mubr.bf16.gmra.mrb[16].mxu1 %v3025_v51 }
  0x88   :  { %635 = vmatprep.mubr.bf16.mxu0 %v3026_v52  ;;  %765 = vmatprep.mubr.bf16.mxu1 %v3028_v53 }
  0x8f   :  { %636 = vmatmul.mubr.bf16.gmra.mrb[20].mxu0 %v3030_v54  ;;  %766 = vmatmul.mubr.bf16.gmra.mrb[20].mxu1 %v3031_v55 }
  0x90   :  { %645 = vmatprep.mubr.bf16.mxu0 %v3032_v56  ;;  %775 = vmatprep.mubr.bf16.mxu1 %v3034_v57 }
  0x97   :  { %646 = vmatmul.mubr.bf16.gmra.mrb[24].mxu0 %v3036_v58  ;;  %776 = vmatmul.mubr.bf16.gmra.mrb[24].mxu1 %v3037_v59 }
  0x98   :  { %655 = vmatprep.mubr.bf16.mxu0 %v3038_v60  ;;  %785 = vmatprep.mubr.bf16.mxu1 %v3040_v61 }
  0x9f   :  { %656 = vmatmul.mubr.bf16.gmra.mrb[28].mxu0 %v3042_v62  ;;  %786 = vmatmul.mubr.bf16.gmra.mrb[28].mxu1 %v3043_v63 }
  0xa0   :  { %665 = vmatprep.mubr.bf16.mxu0 %v3044_v0  ;;  %795 = vmatprep.mubr.bf16.mxu1 %v3046_v1 }
  0xa7   :  { %666 = vmatmul.mubr.bf16.gmra.mrb[32].mxu0 %v3048_v2  ;;  %796 = vmatmul.mubr.bf16.gmra.mrb[32].mxu1 %v3049_v3 }
  0xa8   :  { %675 = vmatprep.mubr.bf16.mxu0 %v3050_v4  ;;  %805 = vmatprep.mubr.bf16.mxu1 %v3052_v5 }
  0xaf   :  { %676 = vmatmul.mubr.bf16.gmra.mrb[36].mxu0 %v3054_v6  ;;  %806 = vmatmul.mubr.bf16.gmra.mrb[36].mxu1 %v3055_v7 }
  0xb0   :  { %685 = vmatprep.mubr.bf16.mxu0 %v3056_v8  ;;  %815 = vmatprep.mubr.bf16.mxu1 %v3058_v9 }
  0xb7   :  { %686 = vmatmul.mubr.bf16.gmra.mrb[40].mxu0 %v3060_v10  ;;  %816 = vmatmul.mubr.bf16.gmra.mrb[40].mxu1 %v3061_v11 }
  0xb8   :  { %695 = vmatprep.mubr.bf16.mxu0 %v3062_v12  ;;  %825 = vmatprep.mubr.bf16.mxu1 %v3064_v13 }
  0xbf   :  { %696 = vmatmul.mubr.bf16.gmra.mrb[44].mxu0 %v3066_v14  ;;  %826 = vmatmul.mubr.bf16.gmra.mrb[44].mxu1 %v3067_v15 }
  0xc0   :  { %705 = vmatprep.mubr.bf16.mxu0 %v3068_v16 }
  0xc7   :  { %706 = vmatmul.mubr.bf16.gmra.mrb[48].mxu0 %v3070_v17 }
 0x13a   :  { %v587_v25 = vpop.f32.mrb[0].mxu0  ;;  %v717_v26 = vpop.f32.mrb[0].mxu1 }
 0x13b   :  { %v588_v27 = vadd.f32 %v587_v25, %v3516_v23  ;;  %v718_v28 = vadd.f32 %v717_v26, %v3516_v23  ;;  %v589_v29 = vpop.f32.mrb[1].mxu0  ;;  %v719_v30 = vpop.f32.mrb[1].mxu1 }
 0x13c   :  { %v590_v31 = vadd.f32 %v589_v29, %v3519_v24  ;;  %v720_v32 = vadd.f32 %v719_v30, %v3519_v24  ;;  %v591_v33 = vpop.f32.mrb[2].mxu0  ;;  %v721_v34 = vpop.f32.mrb[2].mxu1 }
 0x13d   :  { %v936_v35 = vmul.f32 0.70710677, %v588_v27  ;;  %v988_v36 = vmul.f32 0.70710677, %v718_v28  ;;  %v592_v38 = vadd.f32 %v591_v33, %v3516_v23  ;;  %v3527_v39 = vadd.f32 %v721_v34, %v3516_v23  ;;  %v593_v40 = vpop.f32.mrb[3].mxu0  ;;  %v723_v41 = vpop.f32.mrb[3].mxu1 }
 0x13e   :  { %v937_v37 = vmul.f32 0.70710677, %v590_v31  ;;  %v989_v42 = vmul.f32 0.70710677, %v720_v32  ;;  %v594_v43 = vadd.f32 %v593_v40, %v3519_v24  ;;  %v3531_v45 = vadd.f32 %v723_v41, %v3519_v24 }
 0x13f   :  { %3071 = verf.f32 %v936_v35  ;;  %v938_v44 = vmul.f32 0.70710677, %v592_v38  ;;  %v990_v46 = vmul.f32 0.70710677, %v3527_v39  ;;  %v3553_v3 = vmul.f32 0.5, %v588_v27 }
 0x140   :  { %3073 = verf.f32 %v988_v36  ;;  %v939_v48 = vmul.f32 0.70710677, %v594_v43  ;;  %v991_v56 = vmul.f32 0.70710677, %v3531_v45  ;;  %v3559_v6 = vmul.f32 0.5, %v718_v28 }
 0x141   :  { %3075 = verf.f32 %v937_v37  ;;  %v3561_v7 = vmul.f32 0.5, %v590_v31  ;;  %v3564_v12 = vmul.f32 0.5, %v720_v32  ;;  %v3566_v13 = vmul.f32 0.5, %v592_v38 }
 0x142   :  { %v597_v47 = vpop.f32.mrb[4].mxu0  ;;  %v727_v50 = vpop.f32.mrb[4].mxu1  ;;  %3077 = verf.f32 %v989_v42  ;;  %v3588_v32 = vmul.f32 0.5, %v3527_v39  ;;  %v3590_v33 = vmul.f32 0.5, %v594_v43  ;;  %v3596_v38 = vmul.f32 0.5, %v3531_v45 }
 0x143   :  { %v598_v49 = vadd.f32 %v597_v47, %v3516_v23  ;;  %v599_v51 = vpop.f32.mrb[5].mxu0  ;;  %v728_v52 = vadd.f32 %v727_v50, %v3516_v23  ;;  %v729_v54 = vpop.f32.mrb[5].mxu1  ;;  %3079 = verf.f32 %v938_v44 }
 0x144   :  { %v3537_v53 = vadd.f32 %v599_v51, %v3519_v24  ;;  %v601_v55 = vpop.f32.mrb[6].mxu0  ;;  %v3541_v57 = vadd.f32 %v729_v54, %v3519_v24  ;;  %v731_v58 = vpop.f32.mrb[6].mxu1  ;;  %3081 = verf.f32 %v990_v46 }
 0x145   :  { %v603_v59 = vpop.f32.mrb[7].mxu0  ;;  %v940_v60 = vmul.f32 0.70710677, %v598_v49  ;;  %v733_v61 = vpop.f32.mrb[7].mxu1  ;;  %3083 = verf.f32 %v939_v48  ;;  %v992_v62 = vmul.f32 0.70710677, %v728_v52  ;;  %v3545_v0 = vadd.f32 %v601_v55, %v3516_v23 }
 0x146   :  { %v941_v63 = vmul.f32 0.70710677, %v3537_v53  ;;  %v3548_v1 = vadd.f32 %v731_v58, %v3516_v23  ;;  %v3551_v2 = vadd.f32 %v603_v59, %v3519_v24  ;;  %3085 = verf.f32 %v991_v56 }
 0x147   :  { %v993_v4 = vmul.f32 0.70710677, %v3541_v57  ;;  %v3557_v5 = vadd.f32 %v733_v61, %v3519_v24  ;;  %3087 = verf.f32 %v940_v60  ;;  %v942_v8 = vmul.f32 0.70710677, %v3545_v0 }
 0x148   :  { %3089 = verf.f32 %v992_v62  ;;  %v994_v14 = vmul.f32 0.70710677, %v3548_v1  ;;  %v943_v16 = vmul.f32 0.70710677, %v3551_v2  ;;  %v3598_v40 = vmul.f32 0.5, %v598_v49 }
 0x149   :  { %v3072_v11 = vpop.eup %3071  ;;  %3091 = verf.f32 %v941_v63  ;;  %v995_v26 = vmul.f32 0.70710677, %v3557_v5  ;;  %v3601_v39 = vmul.f32 0.5, %v728_v52  ;;  %v3614_v49 = vmul.f32 0.5, %v3537_v53 }
 0x14a   :  { %v607_v9 = vpop.f32.mrb[8].mxu0  ;;  %v737_v10 = vpop.f32.mrb[8].mxu1  ;;  %3093 = verf.f32 %v993_v4  ;;  %v1136_v48 = vadd.f32 1.0, %v3072_v11  ;;  %v3620_v56 = vmul.f32 0.5, %v3541_v57  ;;  %v3629_v62 = vmul.f32 0.5, %v3545_v0 }
 0x14b   :  { %v3569_v15 = vpop.eup %3073  ;;  %v3573_v17 = vadd.f32 %v607_v9, %v3516_v23  ;;  %v3576_v18 = vadd.f32 %v737_v10, %v3516_v23  ;;  %v609_v19 = vpop.f32.mrb[9].mxu0  ;;  %3095 = verf.f32 %v942_v8  ;;  %v3632_v63 = vmul.f32 0.5, %v3548_v1 }
 0x14c   :  { %v739_v21 = vpop.f32.mrb[9].mxu1  ;;  %v3076_v25 = vpop.eup %3075  ;;  %v3580_v27 = vadd.f32 %v609_v19, %v3519_v24  ;;  %3097 = verf.f32 %v994_v14  ;;  %v3638_v9 = vmul.f32 %v1136_v48, %v3553_v3 }
 0x14d   :  { %v3583_v28 = vadd.f32 %v739_v21, %v3519_v24  ;;  %v611_v29 = vpop.f32.mrb[10].mxu0  ;;  %v741_v30 = vpop.f32.mrb[10].mxu1  ;;  %v944_v34 = vmul.f32 0.70710677, %v3573_v17  ;;  %v996_v41 = vmul.f32 0.70710677, %v3576_v18  ;;  %3099 = verf.f32 %v943_v16 }
 0x14e   :  { %v3585_v31 = vpop.eup %3077  ;;  %v613_v35 = vpop.f32.mrb[11].mxu0  ;;  %v945_v43 = vmul.f32 0.70710677, %v3580_v27  ;;  %v3605_v44 = vadd.f32 %v611_v29, %v3516_v23  ;;  %3101 = verf.f32 %v995_v26  ;;  %v3611_v47 = vadd.f32 %v741_v30, %v3516_v23  ;;  %5943 = vst [vmem:[#allocation13_spill] sm:$0xff] %v3638_v9 }
 0x14f   :  { %v743_v36 = vpop.f32.mrb[11].mxu1  ;;  %v3593_v37 = vpop.eup %3079  ;;  %v997_v45 = vmul.f32 0.70710677, %v3583_v28  ;;  %3103 = verf.f32 %v944_v34  ;;  %v3617_v50 = vadd.f32 %v613_v35, %v3519_v24  ;;  %v1137_v51 = vadd.f32 1.0, %v3076_v25 }
 0x150   :  { %v3082_v42 = vpop.eup %3081  ;;  %3105 = verf.f32 %v996_v41  ;;  %v946_v58 = vmul.f32 0.70710677, %v3605_v44  ;;  %v3624_v59 = vadd.f32 %v743_v36, %v3519_v24  ;;  %v998_v57 = vmul.f32 0.70710677, %v3611_v47 }
 0x151   :  { %v3607_v46 = vpop.eup %3083  ;;  %3107 = verf.f32 %v945_v43  ;;  %v3641_v10 = vmul.f32 %v1137_v51, %v3561_v7  ;;  %v947_v16 = vmul.f32 0.70710677, %v3617_v50  ;;  %v1190_v25 = vadd.f32 1.0, %v3082_v42 }
 0x152   :  { %v617_v52 = vpop.f32.mrb[12].mxu0  ;;  %v747_v54 = vpop.f32.mrb[12].mxu1  ;;  %3109 = verf.f32 %v997_v45  ;;  %v3656_v7 = vmul.f32 0.5, %v3551_v2  ;;  %v999_v29 = vmul.f32 0.70710677, %v3624_v59  ;;  %v3664_v35 = vmul.f32 0.5, %v3557_v5 }
 0x153   :  { %v3086_v55 = vpop.eup %3085  ;;  %v749_v60 = vpop.f32.mrb[13].mxu1  ;;  %5944 = vst [vmem:[#allocation14_spill] sm:$0xff] %v3641_v10  ;;  %v3644_v11 = vadd.f32 %v617_v52, %v3516_v23  ;;  %v3648_v19 = vadd.f32 %v747_v54, %v3516_v23  ;;  %3111 = verf.f32 %v946_v58  ;;  %v1336_v30 = vadd.f32 %v3641_v10, %v3638_v9 }
 0x154   :  { %v619_v53 = vpop.f32.mrb[13].mxu0  ;;  %v3626_v61 = vpop.eup %3087  ;;  %v3651_v21 = vadd.f32 %v749_v60, %v3519_v24  ;;  %v3667_v36 = vmul.f32 0.5, %v3573_v17  ;;  %3113 = verf.f32 %v998_v57  ;;  %v1191_v43 = vadd.f32 1.0, %v3086_v55 }
 0x155   :  { %v621_v4 = vpop.f32.mrb[14].mxu0  ;;  %v3635_v8 = vpop.eup %3089  ;;  %v948_v41 = vmul.f32 0.70710677, %v3644_v11  ;;  %1337 = vadd.xlane.f32.xlu0 %v1336_v30  ;;  %v1000_v2 = vmul.f32 0.70710677, %v3648_v19  ;;  %v3674_v45 = vmul.f32 %v1190_v25, %v3588_v32  ;;  %v3677_v48 = vadd.f32 %v619_v53, %v3519_v24 }
 0x156   :  { %v751_v0 = vpop.f32.mrb[14].mxu1  ;;  %v623_v14 = vpop.f32.mrb[15].mxu0  ;;  %v3682_v17 = vmul.f32 0.5, %v3576_v18  ;;  %v3685_v51 = vmul.f32 0.5, %v3580_v27  ;;  %3115 = verf.f32 %v947_v16  ;;  %v1001_v52 = vmul.f32 0.70710677, %v3651_v21 }
 0x157   :  { %v3092_v1 = vpop.eup %3091  ;;  %v753_v3 = vpop.f32.mrb[15].mxu1  ;;  %5945 = vst [vmem:[#allocation15_spill] sm:$0xff] %v3674_v45  ;;  %v3691_v32 = vmul.f32 0.5, %v3583_v28  ;;  %3117 = verf.f32 %v999_v29  ;;  %v3694_v60 = vmul.f32 %v1191_v43, %v3596_v38  ;;  %v3697_v18 = vadd.f32 %v621_v4, %v3516_v23 }
 0x158   :  { %v3653_v26 = vpop.eup %3093  ;;  %3119 = verf.f32 %v948_v41  ;;  %v949_v16 = vmul.f32 0.70710677, %v3677_v48  ;;  %v3703_v25 = vadd.f32 %v751_v0, %v3516_v23  ;;  %v3706_v28 = vadd.f32 %v623_v14, %v3519_v24 }
 0x159   :  { %v3661_v34 = vpop.eup %3095  ;;  %5946 = vst [vmem:[#allocation16_spill] sm:$0xff] %v3694_v60  ;;  %v3711_v38 = vmul.f32 0.5, %v3605_v44  ;;  %v3714_v4 = vmul.f32 0.5, %v3611_v47  ;;  %3121 = verf.f32 %v1000_v2  ;;  %v1417_v30 = vadd.f32 %v3694_v60, %v3674_v45 }
 0x15a   :  { %v3670_v42 = vpop.eup %3097  ;;  %v627_v54 = vpop.f32.mrb[16].mxu0  ;;  %3123 = verf.f32 %v1001_v52  ;;  %v3721_v0 = vadd.f32 %v753_v3, %v3519_v24  ;;  %v1188_v14 = vadd.f32 1.0, %v3569_v15  ;;  %v1189_v44 = vadd.f32 1.0, %v3585_v31 }
 0x15b   :  { %v3679_v5 = vpop.eup %3099  ;;  %v757_v58 = vpop.f32.mrb[16].mxu1  ;;  %5947 = vst [vmem:[#allocation17_spill] sm:$0xff] %v3714_v4  ;;  %1418 = vadd.xlane.f32.xlu1 %v1417_v30  ;;  %v950_v2 = vmul.f32 0.70710677, %v3697_v18  ;;  %v1140_v60 = vadd.f32 1.0, %v3626_v61  ;;  %v1141_v45 = vadd.f32 1.0, %v3092_v1  ;;  %3125 = verf.f32 %v949_v16 }
 0x15c   :  { %v3688_v55 = vpop.eup %3101  ;;  %v629_v53 = vpop.f32.mrb[17].mxu0  ;;  %v1138_v52 = vadd.f32 1.0, %v3593_v37  ;;  %v1002_v3 = vmul.f32 0.70710677, %v3703_v25  ;;  %v951_v15 = vmul.f32 0.70710677, %v3706_v28  ;;  %v3735_v31 = vmul.f32 %v1188_v14, %v3559_v6 }
 0x15d   :  { %v759_v27 = vpop.f32.mrb[17].mxu1  ;;  %v3699_v57 = vpop.eup %3103  ;;  %v3740_v4 = vmul.f32 %v1189_v44, %v3564_v12  ;;  %v3743_v30 = vmul.f32 %v1140_v60, %v3598_v40  ;;  %v3746_v61 = vmul.f32 %v1141_v45, %v3614_v49  ;;  %v1139_v37 = vadd.f32 1.0, %v3607_v46 }
 0x15e   :  { %v3708_v29 = vpop.eup %3105  ;;  %v631_v41 = vpop.f32.mrb[18].mxu0  ;;  %5948 = vst [vmem:[#allocation18_spill] sm:$0xff] %v3735_v31  ;;  %v1003_v16 = vmul.f32 0.70710677, %v3721_v0  ;;  %v3753_v6 = vmul.f32 %v1138_v52, %v3566_v13  ;;  %v3756_v14 = vadd.f32 %v627_v54, %v3516_v23  ;;  %v3759_v12 = vadd.f32 %v757_v58, %v3516_v23 }
 0x15f   :  { %v761_v43 = vpop.f32.mrb[18].mxu1  ;;  %v3718_v22 = vpop.eup %3107  ;;  %5949 = vst [vmem:[#allocation19_spill] sm:$0xff] %v3740_v4  ;;  %5950 = vst [vmem:[#allocation20_spill] sm:$0xff] %v3743_v30  ;;  %v1414_v46 = vadd.f32 %v3740_v4, %v3735_v31  ;;  %v1342_v49 = vadd.f32 %v3746_v61, %v3743_v30  ;;  %v3770_v45 = vmul.f32 %v1139_v37, %v3590_v33  ;;  %v3782_v52 = vmul.f32 0.5, %v3617_v50 }
 0x160   :  { %v633_v20 = vpop.f32.mrb[19].mxu0  ;;  %v3725_v10 = vpop.f32.mrb[19].mxu1  ;;  %5951 = vst [vmem:[#allocation21_spill] sm:$0xff] %v3746_v61  ;;  %5952 = vst [vmem:[#allocation22_spill] sm:$0xff] %v3753_v6  ;;  %v3773_v13 = vadd.f32 %v629_v53, %v3519_v24  ;;  %v3785_v4 = vmul.f32 0.5, %v3624_v59  ;;  %3127 = verf.f32 %v950_v2  ;;  %v3791_v53 = vmul.f32 0.5, %v3644_v11 }
 0x161   :  { %v3727_v47 = vpop.eup %3109  ;;  %5953 = vst [vmem:[#allocation23_spill] sm:$0xff] %v3770_v45  ;;  %v952_v61 = vmul.f32 0.70710677, %v3756_v14  ;;  %3129 = verf.f32 %v1002_v3  ;;  %1415 = vadd.xlane.f32.xlu0 %v1414_v46  ;;  %1343 = vadd.xlane.f32.xlu1 %v1342_v49  ;;  %v1004_v37 = vmul.f32 0.70710677, %v3759_v12  ;;  %v3795_v30 = vadd.f32 %v759_v27, %v3519_v24 }
 0x162   :  { %v3737_v9 = vpop.eup %3111  ;;  %v3761_v40 = vpop.f32.mrb[20].mxu0  ;;  %5954 = vst [vmem:[#allocation24_spill] sm:$0xff] %v3785_v4  ;;  %5955 = vst [vmem:[#allocation25_spill] sm:$0xff] %v3791_v53  ;;  %3131 = verf.f32 %v951_v15  ;;  %v953_v31 = vmul.f32 0.70710677, %v3773_v13  ;;  %v3805_v11 = vadd.f32 %v631_v41, %v3516_v23  ;;  %v3808_v3 = vadd.f32 %v761_v43, %v3516_v23 }
 0x163   :  { %v3749_v1 = vpop.eup %3113  ;;  %v3763_v60 = vpop.f32.mrb[20].mxu1  ;;  %v3817_v53 = vmul.f32 0.5, %v3648_v19  ;;  %3133 = verf.f32 %v1003_v16  ;;  %v1339_v15 = vadd.f32 %v3770_v45, %v3753_v6  ;;  %v3825_v43 = vmul.f32 0.5, %v3651_v21 }
 0x164   :  { %v3775_v54 = vpop.f32.mrb[21].mxu0  ;;  %v3777_v58 = vpop.f32.mrb[21].mxu1  ;;  %v3828_v4 = vmul.f32 0.5, %v3677_v48  ;;  %3135 = verf.f32 %v952_v61  ;;  %v3834_v19 = vmul.f32 0.5, %v3697_v18  ;;  %v954_v16 = vmul.f32 0.70710677, %v3805_v11 }
 0x165   :  { %v3779_v44 = vpop.eup %3115  ;;  %v3797_v50 = vpop.f32.mrb[22].mxu0  ;;  %5958 = vst [vmem:[#allocation28_spill] sm:$0xff] %v3817_v53  ;;  %5960 = vst [vmem:[#allocation30_spill] sm:$0xff] %v3825_v43  ;;  %1340 = vadd.xlane.f32.xlu0 %v1339_v15  ;;  %3137 = verf.f32 %v1004_v37  ;;  %v3839_v45 = vadd.f32 %v3725_v10, %v3519_v24  ;;  %v3844_v48 = vmul.f32 0.5, %v3703_v25  ;;  %v1142_v61 = vadd.f32 1.0, %v3661_v34 }
 0x166   :  { %v3788_v33 = vpop.eup %3117  ;;  %v3799_v59 = vpop.f32.mrb[22].mxu1  ;;  %5961 = vst [vmem:[#allocation31_spill] sm:$0xff] %v3834_v19  ;;  %3139 = verf.f32 %v953_v31  ;;  %v1143_v37 = vadd.f32 1.0, %v3679_v5  ;;  %v1192_v10 = vadd.f32 1.0, %v3635_v8  ;;  %v1193_v6 = vadd.f32 1.0, %v3653_v26 }
 0x167   :  { %v3801_v2 = vpop.eup %3119  ;;  %v3810_v46 = vpop.f32.mrb[23].mxu0  ;;  %5962 = vst [vmem:[#allocation32_spill] sm:$0xff] %v3844_v48  ;;  %v3861_v48 = vmul.f32 %v1142_v61, %v3629_v62  ;;  %v1194_v34 = vadd.f32 1.0, %v3670_v42  ;;  %v1195_v53 = vadd.f32 1.0, %v3688_v55  ;;  %v1007_v8 = vmul.f32 0.70710677, %v3839_v45 }
 0x168   :  { %5956 = vst [vmem:[#allocation26_spill] sm:$0xff] %v3801_v2  ;;  %v3812_v49 = vpop.f32.mrb[23].mxu1  ;;  %v3814_v27 = vpop.eup %3121  ;;  %v1005_v2 = vmul.f32 0.70710677, %v3795_v30  ;;  %v3871_v26 = vmul.f32 %v1143_v37, %v3656_v7  ;;  %v3874_v19 = vmul.f32 %v1192_v10, %v3601_v39  ;;  %v1144_v7 = vadd.f32 1.0, %v3699_v57 }
 0x169   :  { %5957 = vst [vmem:[#allocation27_spill] sm:$0xff] %v3814_v27  ;;  %v3822_v41 = vpop.eup %3123  ;;  %v3831_v27 = vadd.f32 %v633_v20, %v3519_v24  ;;  %v1006_v20 = vmul.f32 0.70710677, %v3808_v3  ;;  %5963 = vst [vmem:[#allocation33_spill] sm:$0xff] %v3861_v48  ;;  %v3886_v61 = vmul.f32 %v1194_v34, %v3632_v63  ;;  %v1145_v39 = vadd.f32 1.0, %v3718_v22 }
 0x16a   :  { %5959 = vst [vmem:[#allocation29_spill] sm:$0xff] %v3822_v41  ;;  %v3841_v21 = vpop.eup %3125  ;;  %v3848_v18 = vpop.f32.mrb[24].mxu0  ;;  %3141 = verf.f32 %v1005_v2  ;;  %5965 = vst [vmem:[#allocation35_spill] sm:$0xff] %v3871_v26  ;;  %v3877_v41 = vmul.f32 %v1193_v6, %v3620_v56  ;;  %v1345_v56 = vadd.f32 %v3871_v26, %v3861_v48  ;;  %v3901_v10 = vadd.f32 %v3761_v40, %v3516_v23 }
 0x16b   :  { %v3850_v15 = vpop.f32.mrb[24].mxu1  ;;  %v3855_v43 = vpop.f32.mrb[25].mxu0  ;;  %v955_v31 = vmul.f32 0.70710677, %v3831_v27  ;;  %5966 = vst [vmem:[#allocation36_spill] sm:$0xff] %v3874_v19  ;;  %5968 = vst [vmem:[#allocation38_spill] sm:$0xff] %v3886_v61  ;;  %v3905_v63 = vadd.f32 %v3763_v60, %v3516_v23  ;;  %3143 = verf.f32 %v954_v16  ;;  %v3910_v22 = vmul.f32 %v1144_v7, %v3667_v36 }
 0x16c   :  { %v3857_v25 = vpop.f32.mrb[25].mxu1  ;;  %v3865_v2 = vpop.f32.mrb[26].mxu0  ;;  %5967 = vst [vmem:[#allocation37_spill] sm:$0xff] %v3877_v41  ;;  %v1420_v6 = vadd.f32 %v3877_v41, %v3874_v19  ;;  %v3913_v57 = vmul.f32 %v1145_v39, %v3685_v51  ;;  %v3922_v40 = vmul.f32 0.5, %v3706_v28  ;;  %3145 = verf.f32 %v1006_v20  ;;  %1346 = vadd.xlane.f32.xlu1 %v1345_v56 }
 0x16d   :  { %v3867_v5 = vpop.f32.mrb[26].mxu1  ;;  %v3879_v62 = vpop.f32.mrb[27].mxu0  ;;  %5970 = vst [vmem:[#allocation40_spill] sm:$0xff] %v3910_v22  ;;  %v956_v60 = vmul.f32 0.70710677, %v3901_v10  ;;  %3147 = verf.f32 %v955_v31  ;;  %v3933_v7 = vadd.f32 %v3777_v58, %v3519_v24  ;;  %v3942_v56 = vmul.f32 0.5, %v3721_v0 }
 0x16e   :  { %5964 = vst [vmem:[#allocation34_spill] sm:$0xff] %v3867_v5  ;;  %v3881_v42 = vpop.f32.mrb[27].mxu1  ;;  %v3883_v55 = vpop.eup %3127  ;;  %v3889_v5 = vmul.f32 %v1195_v53, %v3664_v35  ;;  %5971 = vst [vmem:[#allocation41_spill] sm:$0xff] %v3913_v57  ;;  %v3917_v53 = vadd.f32 %v3775_v54, %v3519_v24  ;;  %1421 = vadd.xlane.f32.xlu0 %v1420_v6  ;;  %v1008_v36 = vmul.f32 0.70710677, %v3905_v63  ;;  %3149 = verf.f32 %v1007_v8 }
 0x16f   :  { %v3893_v37 = vpop.eup %3129  ;;  %v1348_v51 = vadd.f32 %v3913_v57, %v3910_v22  ;;  %v3948_v6 = vadd.f32 %v3797_v50, %v3516_v23  ;;  %v3957_v41 = vmul.f32 0.5, %v3756_v14  ;;  %3151 = verf.f32 %v956_v60 }
 0x170   :  { %5969 = vst [vmem:[#allocation39_spill] sm:$0xff] %v3889_v5  ;;  %v3907_v35 = vpop.eup %3131  ;;  %v957_v54 = vmul.f32 0.70710677, %v3917_v53  ;;  %v1423_v31 = vadd.f32 %v3889_v5, %v3886_v61  ;;  %v1009_v0 = vmul.f32 0.70710677, %v3933_v7  ;;  %v3962_v8 = vadd.f32 %v3799_v59, %v3516_v23 }
 0x171   :  { %v3919_v34 = vpop.eup %3133  ;;  %v3971_v19 = vmul.f32 0.5, %v3759_v12  ;;  %v3974_v26 = vmul.f32 0.5, %v3773_v13  ;;  %3153 = verf.f32 %v1008_v36  ;;  %v3978_v14 = vadd.f32 %v3810_v46, %v3519_v24 }
 0x172   :  { %v3926_v16 = vpop.eup %3135  ;;  %v3935_v28 = vpop.f32.mrb[28].mxu0  ;;  %1424 = vadd.xlane.f32.xlu1 %v1423_v31  ;;  %1349 = vadd.xlane.f32.xlu0 %v1348_v51  ;;  %v3985_v48 = vmul.f32 0.5, %v3795_v30  ;;  %v3988_v12 = vmul.f32 0.5, %v3805_v11  ;;  %3155 = verf.f32 %v957_v54  ;;  %v958_v13 = vmul.f32 0.70710677, %v3948_v6 }
 0x173   :  { %v3937_v20 = vpop.f32.mrb[28].mxu1  ;;  %v3939_v39 = vpop.eup %3137  ;;  %5972 = vst [vmem:[#allocation42_spill] sm:$0xff] %v3971_v19  ;;  %v3992_v51 = vmul.f32 0.5, %v3808_v3  ;;  %3157 = verf.f32 %v1009_v0  ;;  %v3996_v46 = vadd.f32 %v3812_v49, %v3519_v24  ;;  %v1146_v36 = vadd.f32 1.0, %v3737_v9  ;;  %v5982_v19 = vld [vmem:[#allocation24_spill] sm:$0xff] }
 0x174   :  { %v3950_v57 = vpop.f32.mrb[29].mxu0  ;;  %v3952_v58 = vpop.f32.mrb[29].mxu1  ;;  %5973 = vst [vmem:[#allocation43_spill] sm:$0xff] %v3985_v48  ;;  %v1010_v31 = vmul.f32 0.70710677, %v3962_v8  ;;  %v1147_v30 = vadd.f32 1.0, %v3779_v44  ;;  %3159 = verf.f32 %v958_v13 }
 0x175   :  { %v3954_v22 = vpop.eup %3139  ;;  %v3964_v5 = vpop.f32.mrb[30].mxu0  ;;  %5974 = vst [vmem:[#allocation44_spill] sm:$0xff] %v3992_v51  ;;  %v1196_v11 = vadd.f32 1.0, %v3708_v29  ;;  %v1197_v54 = vadd.f32 1.0, %v3727_v47  ;;  %v959_v48 = vmul.f32 0.70710677, %v3978_v14  ;;  %v4005_v3 = vmul.f32 %v1146_v36, %v3711_v38 }
 0x176   :  { %v3966_v50 = vpop.f32.mrb[30].mxu1  ;;  %v3968_v61 = vpop.eup %3141  ;;  %v1198_v0 = vadd.f32 1.0, %v3749_v1  ;;  %v1199_v49 = vadd.f32 1.0, %v3788_v33  ;;  %v4012_v9 = vmul.f32 %v1147_v30, %v3782_v52  ;;  %v5980_v1 = vld [vmem:[#allocation17_spill] sm:$0xff]  ;;  %v5984_v52 = vld [vmem:[#allocation26_spill] sm:$0xff]  ;;  %3161 = verf.f32 %v1010_v31 }
 0x177   :  { %v3980_v59 = vpop.f32.mrb[31].mxu0  ;;  %v3982_v60 = vpop.f32.mrb[31].mxu1  ;;  %5975 = vst [vmem:[#allocation45_spill] sm:$0xff] %v4005_v3  ;;  %v4015_v44 = vmul.f32 %v1196_v11, %v3682_v17  ;;  %v4018_v29 = vmul.f32 %v1197_v54, %v3691_v32  ;;  %v1148_v30 = vadd.f32 1.0, %v5984_v52  ;;  %v1149_v17 = vadd.f32 1.0, %v3841_v21 }
 0x178   :  { %v4009_v51 = vpop.eup %3143  ;;  %5976 = vst [vmem:[#allocation46_spill] sm:$0xff] %v4012_v9  ;;  %v4027_v33 = vmul.f32 %v1198_v0, %v5980_v1  ;;  %v4030_v13 = vmul.f32 %v1199_v49, %v5982_v19  ;;  %v4046_v19 = vadd.f32 %v3848_v18, %v3516_v23  ;;  %v4050_v49 = vadd.f32 %v3850_v15, %v3516_v23 }
 0x179   :  { %5977 = vst [vmem:[#allocation47_spill] sm:$0xff] %v4015_v44  ;;  %5978 = vst [vmem:[#allocation48_spill] sm:$0xff] %v4018_v29  ;;  %v4024_v36 = vpop.eup %3145  ;;  %v1426_v0 = vadd.f32 %v4018_v29, %v4015_v44  ;;  %v4063_v29 = vmul.f32 %v1149_v17, %v3828_v4  ;;  %v4067_v18 = vadd.f32 %v3855_v43, %v3519_v24  ;;  %3163 = verf.f32 %v959_v48  ;;  %v5992_v48 = vld [vmem:[#allocation34_spill] sm:$0xff] }
 0x17a   :  { %v4020_v47 = vpop.f32.mrb[32].mxu0  ;;  %v4022_v38 = vpop.f32.mrb[32].mxu1  ;;  %5981 = vst [vmem:[#allocation17_spill] sm:$0xff] %v4027_v33  ;;  %5983 = vst [vmem:[#allocation24_spill] sm:$0xff] %v4030_v13  ;;  %v960_v4 = vmul.f32 0.70710677, %v4046_v19 }
 0x17b   :  { %5979 = vst [vmem:[#allocation49_spill] sm:$0xff] %v4022_v38  ;;  %v4034_v11 = vpop.f32.mrb[33].mxu0  ;;  %v4036_v32 = vpop.f32.mrb[33].mxu1  ;;  %v1351_v38 = vadd.f32 %v4012_v9, %v4005_v3  ;;  %v5989_v9 = vld [vmem:[#allocation25_spill] sm:$0xff]  ;;  %5991 = vst [vmem:[#allocation53_spill] sm:$0xff] %v4063_v29  ;;  %1427 = vadd.xlane.f32.xlu0 %v1426_v0  ;;  %v4102_v0 = vadd.f32 %v5992_v48, %v3516_v23  ;;  %v4121_v48 = vadd.f32 %v3879_v62, %v3519_v24 }
 0x17c   :  { %5985 = vst [vmem:[#allocation26_spill] sm:$0xff] %v4034_v11  ;;  %5986 = vst [vmem:[#allocation50_spill] sm:$0xff] %v4036_v32  ;;  %v4038_v54 = vpop.eup %3147  ;;  %v4052_v21 = vpop.f32.mrb[34].mxu0  ;;  %v1011_v32 = vmul.f32 0.70710677, %v3996_v46  ;;  %v4060_v3 = vmul.f32 %v1148_v30, %v5989_v9  ;;  %v4079_v11 = vmul.f32 0.5, %v3839_v45  ;;  %v1429_v45 = vadd.f32 %v4030_v13, %v4027_v33 }
 0x17d   :  { %5987 = vst [vmem:[#allocation51_spill] sm:$0xff] %v4052_v21  ;;  %v4054_v1 = vpop.f32.mrb[34].mxu1  ;;  %v4056_v52 = vpop.eup %3149  ;;  %1352 = vadd.xlane.f32.xlu1 %v1351_v38  ;;  %v1012_v30 = vmul.f32 0.70710677, %v4050_v49  ;;  %v961_v31 = vmul.f32 0.70710677, %v4067_v18  ;;  %v4098_v38 = vadd.f32 %v3865_v2, %v3516_v23 }
 0x17e   :  { %5988 = vst [vmem:[#allocation52_spill] sm:$0xff] %v4054_v1  ;;  %5990 = vst [vmem:[#allocation25_spill] sm:$0xff] %v4060_v3  ;;  %v4069_v15 = vpop.f32.mrb[35].mxu0  ;;  %v4071_v44 = vpop.f32.mrb[35].mxu1  ;;  %v4076_v1 = vmul.f32 0.5, %v3831_v27  ;;  %v1354_v43 = vadd.f32 %v4063_v29, %v4060_v3  ;;  %v4089_v27 = vadd.f32 %v3857_v25, %v3519_v24  ;;  %v4107_v25 = vmul.f32 0.5, %v3901_v10 }
 0x17f   :  { %v4073_v21 = vpop.eup %3151  ;;  %v4110_v3 = vmul.f32 0.5, %v3905_v63  ;;  %3165 = verf.f32 %v1011_v32  ;;  %v4114_v33 = vmul.f32 0.5, %v3917_v53  ;;  %v4117_v2 = vmul.f32 0.5, %v3933_v7 }
 0x180   :  { %v4082_v9 = vpop.eup %3153  ;;  %v1013_v13 = vmul.f32 0.70710677, %v4089_v27  ;;  %1355 = vadd.xlane.f32.xlu0 %v1354_v43  ;;  %3167 = verf.f32 %v960_v4  ;;  %v4128_v32 = vmul.f32 0.5, %v3948_v6  ;;  %v4131_v53 = vmul.f32 0.5, %v3962_v8 }
 0x181   :  { %v4091_v17 = vpop.eup %3155  ;;  %5994 = vst [vmem:[#allocation54_spill] sm:$0xff] %v4110_v3  ;;  %5995 = vst [vmem:[#allocation55_spill] sm:$0xff] %v4117_v2  ;;  %1430 = vadd.xlane.f32.xlu1 %v1429_v45  ;;  %3169 = verf.f32 %v1012_v30  ;;  %v962_v7 = vmul.f32 0.70710677, %v4098_v38  ;;  %v1014_v62 = vmul.f32 0.70710677, %v4102_v0  ;;  %v4141_v43 = vadd.f32 %v3881_v42, %v3519_v24 }
 0x182   :  { %v4104_v29 = vpop.eup %3157  ;;  %v4123_v10 = vpop.f32.mrb[36].mxu0  ;;  %5998 = vst [vmem:[#allocation58_spill] sm:$0xff] %v4128_v32  ;;  %5999 = vst [vmem:[#allocation59_spill] sm:$0xff] %v4131_v53  ;;  %3171 = verf.f32 %v961_v31  ;;  %v1150_v6 = vadd.f32 1.0, %v3883_v55  ;;  %v1151_v30 = vadd.f32 1.0, %v3907_v35  ;;  %v6004_v53 = vld [vmem:[#allocation29_spill] sm:$0xff] }
 0x183   :  { %5993 = vst [vmem:[#allocation34_spill] sm:$0xff] %v4104_v29  ;;  %5996 = vst [vmem:[#allocation56_spill] sm:$0xff] %v4123_v10  ;;  %v4125_v63 = vpop.f32.mrb[36].mxu1  ;;  %v4134_v45 = vpop.f32.mrb[37].mxu0  ;;  %3173 = verf.f32 %v1013_v13  ;;  %v6003_v10 = vld [vmem:[#allocation27_spill] sm:$0xff]  ;;  %v1201_v2 = vadd.f32 1.0, %v6004_v53 }
 0x184   :  { %5997 = vst [vmem:[#allocation57_spill] sm:$0xff] %v4125_v63  ;;  %6000 = vst [vmem:[#allocation60_spill] sm:$0xff] %v4134_v45  ;;  %v4136_v4 = vpop.eup %3159  ;;  %v4144_v63 = vpop.f32.mrb[37].mxu1  ;;  %v1200_v45 = vadd.f32 1.0, %v6003_v10  ;;  %v963_v42 = vmul.f32 0.70710677, %v4121_v48  ;;  %3175 = verf.f32 %v962_v7  ;;  %v4164_v35 = vmul.f32 %v1151_v30, %v3922_v40 }
 0x185   :  { %6001 = vst [vmem:[#allocation61_spill] sm:$0xff] %v4144_v63  ;;  %v4146_v8 = vpop.f32.mrb[38].mxu0  ;;  %v4151_v31 = vpop.f32.mrb[38].mxu1  ;;  %v6007_v32 = vld [vmem:[#allocation31_spill] sm:$0xff]  ;;  %v1202_v55 = vadd.f32 1.0, %v3893_v37  ;;  %v6010_v10 = vld [vmem:[#allocation28_spill] sm:$0xff]  ;;  %v4190_v30 = vadd.f32 %v3935_v28, %v3516_v23  ;;  %3177 = verf.f32 %v1014_v62 }
 0x186   :  { %6002 = vst [vmem:[#allocation62_spill] sm:$0xff] %v4146_v8  ;;  %6005 = vst [vmem:[#allocation27_spill] sm:$0xff] %v4151_v31  ;;  %v4153_v3 = vpop.f32.mrb[39].mxu0  ;;  %v4157_v29 = vmul.f32 %v1150_v6, %v6007_v32  ;;  %v1203_v8 = vadd.f32 1.0, %v3919_v34  ;;  %v4161_v13 = vpop.f32.mrb[39].mxu1  ;;  %v4167_v53 = vmul.f32 %v1200_v45, %v6010_v10  ;;  %v6012_v31 = vld [vmem:[#allocation30_spill] sm:$0xff]  ;;  %3179 = verf.f32 %v963_v42 }
 0x187   :  { %6006 = vst [vmem:[#allocation29_spill] sm:$0xff] %v4153_v3  ;;  %6009 = vst [vmem:[#allocation63_spill] sm:$0xff] %v4164_v35  ;;  %v4170_v3 = vmul.f32 %v1201_v2, %v6012_v31  ;;  %v4172_v63 = vpop.eup %3161  ;;  %v6014_v32 = vld [vmem:[#allocation32_spill] sm:$0xff]  ;;  %v1152_v34 = vadd.f32 1.0, %v3926_v16  ;;  %v1153_v7 = vadd.f32 1.0, %v3954_v22  ;;  %v4205_v31 = vadd.f32 %v3950_v57, %v3519_v24 }
 0x188   :  { %6008 = vst [vmem:[#allocation31_spill] sm:$0xff] %v4157_v29  ;;  %6011 = vst [vmem:[#allocation28_spill] sm:$0xff] %v4167_v53  ;;  %v4175_v6 = vmul.f32 %v1202_v55, %v6014_v32  ;;  %v4178_v37 = vmul.f32 %v1203_v8, %v3942_v56  ;;  %v4182_v40 = vpop.eup %3163  ;;  %v1357_v45 = vadd.f32 %v4164_v35, %v4157_v29  ;;  %v1015_v16 = vmul.f32 0.70710677, %v4141_v43 }
 0x189   :  { %6013 = vst [vmem:[#allocation30_spill] sm:$0xff] %v4170_v3  ;;  %v1432_v2 = vadd.f32 %v4170_v3, %v4167_v53  ;;  %v4194_v56 = vadd.f32 %v3937_v20, %v3516_v23  ;;  %v4198_v22 = vmul.f32 %v1152_v34, %v3957_v41  ;;  %v4201_v8 = vmul.f32 %v1153_v7, %v3974_v26  ;;  %v4211_v10 = vpop.eup %3165 }
 0x18a   :  { %6015 = vst [vmem:[#allocation32_spill] sm:$0xff] %v4175_v6  ;;  %6016 = vst [vmem:[#allocation64_spill] sm:$0xff] %v4178_v37  ;;  %v4207_v55 = vpop.f32.mrb[40].mxu0  ;;  %v4209_v28 = vpop.f32.mrb[40].mxu1  ;;  %v4214_v20 = vmul.f32 0.5, %v3978_v14  ;;  %v4217_v32 = vmul.f32 0.5, %v3996_v46  ;;  %1358 = vadd.xlane.f32.xlu1 %v1357_v45  ;;  %v4227_v14 = vadd.f32 %v3952_v58, %v3519_v24  ;;  %v1435_v45 = vadd.f32 %v4178_v37, %v4175_v6 }
 0x18b   :  { %6017 = vst [vmem:[#allocation65_spill] sm:$0xff] %v4198_v22  ;;  %6018 = vst [vmem:[#allocation66_spill] sm:$0xff] %v4201_v8  ;;  %1433 = vadd.xlane.f32.xlu0 %v1432_v2  ;;  %v964_v41 = vmul.f32 0.70710677, %v4190_v30  ;;  %v4220_v26 = vpop.eup %3167  ;;  %v1360_v57 = vadd.f32 %v4201_v8, %v4198_v22  ;;  %v1016_v34 = vmul.f32 0.70710677, %v4194_v56  ;;  %v4240_v2 = vadd.f32 %v3964_v5, %v3516_v23 }
 0x18c   :  { %v4229_v7 = vpop.f32.mrb[41].mxu0  ;;  %v4231_v46 = vpop.f32.mrb[41].mxu1  ;;  %v965_v42 = vmul.f32 0.70710677, %v4205_v31  ;;  %v4244_v8 = vadd.f32 %v3966_v50, %v3516_v23  ;;  %v4253_v53 = vmul.f32 0.5, %v4046_v19  ;;  %v4256_v37 = vmul.f32 0.5, %v4050_v49 }
 0x18d   :  { %6019 = vst [vmem:[#allocation67_spill] sm:$0xff] %v4231_v46  ;;  %v4233_v62 = vpop.eup %3169  ;;  %v4246_v58 = vpop.f32.mrb[42].mxu0  ;;  %3181 = verf.f32 %v1015_v16  ;;  %v1017_v5 = vmul.f32 0.70710677, %v4227_v14  ;;  %v4266_v29 = vmul.f32 0.5, %v4067_v18  ;;  %v4273_v19 = vadd.f32 %v3980_v59, %v3519_v24 }
 0x18e   :  { %6020 = vst [vmem:[#allocation68_spill] sm:$0xff] %v4246_v58  ;;  %v4248_v22 = vpop.f32.mrb[42].mxu1  ;;  %v4250_v3 = vpop.eup %3171  ;;  %1436 = vadd.xlane.f32.xlu1 %v1435_v45  ;;  %3183 = verf.f32 %v964_v41  ;;  %v4276_v49 = vmul.f32 0.5, %v4098_v38  ;;  %v4279_v16 = vmul.f32 0.5, %v4102_v0  ;;  %v4283_v18 = vadd.f32 %v3982_v60, %v3519_v24  ;;  %v6032_v58 = vld [vmem:[#allocation43_spill] sm:$0xff] }
 0x18f   :  { %6021 = vst [vmem:[#allocation69_spill] sm:$0xff] %v4248_v22  ;;  %v4259_v6 = vpop.f32.mrb[43].mxu0  ;;  %v4261_v35 = vpop.f32.mrb[43].mxu1  ;;  %v4269_v22 = vmul.f32 0.5, %v4089_v27  ;;  %1361 = vadd.xlane.f32.xlu0 %v1360_v57  ;;  %3185 = verf.f32 %v1016_v34  ;;  %v966_v41 = vmul.f32 0.70710677, %v4240_v2 }
 0x190   :  { %6022 = vst [vmem:[#allocation70_spill] sm:$0xff] %v4259_v6  ;;  %6023 = vst [vmem:[#allocation71_spill] sm:$0xff] %v4261_v35  ;;  %v4263_v50 = vpop.eup %3173  ;;  %3187 = verf.f32 %v965_v42  ;;  %v1018_v57 = vmul.f32 0.70710677, %v4244_v8  ;;  %v1154_v59 = vadd.f32 1.0, %v4009_v51  ;;  %v1155_v38 = vadd.f32 1.0, %v4038_v54 }
 0x191   :  { %v4285_v27 = vpop.eup %3175  ;;  %3189 = verf.f32 %v1017_v5  ;;  %v1204_v0 = vadd.f32 1.0, %v3939_v39  ;;  %v1205_v34 = vadd.f32 1.0, %v3968_v61  ;;  %v967_v35 = vmul.f32 0.70710677, %v4273_v19 }
 0x192   :  { %v4293_v45 = vpop.f32.mrb[44].mxu0  ;;  %v4295_v60 = vpop.f32.mrb[44].mxu1  ;;  %v4299_v42 = vmul.f32 %v1154_v59, %v3988_v12  ;;  %v1206_v6 = vadd.f32 1.0, %v4024_v36  ;;  %v1207_v51 = vadd.f32 1.0, %v4056_v52  ;;  %v1019_v39 = vmul.f32 0.70710677, %v4283_v18 }
 0x193   :  { %6024 = vst [vmem:[#allocation72_spill] sm:$0xff] %v4293_v45  ;;  %6025 = vst [vmem:[#allocation73_spill] sm:$0xff] %v4295_v60  ;;  %v4303_v5 = vpop.f32.mrb[45].mxu0  ;;  %v4305_v54 = vpop.f32.mrb[45].mxu1  ;;  %v4309_v61 = vmul.f32 %v1155_v38, %v4076_v1  ;;  %v6030_v45 = vld [vmem:[#allocation42_spill] sm:$0xff]  ;;  %v4315_v46 = vmul.f32 %v1205_v34, %v6032_v58  ;;  %v6036_v59 = vld [vmem:[#allocation44_spill] sm:$0xff]  ;;  %3191 = verf.f32 %v966_v41 }
 0x194   :  { %6026 = vst [vmem:[#allocation74_spill] sm:$0xff] %v4299_v42  ;;  %6027 = vst [vmem:[#allocation75_spill] sm:$0xff] %v4303_v5  ;;  %v4312_v60 = vmul.f32 %v1204_v0, %v6030_v45  ;;  %v4317_v12 = vpop.f32.mrb[46].mxu0  ;;  %v4319_v36 = vpop.f32.mrb[46].mxu1  ;;  %v4324_v5 = vmul.f32 %v1206_v6, %v6036_v59  ;;  %v1156_v1 = vadd.f32 1.0, %v4073_v21  ;;  %v1157_v38 = vadd.f32 1.0, %v4091_v17 }
 0x195   :  { %6028 = vst [vmem:[#allocation76_spill] sm:$0xff] %v4305_v54  ;;  %6029 = vst [vmem:[#allocation77_spill] sm:$0xff] %v4309_v61  ;;  %v4321_v52 = vpop.eup %3177  ;;  %v4327_v54 = vmul.f32 %v1207_v51, %v4079_v11  ;;  %v4331_v0 = vpop.f32.mrb[47].mxu0  ;;  %v1363_v45 = vadd.f32 %v4309_v61, %v4299_v42  ;;  %v4343_v11 = vadd.f32 %v4020_v47, %v3516_v23  ;;  %v6041_v21 = vld [vmem:[#allocation49_spill] sm:$0xff]  ;;  %v6044_v61 = vld [vmem:[#allocation26_spill] sm:$0xff]  ;;  %v4362_v47 = vmul.f32 0.5, %v4121_v48 }
 0x196   :  { %6031 = vst [vmem:[#allocation42_spill] sm:$0xff] %v4312_v60  ;;  %6033 = vst [vmem:[#allocation43_spill] sm:$0xff] %v4315_v46  ;;  %v4333_v58 = vpop.f32.mrb[47].mxu1  ;;  %v4335_v34 = vpop.eup %3179  ;;  %v1438_v6 = vadd.f32 %v4315_v46, %v4312_v60  ;;  %v4347_v51 = vadd.f32 %v6041_v21, %v3516_v23  ;;  %v4350_v17 = vmul.f32 %v1156_v1, %v4107_v25  ;;  %3193 = verf.f32 %v1018_v57 }
 0x197   :  { %6034 = vst [vmem:[#allocation78_spill] sm:$0xff] %v4317_v12  ;;  %6035 = vst [vmem:[#allocation79_spill] sm:$0xff] %v4319_v36  ;;  %v4353_v59 = vmul.f32 %v1157_v38, %v4114_v33  ;;  %v4357_v42 = vadd.f32 %v6044_v61, %v3519_v24  ;;  %v4359_v46 = vpop.eup %3181  ;;  %1364 = vadd.xlane.f32.xlu1 %v1363_v45  ;;  %v968_v41 = vmul.f32 0.70710677, %v4343_v11  ;;  %3195 = verf.f32 %v967_v35  ;;  %v6045_v38 = vld [vmem:[#allocation50_spill] sm:$0xff]  ;;  %v6046_v35 = vld [vmem:[#allocation51_spill] sm:$0xff] }
 0x198   :  { %6037 = vst [vmem:[#allocation44_spill] sm:$0xff] %v4324_v5  ;;  %6038 = vst [vmem:[#allocation80_spill] sm:$0xff] %v4327_v54  ;;  %1439 = vadd.xlane.f32.xlu0 %v1438_v6  ;;  %v1020_v25 = vmul.f32 0.70710677, %v4347_v51  ;;  %v4366_v1 = vpop.eup %3183  ;;  %v4373_v21 = vadd.f32 %v6045_v38, %v3519_v24  ;;  %v4378_v57 = vmul.f32 0.5, %v4141_v43  ;;  %3197 = verf.f32 %v1019_v39  ;;  %v6048_v43 = vld [vmem:[#allocation52_spill] sm:$0xff] }
 0x199   :  { %6039 = vst [vmem:[#allocation81_spill] sm:$0xff] %v4331_v0  ;;  %6040 = vst [vmem:[#allocation82_spill] sm:$0xff] %v4333_v58  ;;  %v1366_v33 = vadd.f32 %v4353_v59, %v4350_v17  ;;  %v969_v61 = vmul.f32 0.70710677, %v4357_v42  ;;  %v4375_v48 = vpop.eup %3185  ;;  %v1441_v45 = vadd.f32 %v4327_v54, %v4324_v5  ;;  %v4384_v6 = vadd.f32 %v6046_v35, %v3516_v23 }
 0x19a   :  { %6042 = vst [vmem:[#allocation49_spill] sm:$0xff] %v4350_v17  ;;  %6043 = vst [vmem:[#allocation83_spill] sm:$0xff] %v4353_v59  ;;  %v4386_v59 = vpop.f32.mrb[48].mxu0  ;;  %v4388_v17 = vpop.eup %3187  ;;  %v4391_v38 = vmul.f32 0.5, %v4190_v30  ;;  %3199 = verf.f32 %v968_v41  ;;  %v1021_v60 = vmul.f32 0.70710677, %v4373_v21  ;;  %v4396_v39 = vadd.f32 %v6048_v43, %v3516_v23 }
 0x19b   :  { %6047 = vst [vmem:[#allocation26_spill] sm:$0xff] %v4386_v59  ;;  %v4398_v58 = vpop.f32.mrb[49].mxu0  ;;  %v4400_v54 = vpop.eup %3189  ;;  %v4403_v35 = vmul.f32 0.5, %v4194_v56  ;;  %v4406_v5 = vmul.f32 0.5, %v4205_v31  ;;  %1442 = vadd.xlane.f32.xlu1 %v1441_v45  ;;  %3201 = verf.f32 %v1020_v25  ;;  %v4410_v30 = vadd.f32 %v4069_v15, %v3519_v24  ;;  %v6054_v45 = vld [vmem:[#allocation34_spill] sm:$0xff] }
 0x19c   :  { %6049 = vst [vmem:[#allocation50_spill] sm:$0xff] %v4398_v58  ;;  %1367 = vadd.xlane.f32.xlu0 %v1366_v33  ;;  %v4412_v41 = vpop.f32.mrb[50].mxu0  ;;  %v4415_v43 = vmul.f32 0.5, %v4227_v14  ;;  %v4418_v58 = vmul.f32 0.5, %v4240_v2  ;;  %3203 = verf.f32 %v969_v61  ;;  %v4422_v56 = vadd.f32 %v4071_v44, %v3519_v24  ;;  %v6055_v59 = vld [vmem:[#allocation58_spill] sm:$0xff] }
 0x19d   :  { %6050 = vst [vmem:[#allocation51_spill] sm:$0xff] %v4412_v41  ;;  %v4424_v31 = vpop.f32.mrb[51].mxu0  ;;  %v4427_v25 = vmul.f32 0.5, %v4244_v8  ;;  %3205 = verf.f32 %v1021_v60  ;;  %v970_v15 = vmul.f32 0.70710677, %v4384_v6  ;;  %v1158_v33 = vadd.f32 1.0, %v4136_v4  ;;  %v4441_v0 = vpop.eup %3191 }
 0x19e   :  { %6051 = vst [vmem:[#allocation52_spill] sm:$0xff] %v4415_v43  ;;  %6052 = vst [vmem:[#allocation84_spill] sm:$0xff] %v4424_v31  ;;  %v1022_v14 = vmul.f32 0.70710677, %v4396_v39  ;;  %v1159_v2 = vadd.f32 1.0, %v4182_v40  ;;  %v1208_v61 = vadd.f32 1.0, %v4082_v9 }
 0x19f   :  { %6053 = vst [vmem:[#allocation85_spill] sm:$0xff] %v4427_v25  ;;  %v1209_v41 = vadd.f32 1.0, %v6054_v45  ;;  %v971_v44 = vmul.f32 0.70710677, %v4410_v30  ;;  %v4437_v31 = vmul.f32 %v1158_v33, %v6055_v59  ;;  %v1210_v8 = vadd.f32 1.0, %v4172_v63  ;;  %v6057_v40 = vld [vmem:[#allocation54_spill] sm:$0xff] }
 0x1a0   :  { %v1211_v60 = vadd.f32 1.0, %v4211_v10  ;;  %v1023_v4 = vmul.f32 0.70710677, %v4422_v56  ;;  %v4445_v36 = vmul.f32 %v1159_v2, %v4214_v20  ;;  %v4448_v9 = vmul.f32 %v1208_v61, %v6057_v40  ;;  %v6059_v45 = vld [vmem:[#allocation55_spill] sm:$0xff]  ;;  %v4453_v25 = vpop.eup %3193  ;;  %v6064_v61 = vld [vmem:[#allocation56_spill] sm:$0xff] }
 0x1a1   :  { %v4451_v12 = vmul.f32 %v1209_v41, %v6059_v45  ;;  %v6061_v59 = vld [vmem:[#allocation59_spill] sm:$0xff]  ;;  %v1160_v10 = vadd.f32 1.0, %v4220_v26  ;;  %v1161_v43 = vadd.f32 1.0, %v4250_v3  ;;  %v4463_v20 = vpop.eup %3195  ;;  %v4471_v40 = vadd.f32 %v6064_v61, %v3516_v23  ;;  %v6068_v45 = vld [vmem:[#allocation60_spill] sm:$0xff] }
 0x1a2   :  { %6056 = vst [vmem:[#allocation34_spill] sm:$0xff] %v4445_v36  ;;  %6058 = vst [vmem:[#allocation58_spill] sm:$0xff] %v4448_v9  ;;  %v4456_v33 = vmul.f32 %v1210_v8, %v6061_v59  ;;  %v4459_v63 = vmul.f32 %v1211_v60, %v4217_v32  ;;  %v1369_v2 = vadd.f32 %v4445_v36, %v4437_v31  ;;  %v6065_v8 = vld [vmem:[#allocation57_spill] sm:$0xff]  ;;  %v4477_v60 = vpop.eup %3197  ;;  %3207 = verf.f32 %v970_v15 }
 0x1a3   :  { %6060 = vst [vmem:[#allocation54_spill] sm:$0xff] %v4451_v12  ;;  %v1444_v41 = vadd.f32 %v4451_v12, %v4448_v9  ;;  %v4475_v32 = vadd.f32 %v6065_v8, %v3516_v23  ;;  %v4480_v3 = vmul.f32 %v1160_v10, %v4253_v53  ;;  %v4483_v26 = vmul.f32 %v1161_v43, %v4266_v29  ;;  %v6069_v8 = vld [vmem:[#allocation61_spill] sm:$0xff]  ;;  %v6071_v9 = vld [vmem:[#allocation27_spill] sm:$0xff] }
 0x1a4   :  { %6062 = vst [vmem:[#allocation55_spill] sm:$0xff] %v4456_v33  ;;  %6063 = vst [vmem:[#allocation59_spill] sm:$0xff] %v4459_v63  ;;  %v4487_v59 = vadd.f32 %v6068_v45, %v3519_v24  ;;  %v4489_v12 = vpop.eup %3199  ;;  %v4492_v61 = vmul.f32 0.5, %v4273_v19  ;;  %3209 = verf.f32 %v1022_v14  ;;  %1370 = vadd.xlane.f32.xlu1 %v1369_v2  ;;  %v972_v15 = vmul.f32 0.70710677, %v4471_v40 }
 0x1a5   :  { %6066 = vst [vmem:[#allocation56_spill] sm:$0xff] %v4480_v3  ;;  %6067 = vst [vmem:[#allocation57_spill] sm:$0xff] %v4483_v26  ;;  %1445 = vadd.xlane.f32.xlu0 %v1444_v41  ;;  %v1024_v53 = vmul.f32 0.70710677, %v4475_v32  ;;  %v4496_v10 = vpop.eup %3201  ;;  %3211 = verf.f32 %v971_v44  ;;  %v1372_v29 = vadd.f32 %v4483_v26, %v4480_v3  ;;  %v4503_v45 = vadd.f32 %v6069_v8, %v3519_v24  ;;  %v6070_v44 = vld [vmem:[#allocation62_spill] sm:$0xff] }
 0x1a6   :  { %v973_v43 = vmul.f32 0.70710677, %v4487_v59  ;;  %v4505_v19 = vpop.eup %3203  ;;  %v4508_v14 = vmul.f32 0.5, %v4283_v18  ;;  %3213 = verf.f32 %v1023_v4  ;;  %v1447_v2 = vadd.f32 %v4459_v63, %v4456_v33 }
 0x1a7   :  { %v4514_v41 = vadd.f32 %v6070_v44, %v3516_v23  ;;  %v4516_v26 = vpop.eup %3205  ;;  %v4519_v3 = vmul.f32 0.5, %v4343_v11  ;;  %3215 = verf.f32 %v972_v15  ;;  %v1025_v8 = vmul.f32 0.70710677, %v4503_v45  ;;  %v6072_v44 = vld [vmem:[#allocation29_spill] sm:$0xff] }
 0x1a8   :  { %v4524_v18 = vadd.f32 %v6071_v9, %v3516_v23  ;;  %v4527_v4 = vmul.f32 0.5, %v4347_v51  ;;  %v4530_v63 = vmul.f32 0.5, %v4357_v42  ;;  %1448 = vadd.xlane.f32.xlu1 %v1447_v2  ;;  %3217 = verf.f32 %v1024_v53 }
 0x1a9   :  { %1373 = vadd.xlane.f32.xlu0 %v1372_v29  ;;  %v4534_v11 = vadd.f32 %v6072_v44, %v3519_v24  ;;  %v4537_v15 = vmul.f32 0.5, %v4373_v21  ;;  %v4540_v33 = vmul.f32 0.5, %v4384_v6  ;;  %3219 = verf.f32 %v973_v43 }
 0x1aa   :  { %v4544_v51 = vadd.f32 %v4161_v13, %v3519_v24  ;;  %v4547_v42 = vmul.f32 0.5, %v4396_v39  ;;  %3221 = verf.f32 %v1025_v8  ;;  %v974_v9 = vmul.f32 0.70710677, %v4514_v41 }
 0x1ab   :  { %v1162_v53 = vadd.f32 1.0, %v4285_v27  ;;  %v1026_v29 = vmul.f32 0.70710677, %v4524_v18  ;;  %v1163_v21 = vadd.f32 1.0, %v4335_v34  ;;  %v1212_v6 = vadd.f32 1.0, %v4233_v62 }
 0x1ac   :  { %v1213_v43 = vadd.f32 1.0, %v4263_v50  ;;  %v975_v2 = vmul.f32 0.70710677, %v4534_v11  ;;  %v1214_v39 = vadd.f32 1.0, %v4321_v52  ;;  %v1215_v8 = vadd.f32 1.0, %v4359_v46  ;;  %v4561_v44 = vpop.eup %3207 }
 0x1ad   :  { %v4557_v13 = vmul.f32 %v1162_v53, %v4276_v49  ;;  %v1027_v27 = vmul.f32 0.70710677, %v4544_v51  ;;  %v4565_v36 = vmul.f32 %v1163_v21, %v4362_v47  ;;  %v4568_v62 = vmul.f32 %v1212_v6, %v4256_v37 }
 0x1ae   :  { %v4571_v50 = vmul.f32 %v1213_v43, %v4269_v22  ;;  %v4573_v34 = vpop.eup %3209  ;;  %v4576_v49 = vmul.f32 %v1214_v39, %v4279_v16  ;;  %v4579_v46 = vmul.f32 %v1215_v8, %v4378_v57  ;;  %v1164_v52 = vadd.f32 1.0, %v4366_v1  ;;  %v6081_v39 = vld [vmem:[#allocation67_spill] sm:$0xff] }
 0x1af   :  { %6073 = vst [vmem:[#allocation60_spill] sm:$0xff] %v4557_v13  ;;  %6074 = vst [vmem:[#allocation61_spill] sm:$0xff] %v4565_v36  ;;  %v1165_v53 = vadd.f32 1.0, %v4388_v17  ;;  %v4583_v47 = vpop.eup %3211  ;;  %v1375_v37 = vadd.f32 %v4565_v36, %v4557_v13  ;;  %v4591_v21 = vadd.f32 %v4207_v55, %v3516_v23  ;;  %v4595_v16 = vadd.f32 %v4209_v28, %v3516_v23 }
 0x1b0   :  { %6075 = vst [vmem:[#allocation62_spill] sm:$0xff] %v4568_v62  ;;  %6076 = vst [vmem:[#allocation27_spill] sm:$0xff] %v4571_v50  ;;  %v1450_v22 = vadd.f32 %v4571_v50, %v4568_v62  ;;  %v4597_v57 = vpop.eup %3213  ;;  %3223 = verf.f32 %v974_v9  ;;  %v4600_v17 = vmul.f32 %v1164_v52, %v4391_v38  ;;  %v4607_v6 = vadd.f32 %v4229_v7, %v3519_v24  ;;  %v6082_v52 = vld [vmem:[#allocation68_spill] sm:$0xff] }
 0x1b1   :  { %6077 = vst [vmem:[#allocation29_spill] sm:$0xff] %v4576_v49  ;;  %6078 = vst [vmem:[#allocation86_spill] sm:$0xff] %v4579_v46  ;;  %v4603_v1 = vmul.f32 %v1165_v53, %v4406_v5  ;;  %v4609_v43 = vpop.eup %3215  ;;  %v4612_v55 = vmul.f32 0.5, %v4410_v30  ;;  %3225 = verf.f32 %v1026_v29  ;;  %1376 = vadd.xlane.f32.xlu1 %v1375_v37  ;;  %v976_v28 = vmul.f32 0.70710677, %v4591_v21 }
 0x1b2   :  { %6079 = vst [vmem:[#allocation87_spill] sm:$0xff] %v4600_v17  ;;  %1451 = vadd.xlane.f32.xlu0 %v1450_v22  ;;  %v1028_v38 = vmul.f32 0.70710677, %v4595_v16  ;;  %v4616_v9 = vpop.eup %3217  ;;  %3227 = verf.f32 %v975_v2  ;;  %v977_v7 = vmul.f32 0.70710677, %v4607_v6  ;;  %v4623_v8 = vadd.f32 %v6081_v39, %v3519_v24  ;;  %v6083_v2 = vld [vmem:[#allocation69_spill] sm:$0xff] }
 0x1b3   :  { %6080 = vst [vmem:[#allocation88_spill] sm:$0xff] %v4603_v1  ;;  %v1378_v5 = vadd.f32 %v4603_v1, %v4600_v17  ;;  %v4625_v30 = vpop.eup %3219  ;;  %3229 = verf.f32 %v1027_v27  ;;  %v1453_v29 = vadd.f32 %v4579_v46, %v4576_v49  ;;  %v4631_v53 = vadd.f32 %v6082_v52, %v3516_v23  ;;  %v6084_v27 = vld [vmem:[#allocation70_spill] sm:$0xff] }
 0x1b4   :  { %v4635_v37 = vadd.f32 %v6083_v2, %v3516_v23  ;;  %v4637_v22 = vpop.eup %3221  ;;  %v4640_v1 = vmul.f32 0.5, %v4422_v56  ;;  %3231 = verf.f32 %v976_v28  ;;  %v1029_v39 = vmul.f32 0.70710677, %v4623_v8 }
 0x1b5   :  { %v4645_v17 = vadd.f32 %v6084_v27, %v3519_v24  ;;  %v4648_v46 = vmul.f32 0.5, %v4471_v40  ;;  %v4651_v52 = vmul.f32 0.5, %v4475_v32  ;;  %1454 = vadd.xlane.f32.xlu1 %v1453_v29  ;;  %3233 = verf.f32 %v1028_v38  ;;  %v6085_v27 = vld [vmem:[#allocation71_spill] sm:$0xff] }
 0x1b6   :  { %1379 = vadd.xlane.f32.xlu0 %v1378_v5  ;;  %v978_v2 = vmul.f32 0.70710677, %v4631_v53  ;;  %v4655_v56 = vmul.f32 0.5, %v4487_v59  ;;  %v4658_v28 = vmul.f32 0.5, %v4503_v45  ;;  %3235 = verf.f32 %v977_v7 }
 0x1b7   :  { %v4662_v49 = vadd.f32 %v6085_v27, %v3519_v24  ;;  %v4665_v40 = vmul.f32 0.5, %v4514_v41  ;;  %3237 = verf.f32 %v1029_v39  ;;  %v1030_v32 = vmul.f32 0.70710677, %v4635_v37 }
 0x1b8   :  { %v1166_v38 = vadd.f32 1.0, %v4441_v0  ;;  %v979_v5 = vmul.f32 0.70710677, %v4645_v17  ;;  %v1167_v59 = vadd.f32 1.0, %v4463_v20  ;;  %v1216_v45 = vadd.f32 1.0, %v4375_v48  ;;  %v6089_v48 = vld [vmem:[#allocation52_spill] sm:$0xff] }
 0x1b9   :  { %v1217_v7 = vadd.f32 1.0, %v4400_v54  ;;  %3239 = verf.f32 %v978_v2  ;;  %v1218_v41 = vadd.f32 1.0, %v4453_v25  ;;  %v1219_v39 = vadd.f32 1.0, %v4477_v60 }
 0x1ba   :  { %v4674_v29 = vmul.f32 %v1166_v38, %v4418_v58  ;;  %v4678_v27 = vpop.eup %3223  ;;  %v1031_v0 = vmul.f32 0.70710677, %v4662_v49  ;;  %v4682_v50 = vmul.f32 %v1167_v59, %v4492_v61  ;;  %v4685_v20 = vmul.f32 %v1216_v45, %v4403_v35  ;;  %v6091_v58 = vld [vmem:[#allocation85_spill] sm:$0xff]  ;;  %v6094_v45 = vld [vmem:[#allocation72_spill] sm:$0xff] }
 0x1bb   :  { %v4688_v54 = vmul.f32 %v1217_v7, %v6089_v48  ;;  %v4690_v2 = vpop.eup %3225  ;;  %v4693_v38 = vmul.f32 %v1218_v41, %v6091_v58  ;;  %v4696_v25 = vmul.f32 %v1219_v39, %v4508_v14  ;;  %v1168_v60 = vadd.f32 1.0, %v4489_v12  ;;  %v6095_v41 = vld [vmem:[#allocation73_spill] sm:$0xff]  ;;  %v6098_v48 = vld [vmem:[#allocation75_spill] sm:$0xff] }
 0x1bc   :  { %6086 = vst [vmem:[#allocation67_spill] sm:$0xff] %v4674_v29  ;;  %6087 = vst [vmem:[#allocation68_spill] sm:$0xff] %v4682_v50  ;;  %v1169_v62 = vadd.f32 1.0, %v4505_v19  ;;  %v4700_v61 = vpop.eup %3227  ;;  %v1381_v35 = vadd.f32 %v4682_v50, %v4674_v29  ;;  %v4708_v7 = vadd.f32 %v6094_v45, %v3516_v23  ;;  %v4712_v14 = vadd.f32 %v6095_v41, %v3516_v23  ;;  %v6099_v41 = vld [vmem:[#allocation76_spill] sm:$0xff] }
 0x1bd   :  { %6088 = vst [vmem:[#allocation69_spill] sm:$0xff] %v4685_v20  ;;  %6090 = vst [vmem:[#allocation70_spill] sm:$0xff] %v4688_v54  ;;  %v1456_v59 = vadd.f32 %v4688_v54, %v4685_v20  ;;  %v4714_v39 = vpop.eup %3229  ;;  %3241 = verf.f32 %v1030_v32  ;;  %v4717_v12 = vmul.f32 %v1168_v60, %v4519_v3  ;;  %v4724_v58 = vadd.f32 %v6098_v48, %v3519_v24 }
 0x1be   :  { %6092 = vst [vmem:[#allocation71_spill] sm:$0xff] %v4693_v38  ;;  %6093 = vst [vmem:[#allocation52_spill] sm:$0xff] %v4696_v25  ;;  %v4720_v19 = vmul.f32 %v1169_v62, %v4530_v63  ;;  %v4726_v54 = vpop.eup %3231  ;;  %v4729_v45 = vmul.f32 0.5, %v4524_v18  ;;  %3243 = verf.f32 %v979_v5  ;;  %1382 = vadd.xlane.f32.xlu1 %v1381_v35  ;;  %v980_v32 = vmul.f32 0.70710677, %v4708_v7  ;;  %v6100_v35 = vld [vmem:[#allocation78_spill] sm:$0xff] }
 0x1bf   :  { %6096 = vst [vmem:[#allocation85_spill] sm:$0xff] %v4717_v12  ;;  %1457 = vadd.xlane.f32.xlu0 %v1456_v59  ;;  %v1032_v3 = vmul.f32 0.70710677, %v4712_v14  ;;  %v4733_v60 = vpop.eup %3233  ;;  %3245 = verf.f32 %v1031_v0  ;;  %v981_v62 = vmul.f32 0.70710677, %v4724_v58  ;;  %v4740_v48 = vadd.f32 %v6099_v41, %v3519_v24  ;;  %v6101_v0 = vld [vmem:[#allocation79_spill] sm:$0xff] }
 0x1c0   :  { %6097 = vst [vmem:[#allocation72_spill] sm:$0xff] %v4720_v19  ;;  %v1384_v63 = vadd.f32 %v4720_v19, %v4717_v12  ;;  %v4742_v18 = vpop.eup %3235  ;;  %v1459_v5 = vadd.f32 %v4696_v25, %v4693_v38  ;;  %v4748_v59 = vadd.f32 %v6100_v35, %v3516_v23  ;;  %v4752_v20 = vadd.f32 %v6101_v0, %v3516_v23  ;;  %v6102_v19 = vld [vmem:[#allocation81_spill] sm:$0xff]  ;;  %v6103_v0 = vld [vmem:[#allocation82_spill] sm:$0xff] }
 0x1c1   :  { %v4756_v12 = vadd.f32 %v6102_v19, %v3519_v24  ;;  %v4758_v50 = vpop.eup %3237  ;;  %v4761_v41 = vmul.f32 0.5, %v4534_v11  ;;  %v4764_v29 = vmul.f32 0.5, %v4544_v51  ;;  %3247 = verf.f32 %v980_v32 }
 0x1c2   :  { %v1033_v35 = vmul.f32 0.70710677, %v4740_v48  ;;  %v4768_v25 = vmul.f32 0.5, %v4591_v21  ;;  %1460 = vadd.xlane.f32.xlu1 %v1459_v5  ;;  %3249 = verf.f32 %v1032_v3  ;;  %v982_v19 = vmul.f32 0.70710677, %v4748_v59 }
 0x1c3   :  { %1385 = vadd.xlane.f32.xlu0 %v1384_v63  ;;  %v4773_v38 = vadd.f32 %v6103_v0, %v3519_v24  ;;  %v4775_v11 = vpop.eup %3239  ;;  %v4778_v51 = vmul.f32 0.5, %v4595_v16  ;;  %v4781_v32 = vmul.f32 0.5, %v4607_v6  ;;  %3251 = verf.f32 %v981_v62 }
 0x1c4   :  { %v1034_v21 = vmul.f32 0.70710677, %v4752_v20  ;;  %v4785_v63 = vmul.f32 0.5, %v4623_v8  ;;  %3253 = verf.f32 %v1033_v35  ;;  %v983_v3 = vmul.f32 0.70710677, %v4756_v12 }
 0x1c5   :  { %v1170_v5 = vadd.f32 1.0, %v4561_v44  ;;  %3255 = verf.f32 %v982_v19  ;;  %v1171_v0 = vadd.f32 1.0, %v4583_v47  ;;  %v1220_v16 = vadd.f32 1.0, %v4496_v10 }
 0x1c6   :  { %v1221_v36 = vadd.f32 1.0, %v4516_v26  ;;  %v1035_v6 = vmul.f32 0.70710677, %v4773_v38  ;;  %v1222_v8 = vadd.f32 1.0, %v4573_v34  ;;  %v1223_v35 = vadd.f32 1.0, %v4597_v57 }
 0x1c7   :  { %v4794_v62 = vmul.f32 %v1170_v5, %v4540_v33  ;;  %v4798_v13 = vpop.eup %3241  ;;  %3257 = verf.f32 %v1034_v21  ;;  %v4801_v44 = vmul.f32 %v1171_v0, %v4612_v55  ;;  %v4804_v47 = vmul.f32 %v1220_v16, %v4527_v4  ;;  %v6109_v5 = vld [vmem:[#allocation51_spill] sm:$0xff] }
 0x1c8   :  { %v4807_v26 = vmul.f32 %v1221_v36, %v4537_v15  ;;  %v3244_v10 = vpop.eup %3243  ;;  %v4810_v33 = vmul.f32 %v1222_v8, %v4547_v42  ;;  %v4813_v34 = vmul.f32 %v1223_v35, %v4640_v1  ;;  %v1172_v57 = vadd.f32 1.0, %v4609_v43  ;;  %v6105_v15 = vld [vmem:[#allocation26_spill] sm:$0xff] }
 0x1c9   :  { %v1173_v19 = vadd.f32 1.0, %v4625_v30  ;;  %v4817_v21 = vpop.eup %3245  ;;  %v1387_v4 = vadd.f32 %v4801_v44, %v4794_v62  ;;  %v4825_v55 = vadd.f32 %v6105_v15, %v3516_v23  ;;  %v6106_v42 = vld [vmem:[#allocation50_spill] sm:$0xff]  ;;  %3259 = verf.f32 %v983_v3 }
 0x1ca   :  { %6104 = vst [vmem:[#allocation73_spill] sm:$0xff] %v4813_v34  ;;  %v1462_v36 = vadd.f32 %v4807_v26, %v4804_v47  ;;  %v4829_v1 = vadd.f32 %v6106_v42, %v3519_v24  ;;  %v4832_v43 = vmul.f32 %v1172_v57, %v4648_v46  ;;  %v4839_v0 = vadd.f32 %v6109_v5, %v3516_v23  ;;  %v6110_v57 = vld [vmem:[#allocation84_spill] sm:$0xff] }
 0x1cb   :  { %v4835_v30 = vmul.f32 %v1173_v19, %v4655_v56  ;;  %v3248_v16 = vpop.eup %3247  ;;  %v878_v8 = vmul.f32 0.5, %v4631_v53  ;;  %3261 = verf.f32 %v1035_v6  ;;  %1388 = vadd.xlane.f32.xlu1 %v1387_v4  ;;  %v984_v35 = vmul.f32 0.70710677, %v4825_v55 }
 0x1cc   :  { %6107 = vst [vmem:[#allocation75_spill] sm:$0xff] %v4832_v43  ;;  %1463 = vadd.xlane.f32.xlu0 %v1462_v36  ;;  %v985_v3 = vmul.f32 0.70710677, %v4829_v1  ;;  %v4844_v15 = vpop.eup %3249  ;;  %v1465_v46 = vadd.f32 %v4813_v34, %v4810_v33  ;;  %v986_v23 = vmul.f32 0.70710677, %v4839_v0  ;;  %v4853_v53 = vadd.f32 %v6110_v57, %v3519_v24 }
 0x1cd   :  { %6108 = vst [vmem:[#allocation76_spill] sm:$0xff] %v4835_v30  ;;  %v1390_v56 = vadd.f32 %v4835_v30, %v4832_v43  ;;  %v3252_v6 = vpop.eup %3251  ;;  %3263 = verf.f32 %v984_v35  ;;  %v1174_v19 = vadd.f32 1.0, %v4678_v27  ;;  %v1175_v4 = vadd.f32 1.0, %v4700_v61 }
 0x1ce   :  { %v1224_v36 = vadd.f32 1.0, %v4616_v9  ;;  %v3254_v42 = vpop.eup %3253  ;;  %v879_v5 = vmul.f32 0.5, %v4645_v17  ;;  %v880_v34 = vmul.f32 0.5, %v4708_v7  ;;  %3265 = verf.f32 %v985_v3 }
 0x1cf   :  { %v1225_v30 = vadd.f32 1.0, %v4637_v22  ;;  %v3256_v43 = vpop.eup %3255  ;;  %1466 = vadd.xlane.f32.xlu1 %v1465_v46  ;;  %v987_v24 = vmul.f32 0.70710677, %v4853_v53  ;;  %v4863_v35 = vmul.f32 %v1174_v19, %v4665_v40  ;;  %v4866_v27 = vmul.f32 %v1175_v4, %v4761_v41 }
 0x1d0   :  { %1391 = vadd.xlane.f32.xlu0 %v1390_v56  ;;  %v4869_v9 = vmul.f32 %v1224_v36, %v4651_v52  ;;  %3267 = verf.f32 %v986_v23  ;;  %v1226_v22 = vadd.f32 1.0, %v4690_v2  ;;  %v1227_v61 = vadd.f32 1.0, %v4714_v39 }
 0x1d1   :  { %v4872_v17 = vmul.f32 %v1225_v30, %v4658_v28  ;;  %v3258_v7 = vpop.eup %3257  ;;  %v1393_v3 = vadd.f32 %v4866_v27, %v4863_v35  ;;  %v1176_v40 = vadd.f32 1.0, %v4726_v54  ;;  %v1177_v41 = vadd.f32 1.0, %v4742_v18 }
 0x1d2   :  { %v1178_v46 = vadd.f32 1.0, %v4775_v11  ;;  %v4884_v28 = vmul.f32 %v1226_v22, %v4729_v45  ;;  %v4887_v2 = vmul.f32 %v1227_v61, %v4764_v29  ;;  %v1179_v39 = vadd.f32 1.0, %v3244_v10 }
 0x1d3   :  { %v1468_v52 = vadd.f32 %v4872_v17, %v4869_v9  ;;  %3269 = verf.f32 %v987_v24  ;;  %1394 = vadd.xlane.f32.xlu1 %v1393_v3  ;;  %v4890_v30 = vmul.f32 %v1176_v40, %v4768_v25  ;;  %v4893_v54 = vmul.f32 %v1177_v41, %v4781_v32  ;;  %v3260_v11 = vpop.eup %3259 }
 0x1d4   :  { %v1228_v18 = vadd.f32 1.0, %v4733_v60  ;;  %v1471_v45 = vadd.f32 %v4887_v2, %v4884_v28  ;;  %v4898_v56 = vmul.f32 %v1178_v46, %v878_v8  ;;  %v4900_v29 = vmul.f32 %v1179_v39, %v879_v5 }
 0x1d5   :  { %1469 = vadd.xlane.f32.xlu0 %v1468_v52  ;;  %v1229_v10 = vadd.f32 1.0, %v4758_v50  ;;  %v3262_v23 = vpop.eup %3261  ;;  %v1396_v25 = vadd.f32 %v4893_v54, %v4890_v30  ;;  %v1230_v32 = vadd.f32 1.0, %v4798_v13  ;;  %v1231_v57 = vadd.f32 1.0, %v4817_v21 }
 0x1d6   :  { %v1180_v60 = vadd.f32 1.0, %v3248_v16  ;;  %v881_v19 = vmul.f32 0.5, %v4724_v58  ;;  %v4909_v4 = vmul.f32 %v1228_v18, %v4778_v51  ;;  %v1181_v36 = vadd.f32 1.0, %v3252_v6 }
 0x1d7   :  { %v4912_v8 = vmul.f32 %v1229_v10, %v4785_v63  ;;  %v3264_v5 = vpop.eup %3263  ;;  %v930_v50 = vmul.f32 0.5, %v4635_v37  ;;  %v931_v24 = vmul.f32 0.5, %v4662_v49  ;;  %1472 = vadd.xlane.f32.xlu1 %v1471_v45  ;;  %v1182_v22 = vadd.f32 1.0, %v3256_v43 }
 0x1d8   :  { %v3266_v13 = vpop.eup %3265  ;;  %v4916_v21 = vmul.f32 %v1180_v60, %v880_v34  ;;  %v4918_v16 = vmul.f32 %v1181_v36, %v881_v19  ;;  %v1183_v58 = vadd.f32 1.0, %v3260_v11  ;;  %v882_v51 = vmul.f32 0.5, %v4748_v59 }
 0x1d9   :  { %1397 = vadd.xlane.f32.xlu0 %v1396_v25  ;;  %v1399_v63 = vadd.f32 %v4900_v29, %v4898_v56  ;;  %v4923_v6 = vmul.f32 %v1230_v32, %v930_v50  ;;  %v4925_v61 = vmul.f32 %v1231_v57, %v931_v24  ;;  %v883_v49 = vmul.f32 0.5, %v4756_v12 }
 0x1da   :  { %v3268_v37 = vpop.eup %3267  ;;  %v1474_v43 = vadd.f32 %v4912_v8, %v4909_v4  ;;  %v1232_v34 = vadd.f32 1.0, %v4844_v15  ;;  %v1233_v3 = vadd.f32 1.0, %v3254_v42  ;;  %v932_v40 = vmul.f32 0.5, %v4712_v14 }
 0x1db   :  { %v933_v59 = vmul.f32 0.5, %v4740_v48  ;;  %1400 = vadd.xlane.f32.xlu1 %v1399_v63  ;;  %v4933_v41 = vmul.f32 %v1182_v22, %v882_v51  ;;  %v1402_v46 = vadd.f32 %v4918_v16, %v4916_v21  ;;  %v4937_v52 = vmul.f32 %v1183_v58, %v883_v49  ;;  %v6111_v51 = vld [vmem:[#allocation13_spill] sm:$0xff] }
 0x1dc   :  { %v1184_v12 = vadd.f32 1.0, %v3264_v5  ;;  %v1185_v39 = vadd.f32 1.0, %v3266_v13  ;;  %v1477_v15 = vadd.f32 %v4925_v61, %v4923_v6  ;;  %v1234_v42 = vadd.f32 1.0, %v3258_v7 }
 0x1dd   :  { %1475 = vadd.xlane.f32.xlu0 %v1474_v43  ;;  %v3270_v18 = vpop.eup %3269  ;;  %v1235_v11 = vadd.f32 1.0, %v3262_v23  ;;  %v884_v14 = vmul.f32 0.5, %v4825_v55  ;;  %v885_v48 = vmul.f32 0.5, %v4829_v1  ;;  %v4943_v45 = vmul.f32 %v1232_v34, %v932_v40 }
 0x1de   :  { %v4945_v10 = vmul.f32 %v1233_v3, %v933_v59  ;;  %v934_v25 = vmul.f32 0.5, %v4752_v20  ;;  %v935_v32 = vmul.f32 0.5, %v4773_v38  ;;  %v1405_v57 = vadd.f32 %v4937_v52, %v4933_v41 }
 0x1df   :  { %1478 = vadd.xlane.f32.xlu1 %v1477_v15  ;;  %v4951_v60 = vmul.f32 %v1184_v12, %v884_v14  ;;  %v4953_v7 = vmul.f32 %v1185_v39, %v885_v48  ;;  %v1186_v23 = vadd.f32 1.0, %v3268_v37  ;;  %v1187_v19 = vadd.f32 1.0, %v3270_v18  ;;  %v6113_v18 = vld [vmem:[#allocation18_spill] sm:$0xff]  ;;  %v6115_v14 = vld [vmem:[#allocation20_spill] sm:$0xff] }
 0x1e0   :  { %v4955_v55 = vmul.f32 %v1234_v42, %v934_v25  ;;  %v4957_v1 = vmul.f32 %v1235_v11, %v935_v32  ;;  %v1480_v20 = vadd.f32 %v4945_v10, %v4943_v45  ;;  %v886_v38 = vmul.f32 0.5, %v4839_v0  ;;  %v6114_v42 = vld [vmem:[#allocation19_spill] sm:$0xff]  ;;  %v6116_v25 = vld [vmem:[#allocation21_spill] sm:$0xff] }
 0x1e1   :  { %1403 = vadd.xlane.f32.xlu0 %v1402_v46  ;;  %v887_v36 = vmul.f32 0.5, %v4853_v53  ;;  %v1408_v5 = vadd.f32 %v4953_v7, %v4951_v60  ;;  %v6112_v53 = vld [vmem:[#allocation14_spill] sm:$0xff] }
 0x1e2   :  { %v1483_v50 = vadd.f32 %v4957_v1, %v4955_v55  ;;  %v4967_v24 = vmul.f32 %v1186_v23, %v886_v38  ;;  %v1338_v13 = vpop.xlane.xlu0 %1337 }
 0x1e3   :  { %1406 = vadd.xlane.f32.xlu1 %v1405_v57  ;;  %v4969_v22 = vmul.f32 %v1187_v19, %v887_v36  ;;  %v1487_v58 = vmul.f32 0.00390625, %v1338_v13  ;;  %v6117_v36 = vld [vmem:[#allocation15_spill] sm:$0xff] }
 0x1e5   :  { %1481 = vadd.xlane.f32.xlu0 %v1480_v20  ;;  %v4972_v0 = vsub.f32 %v6111_v51, %v1487_v58  ;;  %v4975_v63 = vsub.f32 %v6112_v53, %v1487_v58  ;;  %v1411_v37 = vadd.f32 %v4969_v22, %v4967_v24  ;;  %v6119_v51 = vld [vmem:[#allocation22_spill] sm:$0xff] }
 0x1e7   :  { %1484 = vadd.xlane.f32.xlu1 %v1483_v50  ;;  %v1637_v49 = vmul.f32 %v4972_v0, %v4972_v0  ;;  %v1638_v43 = vmul.f32 %v4975_v63, %v4975_v63  ;;  %v6118_v50 = vld [vmem:[#allocation16_spill] sm:$0xff] }
 0x1e8   :  { %v1419_v3 = vpop.xlane.xlu1 %1418 }
 0x1e9   :  { %1409 = vadd.xlane.f32.xlu0 %v1408_v5  ;;  %v1737_v34 = vadd.f32 %v1638_v43, %v1637_v49  ;;  %v1514_v39 = vmul.f32 0.00390625, %v1419_v3 }
 0x1eb   :  { %1412 = vadd.xlane.f32.xlu1 %v1411_v37  ;;  %v5002_v5 = vsub.f32 %v6117_v36, %v1514_v39  ;;  %v5005_v13 = vsub.f32 %v6118_v50, %v1514_v39  ;;  %v6120_v37 = vld [vmem:[#allocation23_spill] sm:$0xff]  ;;  %v6125_v50 = vld [vmem:[#allocation37_spill] sm:$0xff] }
 0x1ed   :  { %1738 = vadd.xlane.f32.xlu0 %v1737_v34 }
 0x1ee   :  { %v1416_v40 = vpop.xlane.xlu0 %1415  ;;  %v1344_v59 = vpop.xlane.xlu1 %1343 }
 0x1ef   :  { %v1513_v46 = vmul.f32 0.00390625, %v1416_v40  ;;  %v1489_v12 = vmul.f32 0.00390625, %v1344_v59  ;;  %v1691_v59 = vmul.f32 %v5002_v5, %v5002_v5 }
 0x1f1   :  { %v4984_v15 = vsub.f32 %v6113_v18, %v1513_v46  ;;  %v4987_v11 = vsub.f32 %v6114_v42, %v1513_v46  ;;  %v4990_v48 = vsub.f32 %v6115_v14, %v1489_v12  ;;  %v4993_v32 = vsub.f32 %v6116_v25, %v1489_v12 }
 0x1f2   :  { %v1341_v57 = vpop.xlane.xlu0 %1340  ;;  %v1692_v46 = vmul.f32 %v5005_v13, %v5005_v13 }
 0x1f3   :  { %v1488_v23 = vmul.f32 0.00390625, %v1341_v57  ;;  %v1689_v19 = vmul.f32 %v4984_v15, %v4984_v15  ;;  %v1690_v20 = vmul.f32 %v4987_v11, %v4987_v11  ;;  %v1641_v38 = vmul.f32 %v4990_v48, %v4990_v48  ;;  %v6121_v57 = vld [vmem:[#allocation33_spill] sm:$0xff] }
 0x1f4   :  { %v1642_v58 = vmul.f32 %v4993_v32, %v4993_v32  ;;  %v1818_v25 = vadd.f32 %v1692_v46, %v1691_v59 }
 0x1f5   :  { %v5010_v53 = vsub.f32 %v6119_v51, %v1488_v23  ;;  %v5013_v49 = vsub.f32 %v6120_v37, %v1488_v23  ;;  %v1815_v43 = vadd.f32 %v1690_v20, %v1689_v19  ;;  %v6122_v19 = vld [vmem:[#allocation35_spill] sm:$0xff] }
 0x1f6   :  { %v1743_v34 = vadd.f32 %v1642_v58, %v1641_v38  ;;  %v6124_v38 = vld [vmem:[#allocation36_spill] sm:$0xff] }
 0x1f7   :  { %1816 = vadd.xlane.f32.xlu0 %v1815_v43  ;;  %v1639_v3 = vmul.f32 %v5010_v53, %v5010_v53  ;;  %v1640_v40 = vmul.f32 %v5013_v49, %v5013_v49 }
 0x1f9   :  { %v1740_v12 = vadd.f32 %v1640_v40, %v1639_v3  ;;  %v1347_v39 = vpop.xlane.xlu1 %1346 }
 0x1fa   :  { %v1490_v42 = vmul.f32 0.00390625, %v1347_v39 }
 0x1fb   :  { %v1422_v18 = vpop.xlane.xlu0 %1421  ;;  %1744 = vadd.xlane.f32.xlu0 %v1743_v34  ;;  %1741 = vadd.xlane.f32.xlu1 %v1740_v12  ;;  %v6126_v12 = vld [vmem:[#allocation38_spill] sm:$0xff] }
 0x1fc   :  { %v1515_v14 = vmul.f32 0.00390625, %v1422_v18  ;;  %v5024_v23 = vsub.f32 %v6121_v57, %v1490_v42  ;;  %v5027_v20 = vsub.f32 %v6122_v19, %v1490_v42  ;;  %v6128_v18 = vld [vmem:[#allocation39_spill] sm:$0xff]  ;;  %v6132_v57 = vld [vmem:[#allocation41_spill] sm:$0xff] }
 0x1fe   :  { %6123 = vst [vmem:[#allocation78_spill] sm:$0xff] %v5027_v20  ;;  %v5030_v36 = vsub.f32 %v6124_v38, %v1515_v14  ;;  %v5033_v58 = vsub.f32 %v6125_v50, %v1515_v14  ;;  %v1643_v59 = vmul.f32 %v5024_v23, %v5024_v23  ;;  %v1644_v46 = vmul.f32 %v5027_v20, %v5027_v20  ;;  %v6130_v14 = vld [vmem:[#allocation40_spill] sm:$0xff] }
 0x1ff   :  { %v1425_v51 = vpop.xlane.xlu1 %1424  ;;  %v1350_v37 = vpop.xlane.xlu0 %1349  ;;  %1819 = vadd.xlane.f32.xlu1 %v1818_v25 }
 0x200   :  { %v1516_v43 = vmul.f32 0.00390625, %v1425_v51  ;;  %v1491_v3 = vmul.f32 0.00390625, %v1350_v37  ;;  %v1693_v34 = vmul.f32 %v5030_v36, %v5030_v36  ;;  %v1694_v40 = vmul.f32 %v5033_v58, %v5033_v58 }
 0x201   :  { %v1746_v50 = vadd.f32 %v1644_v46, %v1643_v59  ;;  %v6134_v59 = vld [vmem:[#allocation45_spill] sm:$0xff] }
 0x202   :  { %v5044_v39 = vsub.f32 %v6126_v12, %v1516_v43  ;;  %v5047_v42 = vsub.f32 %v6128_v18, %v1516_v43  ;;  %v5050_v25 = vsub.f32 %v6130_v14, %v1491_v3  ;;  %v5053_v19 = vsub.f32 %v6132_v57, %v1491_v3 }
 0x203   :  { %v1821_v38 = vadd.f32 %v1694_v40, %v1693_v34  ;;  %1747 = vadd.xlane.f32.xlu1 %v1746_v50 }
 0x204   :  { %6127 = vst [vmem:[#allocation79_spill] sm:$0xff] %v5044_v39  ;;  %6129 = vst [vmem:[#allocation81_spill] sm:$0xff] %v5047_v42  ;;  %v1645_v51 = vmul.f32 %v5050_v25, %v5050_v25  ;;  %v1646_v37 = vmul.f32 %v5053_v19, %v5053_v19  ;;  %v1695_v12 = vmul.f32 %v5044_v39, %v5044_v39  ;;  %v6138_v39 = vld [vmem:[#allocation47_spill] sm:$0xff] }
 0x205   :  { %6131 = vst [vmem:[#allocation82_spill] sm:$0xff] %v5050_v25  ;;  %6133 = vst [vmem:[#allocation26_spill] sm:$0xff] %v5053_v19  ;;  %v1696_v43 = vmul.f32 %v5047_v42, %v5047_v42  ;;  %1822 = vadd.xlane.f32.xlu0 %v1821_v38  ;;  %v6136_v19 = vld [vmem:[#allocation46_spill] sm:$0xff]  ;;  %v6140_v42 = vld [vmem:[#allocation48_spill] sm:$0xff] }
 0x206   :  { %v1749_v18 = vadd.f32 %v1646_v37, %v1645_v51 }
 0x207   :  { %v1824_v14 = vadd.f32 %v1696_v43, %v1695_v12 }
 0x208   :  { %v1428_v57 = vpop.xlane.xlu0 %1427 }
 0x209   :  { %v1517_v40 = vmul.f32 0.00390625, %v1428_v57  ;;  %1750 = vadd.xlane.f32.xlu0 %v1749_v18  ;;  %1825 = vadd.xlane.f32.xlu1 %v1824_v14  ;;  %v6142_v14 = vld [vmem:[#allocation17_spill] sm:$0xff] }
 0x20a   :  { %v1353_v3 = vpop.xlane.xlu1 %1352 }
 0x20b   :  { %v1492_v34 = vmul.f32 0.00390625, %v1353_v3  ;;  %v5070_v20 = vsub.f32 %v6138_v39, %v1517_v40  ;;  %v5073_v38 = vsub.f32 %v6140_v42, %v1517_v40  ;;  %v6144_v42 = vld [vmem:[#allocation24_spill] sm:$0xff] }
 0x20d   :  { %v5064_v46 = vsub.f32 %v6134_v59, %v1492_v34  ;;  %v5067_v25 = vsub.f32 %v6136_v19, %v1492_v34  ;;  %6139 = vst [vmem:[#allocation84_spill] sm:$0xff] %v5070_v20  ;;  %6141 = vst [vmem:[#allocation13_spill] sm:$0xff] %v5073_v38  ;;  %v1356_v51 = vpop.xlane.xlu0 %1355  ;;  %v1697_v43 = vmul.f32 %v5070_v20, %v5070_v20  ;;  %v6146_v34 = vld [vmem:[#allocation25_spill] sm:$0xff] }
 0x20e   :  { %v1431_v50 = vpop.xlane.xlu1 %1430  ;;  %v1493_v12 = vmul.f32 0.00390625, %v1356_v51  ;;  %v1698_v18 = vmul.f32 %v5073_v38, %v5073_v38  ;;  %v6148_v59 = vld [vmem:[#allocation53_spill] sm:$0xff] }
 0x20f   :  { %6135 = vst [vmem:[#allocation50_spill] sm:$0xff] %v5064_v46  ;;  %6137 = vst [vmem:[#allocation51_spill] sm:$0xff] %v5067_v25  ;;  %v1518_v37 = vmul.f32 0.00390625, %v1431_v50  ;;  %v1647_v19 = vmul.f32 %v5064_v46, %v5064_v46  ;;  %v1648_v39 = vmul.f32 %v5067_v25, %v5067_v25 }
 0x210   :  { %v5090_v40 = vsub.f32 %v6146_v34, %v1493_v12  ;;  %v5093_v50 = vsub.f32 %v6148_v59, %v1493_v12  ;;  %v1827_v51 = vadd.f32 %v1698_v18, %v1697_v43 }
 0x211   :  { %v5084_v3 = vsub.f32 %v6142_v14, %v1518_v37  ;;  %v5087_v57 = vsub.f32 %v6144_v42, %v1518_v37  ;;  %v1752_v38 = vadd.f32 %v1648_v39, %v1647_v19  ;;  %v6150_v19 = vld [vmem:[#allocation31_spill] sm:$0xff] }
 0x212   :  { %6147 = vst [vmem:[#allocation19_spill] sm:$0xff] %v5090_v40  ;;  %6149 = vst [vmem:[#allocation20_spill] sm:$0xff] %v5093_v50  ;;  %v1649_v46 = vmul.f32 %v5090_v40, %v5090_v40  ;;  %v1650_v25 = vmul.f32 %v5093_v50, %v5093_v50  ;;  %1828 = vadd.xlane.f32.xlu0 %v1827_v51  ;;  %v6152_v50 = vld [vmem:[#allocation63_spill] sm:$0xff] }
 0x213   :  { %6143 = vst [vmem:[#allocation14_spill] sm:$0xff] %v5084_v3  ;;  %6145 = vst [vmem:[#allocation18_spill] sm:$0xff] %v5087_v57  ;;  %v1699_v14 = vmul.f32 %v5084_v3, %v5084_v3  ;;  %v1700_v37 = vmul.f32 %v5087_v57, %v5087_v57  ;;  %1753 = vadd.xlane.f32.xlu1 %v1752_v38  ;;  %v6154_v3 = vld [vmem:[#allocation28_spill] sm:$0xff]  ;;  %v6156_v57 = vld [vmem:[#allocation30_spill] sm:$0xff] }
 0x214   :  { %v1755_v42 = vadd.f32 %v1650_v25, %v1649_v46 }
 0x215   :  { %v1830_v34 = vadd.f32 %v1700_v37, %v1699_v14 }
 0x216   :  { %1756 = vadd.xlane.f32.xlu0 %v1755_v42 }
 0x217   :  { %v1359_v12 = vpop.xlane.xlu1 %1358  ;;  %1831 = vadd.xlane.f32.xlu1 %v1830_v34  ;;  %v6158_v34 = vld [vmem:[#allocation32_spill] sm:$0xff] }
 0x218   :  { %v1434_v59 = vpop.xlane.xlu0 %1433  ;;  %v1494_v43 = vmul.f32 0.00390625, %v1359_v12 }
 0x219   :  { %v1519_v18 = vmul.f32 0.00390625, %v1434_v59 }
 0x21a   :  { %v5104_v39 = vsub.f32 %v6150_v19, %v1494_v43  ;;  %v5107_v40 = vsub.f32 %v6152_v50, %v1494_v43  ;;  %v6162_v43 = vld [vmem:[#allocation65_spill] sm:$0xff]  ;;  %v6164_v19 = vld [vmem:[#allocation66_spill] sm:$0xff] }
 0x21b   :  { %v5110_v20 = vsub.f32 %v6154_v3, %v1519_v18  ;;  %v5113_v51 = vsub.f32 %v6156_v57, %v1519_v18  ;;  %v1437_v25 = vpop.xlane.xlu1 %1436  ;;  %v6160_v57 = vld [vmem:[#allocation64_spill] sm:$0xff] }
 0x21c   :  { %6151 = vst [vmem:[#allocation21_spill] sm:$0xff] %v5104_v39  ;;  %6153 = vst [vmem:[#allocation15_spill] sm:$0xff] %v5107_v40  ;;  %v1362_v46 = vpop.xlane.xlu0 %1361  ;;  %v1520_v38 = vmul.f32 0.00390625, %v1437_v25  ;;  %v1651_v50 = vmul.f32 %v5104_v39, %v5104_v39  ;;  %v1652_v3 = vmul.f32 %v5107_v40, %v5107_v40 }
 0x21d   :  { %6155 = vst [vmem:[#allocation16_spill] sm:$0xff] %v5110_v20  ;;  %6157 = vst [vmem:[#allocation22_spill] sm:$0xff] %v5113_v51  ;;  %v1495_v14 = vmul.f32 0.00390625, %v1362_v46  ;;  %v1701_v37 = vmul.f32 %v5110_v20, %v5110_v20  ;;  %v1702_v42 = vmul.f32 %v5113_v51, %v5113_v51 }
 0x21e   :  { %v5124_v12 = vsub.f32 %v6158_v34, %v1520_v38  ;;  %v5127_v59 = vsub.f32 %v6160_v57, %v1520_v38  ;;  %v1758_v51 = vadd.f32 %v1652_v3, %v1651_v50  ;;  %v6166_v50 = vld [vmem:[#allocation74_spill] sm:$0xff] }
 0x21f   :  { %v5130_v18 = vsub.f32 %v6162_v43, %v1495_v14  ;;  %v5133_v25 = vsub.f32 %v6164_v19, %v1495_v14  ;;  %v1833_v46 = vadd.f32 %v1702_v42, %v1701_v37 }
 0x220   :  { %6159 = vst [vmem:[#allocation23_spill] sm:$0xff] %v5124_v12  ;;  %6161 = vst [vmem:[#allocation33_spill] sm:$0xff] %v5127_v59  ;;  %v1703_v34 = vmul.f32 %v5124_v12, %v5124_v12  ;;  %v1704_v38 = vmul.f32 %v5127_v59, %v5127_v59  ;;  %1759 = vadd.xlane.f32.xlu1 %v1758_v51  ;;  %v6170_v12 = vld [vmem:[#allocation42_spill] sm:$0xff]  ;;  %v6171_v59 = vld [vmem:[#allocation43_spill] sm:$0xff] }
 0x221   :  { %6163 = vst [vmem:[#allocation35_spill] sm:$0xff] %v5130_v18  ;;  %6165 = vst [vmem:[#allocation36_spill] sm:$0xff] %v5133_v25  ;;  %v1653_v39 = vmul.f32 %v5130_v18, %v5130_v18  ;;  %v1654_v40 = vmul.f32 %v5133_v25, %v5133_v25  ;;  %1834 = vadd.xlane.f32.xlu0 %v1833_v46  ;;  %v6168_v25 = vld [vmem:[#allocation77_spill] sm:$0xff] }
 0x222   :  { %v1836_v43 = vadd.f32 %v1704_v38, %v1703_v34 }
 0x223   :  { %v1761_v57 = vadd.f32 %v1654_v40, %v1653_v39 }
 0x224   :  { %v1365_v14 = vpop.xlane.xlu1 %1364  ;;  %1837 = vadd.xlane.f32.xlu1 %v1836_v43  ;;  %v6173_v43 = vld [vmem:[#allocation44_spill] sm:$0xff] }
 0x225   :  { %v1440_v19 = vpop.xlane.xlu0 %1439  ;;  %v1496_v37 = vmul.f32 0.00390625, %v1365_v14  ;;  %1762 = vadd.xlane.f32.xlu0 %v1761_v57 }
 0x226   :  { %v1521_v42 = vmul.f32 0.00390625, %v1440_v19 }
 0x227   :  { %v5144_v3 = vsub.f32 %v6166_v50, %v1496_v37  ;;  %v5147_v18 = vsub.f32 %v6168_v25, %v1496_v37  ;;  %v6177_v37 = vld [vmem:[#allocation49_spill] sm:$0xff]  ;;  %v6179_v50 = vld [vmem:[#allocation83_spill] sm:$0xff] }
 0x228   :  { %v5150_v20 = vsub.f32 %v6170_v12, %v1521_v42  ;;  %v5153_v46 = vsub.f32 %v6171_v59, %v1521_v42  ;;  %v1443_v40 = vpop.xlane.xlu1 %1442  ;;  %v6175_v59 = vld [vmem:[#allocation80_spill] sm:$0xff] }
 0x229   :  { %6167 = vst [vmem:[#allocation37_spill] sm:$0xff] %v5144_v3  ;;  %6169 = vst [vmem:[#allocation38_spill] sm:$0xff] %v5147_v18  ;;  %v1368_v39 = vpop.xlane.xlu0 %1367  ;;  %v1522_v51 = vmul.f32 0.00390625, %v1443_v40  ;;  %v1655_v25 = vmul.f32 %v5144_v3, %v5144_v3  ;;  %v1656_v12 = vmul.f32 %v5147_v18, %v5147_v18 }
 0x22a   :  { %6172 = vst [vmem:[#allocation39_spill] sm:$0xff] %v5153_v46  ;;  %v1497_v34 = vmul.f32 0.00390625, %v1368_v39  ;;  %v1705_v38 = vmul.f32 %v5150_v20, %v5150_v20  ;;  %v1706_v57 = vmul.f32 %v5153_v46, %v5153_v46 }
 0x22b   :  { %v5164_v14 = vsub.f32 %v6173_v43, %v1522_v51  ;;  %v5167_v19 = vsub.f32 %v6175_v59, %v1522_v51  ;;  %v1764_v46 = vadd.f32 %v1656_v12, %v1655_v25  ;;  %v6182_v12 = vld [vmem:[#allocation34_spill] sm:$0xff] }
 0x22c   :  { %v5170_v42 = vsub.f32 %v6177_v37, %v1497_v34  ;;  %v5173_v40 = vsub.f32 %v6179_v50, %v1497_v34  ;;  %v1839_v39 = vadd.f32 %v1706_v57, %v1705_v38 }
 0x22d   :  { %6174 = vst [vmem:[#allocation40_spill] sm:$0xff] %v5164_v14  ;;  %6176 = vst [vmem:[#allocation41_spill] sm:$0xff] %v5167_v19  ;;  %v1707_v43 = vmul.f32 %v5164_v14, %v5164_v14  ;;  %v1708_v51 = vmul.f32 %v5167_v19, %v5167_v19  ;;  %1765 = vadd.xlane.f32.xlu1 %v1764_v46  ;;  %v6184_v14 = vld [vmem:[#allocation58_spill] sm:$0xff] }
 0x22e   :  { %6178 = vst [vmem:[#allocation45_spill] sm:$0xff] %v5170_v42  ;;  %6180 = vst [vmem:[#allocation46_spill] sm:$0xff] %v5173_v40  ;;  %v1657_v3 = vmul.f32 %v5170_v42, %v5170_v42  ;;  %v1658_v18 = vmul.f32 %v5173_v40, %v5173_v40  ;;  %1840 = vadd.xlane.f32.xlu0 %v1839_v39  ;;  %v6186_v19 = vld [vmem:[#allocation54_spill] sm:$0xff] }
 0x22f   :  { %v1842_v37 = vadd.f32 %v1708_v51, %v1707_v43 }
 0x230   :  { %v1767_v59 = vadd.f32 %v1658_v18, %v1657_v3 }
 0x231   :  { %v1371_v34 = vpop.xlane.xlu1 %1370  ;;  %1843 = vadd.xlane.f32.xlu1 %v1842_v37  ;;  %v6188_v37 = vld [vmem:[#allocation55_spill] sm:$0xff] }
 0x232   :  { %v1446_v50 = vpop.xlane.xlu0 %1445  ;;  %v1498_v38 = vmul.f32 0.00390625, %v1371_v34  ;;  %1768 = vadd.xlane.f32.xlu0 %v1767_v59 }
 0x233   :  { %v1523_v57 = vmul.f32 0.00390625, %v1446_v50 }
 0x234   :  { %v5184_v25 = vsub.f32 %v4437_v31, %v1498_v38  ;;  %v5187_v40 = vsub.f32 %v6182_v12, %v1498_v38  ;;  %v6192_v38 = vld [vmem:[#allocation56_spill] sm:$0xff]  ;;  %v6194_v12 = vld [vmem:[#allocation57_spill] sm:$0xff] }
 0x235   :  { %v5190_v42 = vsub.f32 %v6184_v14, %v1523_v57  ;;  %v5193_v39 = vsub.f32 %v6186_v19, %v1523_v57  ;;  %v1449_v18 = vpop.xlane.xlu1 %1448  ;;  %v6190_v19 = vld [vmem:[#allocation59_spill] sm:$0xff] }
 0x236   :  { %6181 = vst [vmem:[#allocation47_spill] sm:$0xff] %v5184_v25  ;;  %6183 = vst [vmem:[#allocation48_spill] sm:$0xff] %v5187_v40  ;;  %v1374_v3 = vpop.xlane.xlu0 %1373  ;;  %v1524_v46 = vmul.f32 0.00390625, %v1449_v18  ;;  %v1659_v59 = vmul.f32 %v5184_v25, %v5184_v25  ;;  %v1660_v14 = vmul.f32 %v5187_v40, %v5187_v40 }
 0x237   :  { %6185 = vst [vmem:[#allocation17_spill] sm:$0xff] %v5190_v42  ;;  %6187 = vst [vmem:[#allocation24_spill] sm:$0xff] %v5193_v39  ;;  %v1499_v43 = vmul.f32 0.00390625, %v1374_v3  ;;  %v1709_v51 = vmul.f32 %v5190_v42, %v5190_v42  ;;  %v1710_v31 = vmul.f32 %v5193_v39, %v5193_v39 }
 0x238   :  { %v5204_v34 = vsub.f32 %v6188_v37, %v1524_v46  ;;  %v5207_v50 = vsub.f32 %v6190_v19, %v1524_v46  ;;  %v1770_v39 = vadd.f32 %v1660_v14, %v1659_v59  ;;  %v6196_v59 = vld [vmem:[#allocation60_spill] sm:$0xff] }
 0x239   :  { %v5210_v57 = vsub.f32 %v6192_v38, %v1499_v43  ;;  %v5213_v18 = vsub.f32 %v6194_v12, %v1499_v43  ;;  %v1845_v3 = vadd.f32 %v1710_v31, %v1709_v51 }
 0x23a   :  { %6189 = vst [vmem:[#allocation25_spill] sm:$0xff] %v5204_v34  ;;  %6191 = vst [vmem:[#allocation53_spill] sm:$0xff] %v5207_v50  ;;  %v1711_v37 = vmul.f32 %v5204_v34, %v5204_v34  ;;  %v1712_v46 = vmul.f32 %v5207_v50, %v5207_v50  ;;  %1771 = vadd.xlane.f32.xlu1 %v1770_v39  ;;  %v6200_v34 = vld [vmem:[#allocation62_spill] sm:$0xff]  ;;  %v6202_v50 = vld [vmem:[#allocation27_spill] sm:$0xff] }
 0x23b   :  { %6193 = vst [vmem:[#allocation31_spill] sm:$0xff] %v5210_v57  ;;  %6195 = vst [vmem:[#allocation63_spill] sm:$0xff] %v5213_v18  ;;  %v1661_v25 = vmul.f32 %v5210_v57, %v5210_v57  ;;  %v1662_v40 = vmul.f32 %v5213_v18, %v5213_v18  ;;  %1846 = vadd.xlane.f32.xlu0 %v1845_v3  ;;  %v6198_v18 = vld [vmem:[#allocation61_spill] sm:$0xff] }
 0x23c   :  { %v1848_v38 = vadd.f32 %v1712_v46, %v1711_v37 }
 0x23d   :  { %v1773_v19 = vadd.f32 %v1662_v40, %v1661_v25 }
 0x23e   :  { %v1377_v43 = vpop.xlane.xlu1 %1376  ;;  %1849 = vadd.xlane.f32.xlu1 %v1848_v38  ;;  %v6204_v38 = vld [vmem:[#allocation29_spill] sm:$0xff] }
 0x23f   :  { %v1452_v12 = vpop.xlane.xlu0 %1451  ;;  %v1500_v51 = vmul.f32 0.00390625, %v1377_v43  ;;  %1774 = vadd.xlane.f32.xlu0 %v1773_v19 }
 0x240   :  { %v1525_v31 = vmul.f32 0.00390625, %v1452_v12 }
 0x241   :  { %v5224_v14 = vsub.f32 %v6196_v59, %v1500_v51  ;;  %v5227_v57 = vsub.f32 %v6198_v18, %v1500_v51  ;;  %v6208_v51 = vld [vmem:[#allocation87_spill] sm:$0xff]  ;;  %v6210_v59 = vld [vmem:[#allocation88_spill] sm:$0xff] }
 0x242   :  { %v5230_v42 = vsub.f32 %v6200_v34, %v1525_v31  ;;  %v5233_v3 = vsub.f32 %v6202_v50, %v1525_v31  ;;  %v1455_v40 = vpop.xlane.xlu1 %1454  ;;  %v6206_v50 = vld [vmem:[#allocation86_spill] sm:$0xff] }
 0x243   :  { %6197 = vst [vmem:[#allocation28_spill] sm:$0xff] %v5224_v14  ;;  %6199 = vst [vmem:[#allocation30_spill] sm:$0xff] %v5227_v57  ;;  %v1380_v25 = vpop.xlane.xlu0 %1379  ;;  %v1526_v39 = vmul.f32 0.00390625, %v1455_v40  ;;  %v1663_v18 = vmul.f32 %v5224_v14, %v5224_v14  ;;  %v1664_v34 = vmul.f32 %v5227_v57, %v5227_v57 }
 0x244   :  { %6201 = vst [vmem:[#allocation32_spill] sm:$0xff] %v5230_v42  ;;  %6203 = vst [vmem:[#allocation64_spill] sm:$0xff] %v5233_v3  ;;  %v1501_v37 = vmul.f32 0.00390625, %v1380_v25  ;;  %v1713_v46 = vmul.f32 %v5230_v42, %v5230_v42  ;;  %v1714_v19 = vmul.f32 %v5233_v3, %v5233_v3 }
 0x245   :  { %v5244_v43 = vsub.f32 %v6204_v38, %v1526_v39  ;;  %v5247_v12 = vsub.f32 %v6206_v50, %v1526_v39  ;;  %v1776_v3 = vadd.f32 %v1664_v34, %v1663_v18  ;;  %v6212_v18 = vld [vmem:[#allocation67_spill] sm:$0xff] }
 0x246   :  { %v5250_v31 = vsub.f32 %v6208_v51, %v1501_v37  ;;  %v5253_v40 = vsub.f32 %v6210_v59, %v1501_v37  ;;  %v1851_v25 = vadd.f32 %v1714_v19, %v1713_v46 }
 0x247   :  { %6205 = vst [vmem:[#allocation65_spill] sm:$0xff] %v5244_v43  ;;  %6207 = vst [vmem:[#allocation66_spill] sm:$0xff] %v5247_v12  ;;  %v1715_v38 = vmul.f32 %v5244_v43, %v5244_v43  ;;  %v1716_v39 = vmul.f32 %v5247_v12, %v5247_v12  ;;  %1777 = vadd.xlane.f32.xlu1 %v1776_v3  ;;  %v6216_v43 = vld [vmem:[#allocation69_spill] sm:$0xff]  ;;  %v6217_v12 = vld [vmem:[#allocation70_spill] sm:$0xff] }
 0x248   :  { %6209 = vst [vmem:[#allocation74_spill] sm:$0xff] %v5250_v31  ;;  %6211 = vst [vmem:[#allocation77_spill] sm:$0xff] %v5253_v40  ;;  %v1665_v14 = vmul.f32 %v5250_v31, %v5250_v31  ;;  %v1666_v57 = vmul.f32 %v5253_v40, %v5253_v40  ;;  %1852 = vadd.xlane.f32.xlu0 %v1851_v25  ;;  %v6214_v40 = vld [vmem:[#allocation68_spill] sm:$0xff] }
 0x249   :  { %v1854_v51 = vadd.f32 %v1716_v39, %v1715_v38 }
 0x24a   :  { %v1779_v50 = vadd.f32 %v1666_v57, %v1665_v14 }
 0x24b   :  { %v1383_v37 = vpop.xlane.xlu1 %1382  ;;  %1855 = vadd.xlane.f32.xlu1 %v1854_v51  ;;  %v6219_v51 = vld [vmem:[#allocation71_spill] sm:$0xff] }
 0x24c   :  { %v1458_v59 = vpop.xlane.xlu0 %1457  ;;  %v1502_v46 = vmul.f32 0.00390625, %v1383_v37  ;;  %1780 = vadd.xlane.f32.xlu0 %v1779_v50 }
 0x24d   :  { %v1527_v19 = vmul.f32 0.00390625, %v1458_v59 }
 0x24e   :  { %v5264_v34 = vsub.f32 %v6212_v18, %v1502_v46  ;;  %v5267_v31 = vsub.f32 %v6214_v40, %v1502_v46  ;;  %v6222_v46 = vld [vmem:[#allocation85_spill] sm:$0xff]  ;;  %v6223_v18 = vld [vmem:[#allocation72_spill] sm:$0xff] }
 0x24f   :  { %v5270_v42 = vsub.f32 %v6216_v43, %v1527_v19  ;;  %v5273_v25 = vsub.f32 %v6217_v12, %v1527_v19  ;;  %v1461_v57 = vpop.xlane.xlu1 %1460  ;;  %v6221_v12 = vld [vmem:[#allocation52_spill] sm:$0xff] }
 0x250   :  { %6213 = vst [vmem:[#allocation42_spill] sm:$0xff] %v5264_v34  ;;  %6215 = vst [vmem:[#allocation43_spill] sm:$0xff] %v5267_v31  ;;  %v1386_v14 = vpop.xlane.xlu0 %1385  ;;  %v1528_v3 = vmul.f32 0.00390625, %v1461_v57  ;;  %v1667_v40 = vmul.f32 %v5264_v34, %v5264_v34  ;;  %v1668_v43 = vmul.f32 %v5267_v31, %v5267_v31 }
 0x251   :  { %6218 = vst [vmem:[#allocation44_spill] sm:$0xff] %v5273_v25  ;;  %v1503_v38 = vmul.f32 0.00390625, %v1386_v14  ;;  %v1717_v39 = vmul.f32 %v5270_v42, %v5270_v42  ;;  %v1718_v50 = vmul.f32 %v5273_v25, %v5273_v25 }
 0x252   :  { %v5284_v37 = vsub.f32 %v6219_v51, %v1528_v3  ;;  %v5287_v59 = vsub.f32 %v6221_v12, %v1528_v3  ;;  %v1782_v25 = vadd.f32 %v1668_v43, %v1667_v40 }
 0x253   :  { %v5290_v19 = vsub.f32 %v6222_v46, %v1503_v38  ;;  %v5293_v57 = vsub.f32 %v6223_v18, %v1503_v38  ;;  %v1857_v14 = vadd.f32 %v1718_v50, %v1717_v39 }
 0x254   :  { %6220 = vst [vmem:[#allocation80_spill] sm:$0xff] %v5284_v37  ;;  %v1719_v51 = vmul.f32 %v5284_v37, %v5284_v37  ;;  %v1720_v3 = vmul.f32 %v5287_v59, %v5287_v59  ;;  %1783 = vadd.xlane.f32.xlu1 %v1782_v25 }
 0x255   :  { %v1669_v34 = vmul.f32 %v5290_v19, %v5290_v19  ;;  %v1670_v31 = vmul.f32 %v5293_v57, %v5293_v57  ;;  %1858 = vadd.xlane.f32.xlu0 %v1857_v14 }
 0x256   :  { %v1860_v46 = vadd.f32 %v1720_v3, %v1719_v51 }
 0x257   :  { %v1785_v12 = vadd.f32 %v1670_v31, %v1669_v34 }
 0x258   :  { %v1389_v38 = vpop.xlane.xlu1 %1388  ;;  %1861 = vadd.xlane.f32.xlu1 %v1860_v46 }
 0x259   :  { %v1464_v18 = vpop.xlane.xlu0 %1463  ;;  %v1504_v39 = vmul.f32 0.00390625, %v1389_v38  ;;  %1786 = vadd.xlane.f32.xlu0 %v1785_v12  ;;  %v6230_v38 = vld [vmem:[#allocation75_spill] sm:$0xff] }
 0x25a   :  { %v1529_v50 = vmul.f32 0.00390625, %v1464_v18 }
 0x25b   :  { %v5304_v40 = vsub.f32 %v4794_v62, %v1504_v39  ;;  %v5307_v43 = vsub.f32 %v4801_v44, %v1504_v39  ;;  %v6231_v39 = vld [vmem:[#allocation76_spill] sm:$0xff] }
 0x25c   :  { %v5310_v37 = vsub.f32 %v4804_v47, %v1529_v50  ;;  %v5313_v14 = vsub.f32 %v4807_v26, %v1529_v50  ;;  %v1467_v31 = vpop.xlane.xlu1 %1466  ;;  %v6228_v26 = vld [vmem:[#allocation73_spill] sm:$0xff] }
 0x25d   :  { %6224 = vst [vmem:[#allocation49_spill] sm:$0xff] %v5304_v40  ;;  %6225 = vst [vmem:[#allocation83_spill] sm:$0xff] %v5307_v43  ;;  %v1392_v34 = vpop.xlane.xlu0 %1391  ;;  %v1530_v25 = vmul.f32 0.00390625, %v1467_v31  ;;  %v1671_v44 = vmul.f32 %v5304_v40, %v5304_v40  ;;  %v1672_v47 = vmul.f32 %v5307_v43, %v5307_v43 }
 0x25e   :  { %6226 = vst [vmem:[#allocation34_spill] sm:$0xff] %v5310_v37  ;;  %6227 = vst [vmem:[#allocation58_spill] sm:$0xff] %v5313_v14  ;;  %v1505_v51 = vmul.f32 0.00390625, %v1392_v34  ;;  %v1721_v3 = vmul.f32 %v5310_v37, %v5310_v37  ;;  %v1722_v62 = vmul.f32 %v5313_v14, %v5313_v14 }
 0x25f   :  { %v5324_v12 = vsub.f32 %v4810_v33, %v1530_v25  ;;  %v5327_v46 = vsub.f32 %v6228_v26, %v1530_v25  ;;  %v1788_v14 = vadd.f32 %v1672_v47, %v1671_v44 }
 0x260   :  { %v5330_v18 = vsub.f32 %v6230_v38, %v1505_v51  ;;  %v5333_v50 = vsub.f32 %v6231_v39, %v1505_v51  ;;  %v1395_v31 = vpop.xlane.xlu1 %1394  ;;  %v1863_v34 = vadd.f32 %v1722_v62, %v1721_v3 }
 0x261   :  { %6229 = vst [vmem:[#allocation54_spill] sm:$0xff] %v5327_v46  ;;  %v1506_v37 = vmul.f32 0.00390625, %v1395_v31  ;;  %v1723_v25 = vmul.f32 %v5324_v12, %v5324_v12  ;;  %1789 = vadd.xlane.f32.xlu1 %v1788_v14  ;;  %v1724_v51 = vmul.f32 %v5327_v46, %v5327_v46 }
 0x262   :  { %v1470_v40 = vpop.xlane.xlu0 %1469  ;;  %v1673_v43 = vmul.f32 %v5330_v18, %v5330_v18  ;;  %v1674_v33 = vmul.f32 %v5333_v50, %v5333_v50  ;;  %1864 = vadd.xlane.f32.xlu0 %v1863_v34 }
 0x263   :  { %v1531_v26 = vmul.f32 0.00390625, %v1470_v40  ;;  %v5344_v3 = vsub.f32 %v4863_v35, %v1506_v37  ;;  %v5347_v62 = vsub.f32 %v4866_v27, %v1506_v37  ;;  %v1866_v40 = vadd.f32 %v1724_v51, %v1723_v25 }
 0x264   :  { %v1791_v44 = vadd.f32 %v1674_v33, %v1673_v43  ;;  %v1473_v39 = vpop.xlane.xlu1 %1472 }
 0x265   :  { %v5350_v47 = vsub.f32 %v4869_v9, %v1531_v26  ;;  %v5353_v38 = vsub.f32 %v4872_v17, %v1531_v26  ;;  %v1532_v31 = vmul.f32 0.00390625, %v1473_v39  ;;  %v1675_v34 = vmul.f32 %v5344_v3, %v5344_v3  ;;  %1867 = vadd.xlane.f32.xlu1 %v1866_v40 }
 0x266   :  { %v1398_v14 = vpop.xlane.xlu0 %1397  ;;  %v1676_v35 = vmul.f32 %v5347_v62, %v5347_v62  ;;  %1792 = vadd.xlane.f32.xlu0 %v1791_v44 }
 0x267   :  { %v1507_v46 = vmul.f32 0.00390625, %v1398_v14  ;;  %v1725_v27 = vmul.f32 %v5350_v47, %v5350_v47  ;;  %v1726_v9 = vmul.f32 %v5353_v38, %v5353_v38  ;;  %v5364_v17 = vsub.f32 %v4884_v28, %v1532_v31 }
 0x268   :  { %v5367_v37 = vsub.f32 %v4887_v2, %v1532_v31  ;;  %v1401_v25 = vpop.xlane.xlu1 %1400  ;;  %v1794_v51 = vadd.f32 %v1676_v35, %v1675_v34 }
 0x269   :  { %v5370_v43 = vsub.f32 %v4890_v30, %v1507_v46  ;;  %v5373_v33 = vsub.f32 %v4893_v54, %v1507_v46  ;;  %v1869_v26 = vadd.f32 %v1726_v9, %v1725_v27  ;;  %v1508_v44 = vmul.f32 0.00390625, %v1401_v25 }
 0x26a   :  { %v1476_v39 = vpop.xlane.xlu0 %1475  ;;  %v1727_v40 = vmul.f32 %v5364_v17, %v5364_v17  ;;  %v1728_v28 = vmul.f32 %v5367_v37, %v5367_v37  ;;  %1795 = vadd.xlane.f32.xlu1 %v1794_v51 }
 0x26b   :  { %v1533_v14 = vmul.f32 0.00390625, %v1476_v39  ;;  %1870 = vadd.xlane.f32.xlu0 %v1869_v26  ;;  %v1677_v2 = vmul.f32 %v5370_v43, %v5370_v43  ;;  %v1678_v30 = vmul.f32 %v5373_v33, %v5373_v33  ;;  %v5384_v54 = vsub.f32 %v4898_v56, %v1508_v44 }
 0x26c   :  { %v5387_v46 = vsub.f32 %v4900_v29, %v1508_v44  ;;  %v1479_v35 = vpop.xlane.xlu1 %1478  ;;  %v1872_v9 = vadd.f32 %v1728_v28, %v1727_v40 }
 0x26d   :  { %v5390_v31 = vsub.f32 %v4909_v4, %v1533_v14  ;;  %v5393_v34 = vsub.f32 %v4912_v8, %v1533_v14  ;;  %v1797_v27 = vadd.f32 %v1678_v30, %v1677_v2  ;;  %v1534_v25 = vmul.f32 0.00390625, %v1479_v35 }
 0x26e   :  { %v1404_v26 = vpop.xlane.xlu0 %1403  ;;  %v1679_v51 = vmul.f32 %v5384_v54, %v5384_v54  ;;  %v1680_v56 = vmul.f32 %v5387_v46, %v5387_v46  ;;  %1873 = vadd.xlane.f32.xlu1 %v1872_v9 }
 0x26f   :  { %v1509_v39 = vmul.f32 0.00390625, %v1404_v26  ;;  %1798 = vadd.xlane.f32.xlu0 %v1797_v27  ;;  %v1729_v29 = vmul.f32 %v5390_v31, %v5390_v31  ;;  %v1730_v4 = vmul.f32 %v5393_v34, %v5393_v34  ;;  %v5404_v8 = vsub.f32 %v4923_v6, %v1534_v25 }
 0x270   :  { %v5407_v44 = vsub.f32 %v4925_v61, %v1534_v25  ;;  %v1407_v14 = vpop.xlane.xlu1 %1406  ;;  %v1800_v30 = vadd.f32 %v1680_v56, %v1679_v51 }
 0x271   :  { %v5410_v40 = vsub.f32 %v4916_v21, %v1509_v39  ;;  %v5413_v28 = vsub.f32 %v4918_v16, %v1509_v39  ;;  %v1875_v2 = vadd.f32 %v1730_v4, %v1729_v29  ;;  %v1510_v35 = vmul.f32 0.00390625, %v1407_v14 }
 0x272   :  { %v1482_v27 = vpop.xlane.xlu0 %1481  ;;  %v1731_v9 = vmul.f32 %v5404_v8, %v5404_v8  ;;  %v1732_v6 = vmul.f32 %v5407_v44, %v5407_v44  ;;  %1801 = vadd.xlane.f32.xlu1 %v1800_v30 }
 0x273   :  { %1876 = vadd.xlane.f32.xlu0 %v1875_v2  ;;  %v1681_v21 = vmul.f32 %v5410_v40, %v5410_v40  ;;  %v1682_v16 = vmul.f32 %v5413_v28, %v5413_v28  ;;  %v5424_v61 = vsub.f32 %v4933_v41, %v1510_v35  ;;  %v5427_v25 = vsub.f32 %v4937_v52, %v1510_v35 }
 0x274   :  { %v1535_v26 = vmul.f32 0.00390625, %v1482_v27  ;;  %v1485_v51 = vpop.xlane.xlu1 %1484  ;;  %v1878_v39 = vadd.f32 %v1732_v6, %v1731_v9 }
 0x275   :  { %v1803_v56 = vadd.f32 %v1682_v16, %v1681_v21  ;;  %v1683_v4 = vmul.f32 %v5424_v61, %v5424_v61  ;;  %v1684_v14 = vmul.f32 %v5427_v25, %v5427_v25  ;;  %v1536_v30 = vmul.f32 0.00390625, %v1485_v51 }
 0x276   :  { %v1410_v29 = vpop.xlane.xlu0 %1409  ;;  %1879 = vadd.xlane.f32.xlu1 %v1878_v39  ;;  %v5434_v41 = vsub.f32 %v4943_v45, %v1535_v26  ;;  %v5437_v52 = vsub.f32 %v4945_v10, %v1535_v26 }
 0x277   :  { %v1511_v2 = vmul.f32 0.00390625, %v1410_v29  ;;  %1804 = vadd.xlane.f32.xlu0 %v1803_v56  ;;  %v1806_v6 = vadd.f32 %v1684_v14, %v1683_v4  ;;  %v5450_v51 = vsub.f32 %v4955_v55, %v1536_v30  ;;  %v5453_v10 = vsub.f32 %v4957_v1, %v1536_v30 }
 0x278   :  { %6232 = vst [vmem:[#allocation55_spill] sm:$0xff] %v5434_v41  ;;  %6233 = vst [vmem:[#allocation59_spill] sm:$0xff] %v5437_v52  ;;  %v1413_v9 = vpop.xlane.xlu1 %1412  ;;  %v1733_v56 = vmul.f32 %v5434_v41, %v5434_v41  ;;  %v1734_v39 = vmul.f32 %v5437_v52, %v5437_v52 }
 0x279   :  { %v5440_v35 = vsub.f32 %v4951_v60, %v1511_v2  ;;  %v5443_v27 = vsub.f32 %v4953_v7, %v1511_v2  ;;  %v1512_v21 = vmul.f32 0.00390625, %v1413_v9  ;;  %6234 = vst [vmem:[#allocation56_spill] sm:$0xff] %v5450_v51  ;;  %6235 = vst [vmem:[#allocation57_spill] sm:$0xff] %v5453_v10  ;;  %v1736_v14 = vmul.f32 %v5453_v10, %v5453_v10 }
 0x27a   :  { %1807 = vadd.xlane.f32.xlu1 %v1806_v6  ;;  %v1739_v26 = vpop.xlane.xlu0 %1738  ;;  %v1881_v30 = vadd.f32 %v1734_v39, %v1733_v56  ;;  %v2137_v6 = vld [vmem:[%s5809_s3] sm:$0x3]  ;;  %s3447_s3 = smov [#allocation7]  }
 0x27b   :  { %v1685_v16 = vmul.f32 %v5440_v35, %v5440_v35  ;;  %v1686_v45 = vmul.f32 %v5443_v27, %v5443_v27  ;;  %v5456_v60 = vsub.f32 %v4967_v24, %v1512_v21  ;;  %v5459_v7 = vsub.f32 %v4969_v22, %v1512_v21 }
 0x27c   :  { %v1887_v4 = vmul.f32 0.00390625, %v1739_v26  ;;  %v1735_v22 = vmul.f32 %v5450_v51, %v5450_v51  ;;  %v6236_v26 = vld [vmem:[#allocation11_spill] sm:$0xff] }
 0x27d   :  { %v1809_v29 = vadd.f32 %v1686_v45, %v1685_v16  ;;  %v1687_v55 = vmul.f32 %v5456_v60, %v5456_v60  ;;  %v1688_v1 = vmul.f32 %v5459_v7, %v5459_v7  ;;  %v2249_v16 = vld [vmem:[%s5810_s4] sm:$0x3]  ;;  %s2716_s4 = sshll.u32 %s3447_s3, 4  ;;  %s2717_s4 = int_to_ptr.vmem [resolvable:$true] %s2716_s4 }
 0x27e   :  { %v1937_v24 = vadd.f32 1e-12, %v1887_v4  ;;  %v1884_v9 = vadd.f32 %v1736_v14, %v1735_v22  ;;  %v6237_v4 = vld [vmem:[#allocation12_spill] sm:$0xff]  ;;  %s3415_s22 = scalar_lea.vmem %s2717_s4, 6400  ;;  %p3420_p3 = scmp.lt.s32.totalorder %s2717_s4, %s2717_s4 }
 0x27f   :  { %1810 = vadd.xlane.f32.xlu0 %v1809_v29  ;;  %v1812_v2 = vadd.f32 %v1688_v1, %v1687_v55  ;;  %v5480_v29 = vrot.slane %v2137_v6, %v6236_v26  ;;  %v5483_v56 = vrot.slane %v2137_v6, %v6237_v4  ;;  %v5486_v1 = vrot.slane %v2249_v16, %v6236_v26  ;;  %p3416_p2 = scmp.ne.s32.totalorder %s2717_s4, %s3415_s22  ;;  %p3421_p4 = scmp.lt.s32.totalorder %s3415_s22, %s3415_s22 }
 0x280   :  { %3271 = vrsqrt.f32 %v1937_v24  ;;  %v5489_v24 = vrot.slane %v2249_v16, %v6237_v4 }
 0x281   :  { %1813 = vadd.xlane.f32.xlu1 %v1812_v2  ;;  %p3422_p5 = por %p3421_p4, %p3420_p3 }
 0x283   :  { %1882 = vadd.xlane.f32.xlu0 %v1881_v30  ;;  %p3423_p6 = pnand %p3422_p5, %p3416_p2 }
 0x284   :  { %v1817_v21 = vpop.xlane.xlu0 %1816 }
 0x285   :  { %1885 = vadd.xlane.f32.xlu1 %v1884_v9  ;;  %v1913_v45 = vmul.f32 0.00390625, %v1817_v21 }
 0x287   :  { %v1963_v55 = vadd.f32 1e-12, %v1913_v45 }
 0x288   :  { %v1742_v2 = vpop.xlane.xlu1 %1741  ;;  %v1745_v30 = vpop.xlane.xlu0 %1744 }
 0x289   :  { %3273 = vrsqrt.f32 %v1963_v55  ;;  %v1888_v9 = vmul.f32 0.00390625, %v1742_v2  ;;  %v1889_v21 = vmul.f32 0.00390625, %v1745_v30 }
 0x28a   :  { %v3272_v39 = vpop.eup %3271 }
 0x28b   :  { %v2037_v22 = vmul.f32 %v3272_v39, %v4972_v0  ;;  %v2038_v14 = vmul.f32 %v3272_v39, %v4975_v63  ;;  %v1938_v45 = vadd.f32 1e-12, %v1888_v9  ;;  %v1939_v51 = vadd.f32 1e-12, %v1889_v21 }
 0x28c   :  { %v1820_v4 = vpop.xlane.xlu1 %1819 }
 0x28d   :  { %v2149_v6 = vmul.f32 %v5480_v29, %v2037_v22  ;;  %v2150_v10 = vmul.f32 %v5483_v56, %v2038_v14  ;;  %3275 = vrsqrt.f32 %v1938_v45  ;;  %v1914_v0 = vmul.f32 0.00390625, %v1820_v4 }
 0x28e   :  { %3277 = vrsqrt.f32 %v1939_v51 }
 0x28f   :  { %v2261_v26 = vadd.f32 %v5486_v1, %v2149_v6  ;;  %v2262_v16 = vadd.f32 %v5489_v24, %v2150_v10  ;;  %v1964_v63 = vadd.f32 1e-12, %v1914_v0 }
 0x290   :  { %v1748_v55 = vpop.xlane.xlu1 %1747 }
 0x291   :  { %v2861_v52 = vpack.c.bf16 %v2262_v16, %v2261_v26  ;;  %3279 = vrsqrt.f32 %v1964_v63  ;;  %v1890_v22 = vmul.f32 0.00390625, %v1748_v55 }
 0x292   :  { %v1823_v39 = vpop.xlane.xlu0 %1822 }
 0x293   :  { %2661 = vst [vmem:[#allocation7] sm:$0xff] %v2861_v52  ;;  %v1915_v2 = vmul.f32 0.00390625, %v1823_v39  ;;  %v3274_v30 = vpop.eup %3273  ;;  %v1940_v6 = vadd.f32 1e-12, %v1890_v22 }
 0x294   :  { %v2089_v14 = vmul.f32 %v3274_v30, %v4984_v15  ;;  %v2090_v9 = vmul.f32 %v3274_v30, %v4987_v11 }
 0x295   :  { %v1965_v21 = vadd.f32 1e-12, %v1915_v2 }
 0x296   :  { %v1751_v10 = vpop.xlane.xlu0 %1750  ;;  %v1826_v41 = vpop.xlane.xlu1 %1825  ;;  %v2201_v45 = vmul.f32 %v5480_v29, %v2089_v14  ;;  %v2202_v51 = vmul.f32 %v5483_v56, %v2090_v9 }
 0x297   :  { %3281 = vrsqrt.f32 %v1965_v21  ;;  %v1891_v52 = vmul.f32 0.00390625, %v1751_v10  ;;  %v3276_v26 = vpop.eup %3275  ;;  %v1916_v16 = vmul.f32 0.00390625, %v1826_v41 }
 0x298   :  { %3283 = vrsqrt.f32 %v1940_v6  ;;  %v3278_v4 = vpop.eup %3277  ;;  %v2313_v0 = vadd.f32 %v5486_v1, %v2201_v45  ;;  %v2314_v15 = vadd.f32 %v5489_v24, %v2202_v51  ;;  %v2039_v11 = vmul.f32 %v3276_v26, %v5010_v53 }
 0x299   :  { %v2040_v63 = vmul.f32 %v3276_v26, %v5013_v49  ;;  %v2041_v39 = vmul.f32 %v3278_v4, %v4990_v48  ;;  %v2042_v55 = vmul.f32 %v3278_v4, %v4993_v32  ;;  %v1941_v2 = vadd.f32 1e-12, %v1891_v52 }
 0x29a   :  { %v1966_v22 = vadd.f32 1e-12, %v1916_v16  ;;  %v2887_v30 = vpack.c.bf16 %v2314_v15, %v2313_v0  ;;  %v2151_v14 = vmul.f32 %v5480_v29, %v2039_v11 }
 0x29b   :  { %v2152_v41 = vmul.f32 %v5483_v56, %v2040_v63  ;;  %v3280_v9 = vpop.eup %3279  ;;  %v2153_v21 = vmul.f32 %v5480_v29, %v2041_v39  ;;  %v2154_v6 = vmul.f32 %v5483_v56, %v2042_v55  ;;  %3285 = vrsqrt.f32 %v1941_v2 }
 0x29c   :  { %2687 = vst [vmem:[#allocation7 + $0xd0] sm:$0xff] %v2887_v30  ;;  %v2263_v53 = vadd.f32 %v5486_v1, %v2151_v14  ;;  %v2091_v32 = vmul.f32 %v3280_v9, %v5002_v5  ;;  %v2092_v49 = vmul.f32 %v3280_v9, %v5005_v13  ;;  %3287 = vrsqrt.f32 %v1966_v22  ;;  %v6238_v9 = vld [vmem:[#allocation78_spill] sm:$0xff] }
 0x29d   :  { %v2264_v48 = vadd.f32 %v5489_v24, %v2152_v41  ;;  %v2265_v10 = vadd.f32 %v5486_v1, %v2153_v21  ;;  %v2266_v45 = vadd.f32 %v5489_v24, %v2154_v6 }
 0x29e   :  { %v2203_v52 = vmul.f32 %v5480_v29, %v2091_v32  ;;  %v2204_v26 = vmul.f32 %v5483_v56, %v2092_v49 }
 0x29f   :  { %v2862_v51 = vpack.c.bf16 %v2264_v48, %v2263_v53  ;;  %v1829_v16 = vpop.xlane.xlu0 %1828  ;;  %v2863_v0 = vpack.c.bf16 %v2266_v45, %v2265_v10 }
 0x2a0   :  { %v1754_v4 = vpop.xlane.xlu1 %1753  ;;  %v1917_v15 = vmul.f32 0.00390625, %v1829_v16  ;;  %v2315_v5 = vadd.f32 %v5486_v1, %v2203_v52  ;;  %v2316_v13 = vadd.f32 %v5489_v24, %v2204_v26 }
 0x2a1   :  { %v1892_v11 = vmul.f32 0.00390625, %v1754_v4  ;;  %v3282_v63 = vpop.eup %3281  ;;  %2662 = vst [vmem:[#allocation7 + $0x8] sm:$0xff] %v2862_v51  ;;  %2663 = vst [vmem:[#allocation7 + $0x10] sm:$0xff] %v2863_v0  ;;  %v6239_v4 = vld [vmem:[#allocation82_spill] sm:$0xff] }
 0x2a2   :  { %v3284_v39 = vpop.eup %3283  ;;  %v2093_v55 = vmul.f32 %v3282_v63, %v5030_v36  ;;  %v2094_v2 = vmul.f32 %v3282_v63, %v5033_v58  ;;  %v1967_v22 = vadd.f32 1e-12, %v1917_v15  ;;  %v2888_v14 = vpack.c.bf16 %v2316_v13, %v2315_v5  ;;  %v6240_v15 = vld [vmem:[#allocation26_spill] sm:$0xff] }
 0x2a3   :  { %v1942_v30 = vadd.f32 1e-12, %v1892_v11  ;;  %v2043_v41 = vmul.f32 %v3284_v39, %v5024_v23  ;;  %v2044_v21 = vmul.f32 %v3284_v39, %v6238_v9  ;;  %v1757_v6 = vpop.xlane.xlu0 %1756 }
 0x2a4   :  { %v1832_v53 = vpop.xlane.xlu1 %1831  ;;  %v2205_v48 = vmul.f32 %v5480_v29, %v2093_v55  ;;  %v2206_v32 = vmul.f32 %v5483_v56, %v2094_v2  ;;  %3289 = vrsqrt.f32 %v1967_v22  ;;  %v1893_v49 = vmul.f32 0.00390625, %v1757_v6  ;;  %2688 = vst [vmem:[#allocation7 + $0xd8] sm:$0xff] %v2888_v14  ;;  %v6241_v22 = vld [vmem:[#allocation79_spill] sm:$0xff]  ;;  %v6242_v14 = vld [vmem:[#allocation81_spill] sm:$0xff] }
 0x2a5   :  { %v2155_v36 = vmul.f32 %v5480_v29, %v2043_v41  ;;  %v2156_v58 = vmul.f32 %v5483_v56, %v2044_v21  ;;  %3291 = vrsqrt.f32 %v1942_v30  ;;  %v1918_v10 = vmul.f32 0.00390625, %v1832_v53  ;;  %v3286_v45 = vpop.eup %3285 }
 0x2a6   :  { %v2317_v23 = vadd.f32 %v5486_v1, %v2205_v48  ;;  %v2318_v51 = vadd.f32 %v5489_v24, %v2206_v32  ;;  %v1943_v52 = vadd.f32 1e-12, %v1893_v49  ;;  %v2045_v0 = vmul.f32 %v3286_v45, %v6239_v4  ;;  %v3288_v63 = vpop.eup %3287 }
 0x2a7   :  { %v2267_v26 = vadd.f32 %v5486_v1, %v2155_v36  ;;  %v2268_v16 = vadd.f32 %v5489_v24, %v2156_v58  ;;  %v2046_v11 = vmul.f32 %v3286_v45, %v6240_v15  ;;  %v1968_v13 = vadd.f32 1e-12, %v1918_v10 }
 0x2a8   :  { %v2889_v5 = vpack.c.bf16 %v2318_v51, %v2317_v23  ;;  %3293 = vrsqrt.f32 %v1943_v52  ;;  %v2157_v55 = vmul.f32 %v5480_v29, %v2045_v0  ;;  %v2095_v30 = vmul.f32 %v3288_v63, %v6241_v22  ;;  %v6243_v52 = vld [vmem:[#allocation84_spill] sm:$0xff] }
 0x2a9   :  { %v2864_v39 = vpack.c.bf16 %v2268_v16, %v2267_v26  ;;  %v2158_v2 = vmul.f32 %v5483_v56, %v2046_v11  ;;  %v2096_v41 = vmul.f32 %v3288_v63, %v6242_v14  ;;  %3295 = vrsqrt.f32 %v1968_v13  ;;  %v6244_v16 = vld [vmem:[#allocation13_spill] sm:$0xff]  ;;  %v6245_v63 = vld [vmem:[#allocation50_spill] sm:$0xff]  ;;  %v6246_v13 = vld [vmem:[#allocation51_spill] sm:$0xff] }
 0x2aa   :  { %2689 = vst [vmem:[#allocation7 + $0xe0] sm:$0xff] %v2889_v5  ;;  %v2269_v9 = vadd.f32 %v5486_v1, %v2157_v55  ;;  %v2207_v6 = vmul.f32 %v5480_v29, %v2095_v30 }
 0x2ab   :  { %2664 = vst [vmem:[#allocation7 + $0x18] sm:$0xff] %v2864_v39  ;;  %v2270_v21 = vadd.f32 %v5489_v24, %v2158_v2  ;;  %v2208_v53 = vmul.f32 %v5483_v56, %v2096_v41 }
 0x2ac   :  { %v2319_v36 = vadd.f32 %v5486_v1, %v2207_v6 }
 0x2ad   :  { %v1760_v32 = vpop.xlane.xlu1 %1759  ;;  %v2865_v49 = vpack.c.bf16 %v2270_v21, %v2269_v9  ;;  %v2320_v23 = vadd.f32 %v5489_v24, %v2208_v53 }
 0x2ae   :  { %v1835_v48 = vpop.xlane.xlu0 %1834  ;;  %v1894_v10 = vmul.f32 0.00390625, %v1760_v32  ;;  %v3290_v45 = vpop.eup %3289  ;;  %v6247_v32 = vld [vmem:[#allocation19_spill] sm:$0xff] }
 0x2af   :  { %v1919_v58 = vmul.f32 0.00390625, %v1835_v48  ;;  %v3292_v51 = vpop.eup %3291  ;;  %2665 = vst [vmem:[#allocation7 + $0x20] sm:$0xff] %v2865_v49  ;;  %v2097_v26 = vmul.f32 %v3290_v45, %v6243_v52  ;;  %v2098_v4 = vmul.f32 %v3290_v45, %v6244_v16  ;;  %v2890_v11 = vpack.c.bf16 %v2320_v23, %v2319_v36  ;;  %v6248_v36 = vld [vmem:[#allocation20_spill] sm:$0xff] }
 0x2b0   :  { %v1944_v15 = vadd.f32 1e-12, %v1894_v10  ;;  %v2047_v5 = vmul.f32 %v3292_v51, %v6245_v63  ;;  %v2048_v39 = vmul.f32 %v3292_v51, %v6246_v13  ;;  %v6250_v63 = vld [vmem:[#allocation18_spill] sm:$0xff] }
 0x2b1   :  { %v1969_v0 = vadd.f32 1e-12, %v1919_v58  ;;  %v1838_v2 = vpop.xlane.xlu1 %1837  ;;  %v2209_v22 = vmul.f32 %v5480_v29, %v2097_v26  ;;  %v2210_v30 = vmul.f32 %v5483_v56, %v2098_v4  ;;  %2690 = vst [vmem:[#allocation7 + $0xe8] sm:$0xff] %v2890_v11 }
 0x2b2   :  { %v1763_v55 = vpop.xlane.xlu0 %1762  ;;  %v3294_v41 = vpop.eup %3293  ;;  %v2159_v9 = vmul.f32 %v5480_v29, %v2047_v5  ;;  %v2160_v21 = vmul.f32 %v5483_v56, %v2048_v39  ;;  %v1920_v6 = vmul.f32 0.00390625, %v1838_v2 }
 0x2b3   :  { %3297 = vrsqrt.f32 %v1969_v0  ;;  %v1895_v14 = vmul.f32 0.00390625, %v1763_v55  ;;  %v2321_v53 = vadd.f32 %v5486_v1, %v2209_v22  ;;  %v2322_v48 = vadd.f32 %v5489_v24, %v2210_v30  ;;  %v3296_v10 = vpop.eup %3295  ;;  %v6249_v0 = vld [vmem:[#allocation14_spill] sm:$0xff] }
 0x2b4   :  { %3299 = vrsqrt.f32 %v1944_v15  ;;  %v2049_v49 = vmul.f32 %v3294_v41, %v6247_v32  ;;  %v2050_v58 = vmul.f32 %v3294_v41, %v6248_v36  ;;  %v2271_v45 = vadd.f32 %v5486_v1, %v2159_v9 }
 0x2b5   :  { %v2272_v23 = vadd.f32 %v5489_v24, %v2160_v21  ;;  %v1945_v51 = vadd.f32 1e-12, %v1895_v14  ;;  %v1970_v52 = vadd.f32 1e-12, %v1920_v6  ;;  %v2891_v26 = vpack.c.bf16 %v2322_v48, %v2321_v53 }
 0x2b6   :  { %v2161_v16 = vmul.f32 %v5480_v29, %v2049_v49  ;;  %v2162_v4 = vmul.f32 %v5483_v56, %v2050_v58  ;;  %v2099_v15 = vmul.f32 %v3296_v10, %v6249_v0  ;;  %v2100_v5 = vmul.f32 %v3296_v10, %v6250_v63  ;;  %v6251_v49 = vld [vmem:[#allocation16_spill] sm:$0xff]  ;;  %v6252_v58 = vld [vmem:[#allocation22_spill] sm:$0xff] }
 0x2b7   :  { %v2866_v11 = vpack.c.bf16 %v2272_v23, %v2271_v45  ;;  %3301 = vrsqrt.f32 %v1945_v51  ;;  %2691 = vst [vmem:[#allocation7 + $0xf0] sm:$0xff] %v2891_v26  ;;  %v6253_v23 = vld [vmem:[#allocation21_spill] sm:$0xff] }
 0x2b8   :  { %v2273_v13 = vadd.f32 %v5486_v1, %v2161_v16  ;;  %v2274_v39 = vadd.f32 %v5489_v24, %v2162_v4  ;;  %v2211_v55 = vmul.f32 %v5480_v29, %v2099_v15  ;;  %3303 = vrsqrt.f32 %v1970_v52  ;;  %v6254_v52 = vld [vmem:[#allocation15_spill] sm:$0xff] }
 0x2b9   :  { %2666 = vst [vmem:[#allocation7 + $0x28] sm:$0xff] %v2866_v11  ;;  %v2212_v2 = vmul.f32 %v5483_v56, %v2100_v5 }
 0x2ba   :  { %v2867_v22 = vpack.c.bf16 %v2274_v39, %v2273_v13  ;;  %v2323_v30 = vadd.f32 %v5486_v1, %v2211_v55  ;;  %v1766_v41 = vpop.xlane.xlu1 %1765 }
 0x2bb   :  { %v1841_v14 = vpop.xlane.xlu0 %1840  ;;  %v2324_v9 = vadd.f32 %v5489_v24, %v2212_v2  ;;  %v1896_v6 = vmul.f32 0.00390625, %v1766_v41 }
 0x2bc   :  { %v1921_v21 = vmul.f32 0.00390625, %v1841_v14  ;;  %2667 = vst [vmem:[#allocation7 + $0x30] sm:$0xff] %v2867_v22 }
 0x2bd   :  { %v3298_v53 = vpop.eup %3297  ;;  %v2892_v32 = vpack.c.bf16 %v2324_v9, %v2323_v30  ;;  %v1946_v16 = vadd.f32 1e-12, %v1896_v6 }
 0x2be   :  { %v3300_v48 = vpop.eup %3299  ;;  %v2101_v36 = vmul.f32 %v3298_v53, %v6251_v49  ;;  %v2102_v10 = vmul.f32 %v3298_v53, %v6252_v58  ;;  %v1971_v45 = vadd.f32 1e-12, %v1921_v21  ;;  %v1844_v0 = vpop.xlane.xlu1 %1843  ;;  %v6255_v21 = vld [vmem:[#allocation35_spill] sm:$0xff]  ;;  %v6256_v53 = vld [vmem:[#allocation36_spill] sm:$0xff]  ;;  %v6258_v58 = vld [vmem:[#allocation33_spill] sm:$0xff] }
 0x2bf   :  { %v2051_v51 = vmul.f32 %v3300_v48, %v6253_v23  ;;  %v2052_v26 = vmul.f32 %v3300_v48, %v6254_v52  ;;  %v1769_v4 = vpop.xlane.xlu0 %1768  ;;  %2692 = vst [vmem:[#allocation7 + $0xf8] sm:$0xff] %v2892_v32  ;;  %v1922_v39 = vmul.f32 0.00390625, %v1844_v0  ;;  %v6257_v49 = vld [vmem:[#allocation23_spill] sm:$0xff] }
 0x2c0   :  { %v2213_v15 = vmul.f32 %v5480_v29, %v2101_v36  ;;  %v2214_v11 = vmul.f32 %v5483_v56, %v2102_v10  ;;  %3305 = vrsqrt.f32 %v1971_v45  ;;  %v1897_v63 = vmul.f32 0.00390625, %v1769_v4 }
 0x2c1   :  { %v2163_v5 = vmul.f32 %v5480_v29, %v2051_v51  ;;  %v2164_v13 = vmul.f32 %v5483_v56, %v2052_v26  ;;  %3307 = vrsqrt.f32 %v1946_v16  ;;  %v3302_v55 = vpop.eup %3301  ;;  %v1972_v52 = vadd.f32 1e-12, %v1922_v39 }
 0x2c2   :  { %v2325_v2 = vadd.f32 %v5486_v1, %v2213_v15  ;;  %v2326_v22 = vadd.f32 %v5489_v24, %v2214_v11  ;;  %v1947_v30 = vadd.f32 1e-12, %v1897_v63  ;;  %v3304_v14 = vpop.eup %3303  ;;  %v2053_v6 = vmul.f32 %v3302_v55, %v6255_v21 }
 0x2c3   :  { %v2275_v41 = vadd.f32 %v5486_v1, %v2163_v5  ;;  %v2276_v9 = vadd.f32 %v5489_v24, %v2164_v13  ;;  %v2054_v48 = vmul.f32 %v3302_v55, %v6256_v53  ;;  %v2103_v36 = vmul.f32 %v3304_v14, %v6257_v49  ;;  %v6260_v53 = vld [vmem:[#allocation37_spill] sm:$0xff] }
 0x2c4   :  { %v2893_v32 = vpack.c.bf16 %v2326_v22, %v2325_v2  ;;  %v2104_v10 = vmul.f32 %v3304_v14, %v6258_v58  ;;  %3309 = vrsqrt.f32 %v1947_v30  ;;  %v2165_v23 = vmul.f32 %v5480_v29, %v2053_v6 }
 0x2c5   :  { %v2868_v45 = vpack.c.bf16 %v2276_v9, %v2275_v41  ;;  %v2166_v51 = vmul.f32 %v5483_v56, %v2054_v48  ;;  %v2215_v26 = vmul.f32 %v5480_v29, %v2103_v36  ;;  %3311 = vrsqrt.f32 %v1972_v52  ;;  %v6259_v41 = vld [vmem:[#allocation39_spill] sm:$0xff] }
 0x2c6   :  { %2693 = vst [vmem:[#allocation7 + $0x100] sm:$0xff] %v2893_v32  ;;  %v2216_v16 = vmul.f32 %v5483_v56, %v2104_v10  ;;  %v2277_v4 = vadd.f32 %v5486_v1, %v2165_v23  ;;  %v6261_v32 = vld [vmem:[#allocation38_spill] sm:$0xff] }
 0x2c7   :  { %2668 = vst [vmem:[#allocation7 + $0x38] sm:$0xff] %v2868_v45  ;;  %v2278_v0 = vadd.f32 %v5489_v24, %v2166_v51  ;;  %v2327_v15 = vadd.f32 %v5486_v1, %v2215_v26  ;;  %v1772_v5 = vpop.xlane.xlu1 %1771 }
 0x2c8   :  { %v2328_v11 = vadd.f32 %v5489_v24, %v2216_v16  ;;  %v1847_v63 = vpop.xlane.xlu0 %1846  ;;  %v1898_v39 = vmul.f32 0.00390625, %v1772_v5 }
 0x2c9   :  { %v2869_v13 = vpack.c.bf16 %v2278_v0, %v2277_v4  ;;  %v1923_v55 = vmul.f32 0.00390625, %v1847_v63  ;;  %v6262_v0 = vld [vmem:[#allocation45_spill] sm:$0xff] }
 0x2ca   :  { %v3306_v2 = vpop.eup %3305  ;;  %v2894_v22 = vpack.c.bf16 %v2328_v11, %v2327_v15  ;;  %v1948_v6 = vadd.f32 1e-12, %v1898_v39  ;;  %v6263_v11 = vld [vmem:[#allocation46_spill] sm:$0xff] }
 0x2cb   :  { %v3308_v30 = vpop.eup %3307  ;;  %2669 = vst [vmem:[#allocation7 + $0x40] sm:$0xff] %v2869_v13  ;;  %v2105_v14 = vmul.f32 %v3306_v2, %v5150_v20  ;;  %v2106_v9 = vmul.f32 %v3306_v2, %v6259_v41  ;;  %v1973_v21 = vadd.f32 1e-12, %v1923_v55  ;;  %v1850_v58 = vpop.xlane.xlu1 %1849 }
 0x2cc   :  { %2694 = vst [vmem:[#allocation7 + $0x108] sm:$0xff] %v2894_v22  ;;  %v2055_v48 = vmul.f32 %v3308_v30, %v6260_v53  ;;  %v2056_v49 = vmul.f32 %v3308_v30, %v6261_v32  ;;  %v1775_v36 = vpop.xlane.xlu0 %1774  ;;  %v1924_v26 = vmul.f32 0.00390625, %v1850_v58 }
 0x2cd   :  { %v2217_v10 = vmul.f32 %v5480_v29, %v2105_v14  ;;  %v2218_v45 = vmul.f32 %v5483_v56, %v2106_v9  ;;  %3313 = vrsqrt.f32 %v1973_v21  ;;  %v1899_v23 = vmul.f32 0.00390625, %v1775_v36  ;;  %v6264_v9 = vld [vmem:[#allocation40_spill] sm:$0xff] }
 0x2ce   :  { %v3310_v51 = vpop.eup %3309  ;;  %v2167_v20 = vmul.f32 %v5480_v29, %v2055_v48  ;;  %v2168_v52 = vmul.f32 %v5483_v56, %v2056_v49  ;;  %3315 = vrsqrt.f32 %v1948_v6  ;;  %v1974_v39 = vadd.f32 1e-12, %v1924_v26  ;;  %v6265_v6 = vld [vmem:[#allocation41_spill] sm:$0xff] }
 0x2cf   :  { %v2329_v16 = vadd.f32 %v5486_v1, %v2217_v10  ;;  %v2330_v4 = vadd.f32 %v5489_v24, %v2218_v45  ;;  %v2057_v15 = vmul.f32 %v3310_v51, %v6262_v0  ;;  %v2058_v63 = vmul.f32 %v3310_v51, %v6263_v11  ;;  %v3312_v2 = vpop.eup %3311  ;;  %v6266_v0 = vld [vmem:[#allocation17_spill] sm:$0xff]  ;;  %v6267_v11 = vld [vmem:[#allocation24_spill] sm:$0xff] }
 0x2d0   :  { %v2279_v5 = vadd.f32 %v5486_v1, %v2167_v20  ;;  %v2280_v13 = vadd.f32 %v5489_v24, %v2168_v52  ;;  %v1949_v55 = vadd.f32 1e-12, %v1899_v23  ;;  %v2107_v21 = vmul.f32 %v3312_v2, %v6264_v9 }
 0x2d1   :  { %v2895_v22 = vpack.c.bf16 %v2330_v4, %v2329_v16  ;;  %v2169_v30 = vmul.f32 %v5480_v29, %v2057_v15  ;;  %v2170_v14 = vmul.f32 %v5483_v56, %v2058_v63  ;;  %v2108_v53 = vmul.f32 %v3312_v2, %v6265_v6 }
 0x2d2   :  { %v2870_v41 = vpack.c.bf16 %v2280_v13, %v2279_v5  ;;  %3317 = vrsqrt.f32 %v1949_v55  ;;  %v2219_v49 = vmul.f32 %v5480_v29, %v2107_v21  ;;  %v6268_v13 = vld [vmem:[#allocation47_spill] sm:$0xff] }
 0x2d3   :  { %2695 = vst [vmem:[#allocation7 + $0x110] sm:$0xff] %v2895_v22  ;;  %v2281_v48 = vadd.f32 %v5486_v1, %v2169_v30  ;;  %v2282_v32 = vadd.f32 %v5489_v24, %v2170_v14  ;;  %3319 = vrsqrt.f32 %v1974_v39  ;;  %v2220_v36 = vmul.f32 %v5483_v56, %v2108_v53  ;;  %v6269_v39 = vld [vmem:[#allocation48_spill] sm:$0xff] }
 0x2d4   :  { %2670 = vst [vmem:[#allocation7 + $0x48] sm:$0xff] %v2870_v41  ;;  %v1778_v45 = vpop.xlane.xlu1 %1777  ;;  %v2331_v23 = vadd.f32 %v5486_v1, %v2219_v49 }
 0x2d5   :  { %v2871_v58 = vpack.c.bf16 %v2282_v32, %v2281_v48  ;;  %v1853_v10 = vpop.xlane.xlu0 %1852  ;;  %v2332_v51 = vadd.f32 %v5489_v24, %v2220_v36  ;;  %v1900_v52 = vmul.f32 0.00390625, %v1778_v45 }
 0x2d6   :  { %v1925_v20 = vmul.f32 0.00390625, %v1853_v10 }
 0x2d7   :  { %v3314_v26 = vpop.eup %3313  ;;  %2671 = vst [vmem:[#allocation7 + $0x50] sm:$0xff] %v2871_v58  ;;  %v2896_v4 = vpack.c.bf16 %v2332_v51, %v2331_v23  ;;  %v1950_v22 = vadd.f32 1e-12, %v1900_v52  ;;  %v6270_v51 = vld [vmem:[#allocation31_spill] sm:$0xff] }
 0x2d8   :  { %v3316_v16 = vpop.eup %3315  ;;  %v2109_v15 = vmul.f32 %v3314_v26, %v6266_v0  ;;  %v2110_v63 = vmul.f32 %v3314_v26, %v6267_v11  ;;  %v1975_v5 = vadd.f32 1e-12, %v1925_v20  ;;  %v1856_v14 = vpop.xlane.xlu1 %1855  ;;  %v6271_v52 = vld [vmem:[#allocation63_spill] sm:$0xff] }
 0x2d9   :  { %v2059_v55 = vmul.f32 %v3316_v16, %v6268_v13  ;;  %v2060_v2 = vmul.f32 %v3316_v16, %v6269_v39  ;;  %v1781_v30 = vpop.xlane.xlu0 %1780  ;;  %2696 = vst [vmem:[#allocation7 + $0x118] sm:$0xff] %v2896_v4  ;;  %v1926_v48 = vmul.f32 0.00390625, %v1856_v14  ;;  %v6272_v4 = vld [vmem:[#allocation25_spill] sm:$0xff] }
 0x2da   :  { %v2221_v41 = vmul.f32 %v5480_v29, %v2109_v15  ;;  %v2222_v9 = vmul.f32 %v5483_v56, %v2110_v63  ;;  %3321 = vrsqrt.f32 %v1975_v5  ;;  %v1901_v21 = vmul.f32 0.00390625, %v1781_v30  ;;  %v6273_v15 = vld [vmem:[#allocation53_spill] sm:$0xff] }
 0x2db   :  { %v2171_v6 = vmul.f32 %v5480_v29, %v2059_v55  ;;  %v2172_v53 = vmul.f32 %v5483_v56, %v2060_v2  ;;  %3323 = vrsqrt.f32 %v1950_v22  ;;  %v1976_v55 = vadd.f32 1e-12, %v1926_v48 }
 0x2dc   :  { %v3318_v32 = vpop.eup %3317  ;;  %v2333_v49 = vadd.f32 %v5486_v1, %v2221_v41  ;;  %v2334_v36 = vadd.f32 %v5489_v24, %v2222_v9  ;;  %v1951_v58 = vadd.f32 1e-12, %v1901_v21 }
 0x2dd   :  { %v3320_v10 = vpop.eup %3319  ;;  %v2283_v45 = vadd.f32 %v5486_v1, %v2171_v6  ;;  %v2284_v23 = vadd.f32 %v5489_v24, %v2172_v53  ;;  %v2061_v20 = vmul.f32 %v3318_v32, %v6270_v51  ;;  %v2062_v26 = vmul.f32 %v3318_v32, %v6271_v52  ;;  %v6276_v52 = vld [vmem:[#allocation28_spill] sm:$0xff] }
 0x2de   :  { %v2897_v16 = vpack.c.bf16 %v2334_v36, %v2333_v49  ;;  %v2111_v0 = vmul.f32 %v3320_v10, %v6272_v4  ;;  %v2112_v11 = vmul.f32 %v3320_v10, %v6273_v15  ;;  %3325 = vrsqrt.f32 %v1951_v58  ;;  %v6274_v58 = vld [vmem:[#allocation32_spill] sm:$0xff] }
 0x2df   :  { %v2872_v63 = vpack.c.bf16 %v2284_v23, %v2283_v45  ;;  %v2173_v5 = vmul.f32 %v5480_v29, %v2061_v20  ;;  %v2174_v13 = vmul.f32 %v5483_v56, %v2062_v26  ;;  %3327 = vrsqrt.f32 %v1976_v55  ;;  %v6275_v45 = vld [vmem:[#allocation64_spill] sm:$0xff] }
 0x2e0   :  { %2697 = vst [vmem:[#allocation7 + $0x120] sm:$0xff] %v2897_v16  ;;  %v2223_v39 = vmul.f32 %v5480_v29, %v2111_v0  ;;  %v2224_v2 = vmul.f32 %v5483_v56, %v2112_v11  ;;  %v6277_v16 = vld [vmem:[#allocation30_spill] sm:$0xff] }
 0x2e1   :  { %2672 = vst [vmem:[#allocation7 + $0x58] sm:$0xff] %v2872_v63  ;;  %v2285_v22 = vadd.f32 %v5486_v1, %v2173_v5  ;;  %v2286_v30 = vadd.f32 %v5489_v24, %v2174_v13  ;;  %v1784_v21 = vpop.xlane.xlu1 %1783 }
 0x2e2   :  { %v2335_v14 = vadd.f32 %v5486_v1, %v2223_v39  ;;  %v2336_v41 = vadd.f32 %v5489_v24, %v2224_v2  ;;  %v1859_v9 = vpop.xlane.xlu0 %1858  ;;  %v1902_v48 = vmul.f32 0.00390625, %v1784_v21 }
 0x2e3   :  { %v2873_v6 = vpack.c.bf16 %v2286_v30, %v2285_v22  ;;  %v1927_v53 = vmul.f32 0.00390625, %v1859_v9  ;;  %v6279_v9 = vld [vmem:[#allocation77_spill] sm:$0xff] }
 0x2e4   :  { %v3322_v32 = vpop.eup %3321  ;;  %v2898_v49 = vpack.c.bf16 %v2336_v41, %v2335_v14  ;;  %v1952_v20 = vadd.f32 1e-12, %v1902_v48  ;;  %v6278_v14 = vld [vmem:[#allocation74_spill] sm:$0xff] }
 0x2e5   :  { %v3324_v36 = vpop.eup %3323  ;;  %2673 = vst [vmem:[#allocation7 + $0x60] sm:$0xff] %v2873_v6  ;;  %v2113_v10 = vmul.f32 %v3322_v32, %v6274_v58  ;;  %v2114_v23 = vmul.f32 %v3322_v32, %v6275_v45  ;;  %v1977_v51 = vadd.f32 1e-12, %v1927_v53  ;;  %v1862_v15 = vpop.xlane.xlu1 %1861 }
 0x2e6   :  { %2698 = vst [vmem:[#allocation7 + $0x128] sm:$0xff] %v2898_v49  ;;  %v2063_v26 = vmul.f32 %v3324_v36, %v6276_v52  ;;  %v2064_v4 = vmul.f32 %v3324_v36, %v6277_v16  ;;  %v1787_v0 = vpop.xlane.xlu0 %1786  ;;  %v1928_v2 = vmul.f32 0.00390625, %v1862_v15 }
 0x2e7   :  { %v2225_v11 = vmul.f32 %v5480_v29, %v2113_v10  ;;  %v2226_v63 = vmul.f32 %v5483_v56, %v2114_v23  ;;  %3329 = vrsqrt.f32 %v1977_v51  ;;  %v1903_v5 = vmul.f32 0.00390625, %v1787_v0  ;;  %v6280_v23 = vld [vmem:[#allocation65_spill] sm:$0xff] }
 0x2e8   :  { %v3326_v13 = vpop.eup %3325  ;;  %v2175_v55 = vmul.f32 %v5480_v29, %v2063_v26  ;;  %v2176_v39 = vmul.f32 %v5483_v56, %v2064_v4  ;;  %3331 = vrsqrt.f32 %v1952_v20  ;;  %v1978_v32 = vadd.f32 1e-12, %v1928_v2  ;;  %v6281_v20 = vld [vmem:[#allocation66_spill] sm:$0xff] }
 0x2e9   :  { %v2337_v22 = vadd.f32 %v5486_v1, %v2225_v11  ;;  %v2338_v30 = vadd.f32 %v5489_v24, %v2226_v63  ;;  %v2065_v41 = vmul.f32 %v3326_v13, %v6278_v14  ;;  %v2066_v21 = vmul.f32 %v3326_v13, %v6279_v9  ;;  %v3328_v49 = vpop.eup %3327 }
 0x2ea   :  { %v2287_v6 = vadd.f32 %v5486_v1, %v2175_v55  ;;  %v2288_v53 = vadd.f32 %v5489_v24, %v2176_v39  ;;  %v1953_v48 = vadd.f32 1e-12, %v1903_v5  ;;  %v2115_v51 = vmul.f32 %v3328_v49, %v6280_v23 }
 0x2eb   :  { %v2899_v36 = vpack.c.bf16 %v2338_v30, %v2337_v22  ;;  %v2177_v58 = vmul.f32 %v5480_v29, %v2065_v41  ;;  %v2178_v10 = vmul.f32 %v5483_v56, %v2066_v21  ;;  %v2116_v52 = vmul.f32 %v3328_v49, %v6281_v20  ;;  %v6282_v41 = vld [vmem:[#allocation44_spill] sm:$0xff] }
 0x2ec   :  { %v2874_v45 = vpack.c.bf16 %v2288_v53, %v2287_v6  ;;  %3333 = vrsqrt.f32 %v1953_v48  ;;  %v2227_v4 = vmul.f32 %v5480_v29, %v2115_v51  ;;  %v6283_v6 = vld [vmem:[#allocation42_spill] sm:$0xff]  ;;  %v6284_v48 = vld [vmem:[#allocation43_spill] sm:$0xff] }
 0x2ed   :  { %2699 = vst [vmem:[#allocation7 + $0x130] sm:$0xff] %v2899_v36  ;;  %v2289_v26 = vadd.f32 %v5486_v1, %v2177_v58  ;;  %v2290_v16 = vadd.f32 %v5489_v24, %v2178_v10  ;;  %3335 = vrsqrt.f32 %v1978_v32  ;;  %v2228_v0 = vmul.f32 %v5483_v56, %v2116_v52 }
 0x2ee   :  { %2674 = vst [vmem:[#allocation7 + $0x68] sm:$0xff] %v2874_v45  ;;  %v1790_v63 = vpop.xlane.xlu1 %1789  ;;  %v2339_v5 = vadd.f32 %v5486_v1, %v2227_v4 }
 0x2ef   :  { %v2875_v15 = vpack.c.bf16 %v2290_v16, %v2289_v26  ;;  %v1865_v11 = vpop.xlane.xlu0 %1864  ;;  %v2340_v13 = vadd.f32 %v5489_v24, %v2228_v0  ;;  %v1904_v39 = vmul.f32 0.00390625, %v1790_v63 }
 0x2f0   :  { %v1929_v55 = vmul.f32 0.00390625, %v1865_v11 }
 0x2f1   :  { %v3330_v2 = vpop.eup %3329  ;;  %2675 = vst [vmem:[#allocation7 + $0x70] sm:$0xff] %v2875_v15  ;;  %v2900_v30 = vpack.c.bf16 %v2340_v13, %v2339_v5  ;;  %v1954_v49 = vadd.f32 1e-12, %v1904_v39 }
 0x2f2   :  { %v3332_v22 = vpop.eup %3331  ;;  %v2117_v14 = vmul.f32 %v3330_v2, %v5270_v42  ;;  %v2118_v9 = vmul.f32 %v3330_v2, %v6282_v41  ;;  %v1979_v21 = vadd.f32 1e-12, %v1929_v55  ;;  %v1868_v58 = vpop.xlane.xlu1 %1867  ;;  %v6285_v2 = vld [vmem:[#allocation80_spill] sm:$0xff] }
 0x2f3   :  { %v2067_v53 = vmul.f32 %v3332_v22, %v6283_v6  ;;  %v2068_v32 = vmul.f32 %v3332_v22, %v6284_v48  ;;  %v1793_v36 = vpop.xlane.xlu0 %1792  ;;  %2700 = vst [vmem:[#allocation7 + $0x138] sm:$0xff] %v2900_v30  ;;  %v1930_v20 = vmul.f32 0.00390625, %v1868_v58 }
 0x2f4   :  { %v2229_v10 = vmul.f32 %v5480_v29, %v2117_v14  ;;  %v2230_v45 = vmul.f32 %v5483_v56, %v2118_v9  ;;  %3337 = vrsqrt.f32 %v1979_v21  ;;  %v1905_v23 = vmul.f32 0.00390625, %v1793_v36 }
 0x2f5   :  { %v2179_v51 = vmul.f32 %v5480_v29, %v2067_v53  ;;  %v2180_v42 = vmul.f32 %v5483_v56, %v2068_v32  ;;  %3339 = vrsqrt.f32 %v1954_v49  ;;  %v1980_v21 = vadd.f32 1e-12, %v1930_v20 }
 0x2f6   :  { %v3334_v52 = vpop.eup %3333  ;;  %v2341_v26 = vadd.f32 %v5486_v1, %v2229_v10  ;;  %v2342_v16 = vadd.f32 %v5489_v24, %v2230_v45  ;;  %v1955_v4 = vadd.f32 1e-12, %v1905_v23 }
 0x2f7   :  { %v3336_v0 = vpop.eup %3335  ;;  %v2291_v15 = vadd.f32 %v5486_v1, %v2179_v51  ;;  %v2292_v11 = vadd.f32 %v5489_v24, %v2180_v42  ;;  %v2069_v63 = vmul.f32 %v3334_v52, %v5290_v19  ;;  %v2070_v5 = vmul.f32 %v3334_v52, %v5293_v57  ;;  %v1796_v55 = vpop.xlane.xlu1 %1795 }
 0x2f8   :  { %v1871_v13 = vpop.xlane.xlu0 %1870  ;;  %v2901_v39 = vpack.c.bf16 %v2342_v16, %v2341_v26  ;;  %v2119_v22 = vmul.f32 %v3336_v0, %v6285_v2  ;;  %v2120_v30 = vmul.f32 %v3336_v0, %v5287_v59  ;;  %3341 = vrsqrt.f32 %v1955_v4  ;;  %v6286_v16 = vld [vmem:[#allocation34_spill] sm:$0xff] }
 0x2f9   :  { %v2876_v14 = vpack.c.bf16 %v2292_v11, %v2291_v15  ;;  %v2181_v41 = vmul.f32 %v5480_v29, %v2069_v63  ;;  %v2182_v9 = vmul.f32 %v5483_v56, %v2070_v5  ;;  %v1931_v57 = vmul.f32 0.00390625, %v1871_v13  ;;  %v6287_v0 = vld [vmem:[#allocation58_spill] sm:$0xff]  ;;  %v6288_v13 = vld [vmem:[#allocation49_spill] sm:$0xff] }
 0x2fa   :  { %2701 = vst [vmem:[#allocation7 + $0x140] sm:$0xff] %v2901_v39  ;;  %v2231_v6 = vmul.f32 %v5480_v29, %v2119_v22  ;;  %v2232_v19 = vmul.f32 %v5483_v56, %v2120_v30  ;;  %v1906_v53 = vmul.f32 0.00390625, %v1796_v55  ;;  %3343 = vrsqrt.f32 %v1980_v21  ;;  %v6289_v39 = vld [vmem:[#allocation83_spill] sm:$0xff] }
 0x2fb   :  { %2676 = vst [vmem:[#allocation7 + $0x78] sm:$0xff] %v2876_v14  ;;  %v2293_v48 = vadd.f32 %v5486_v1, %v2181_v41  ;;  %v2294_v32 = vadd.f32 %v5489_v24, %v2182_v9  ;;  %v1874_v49 = vpop.xlane.xlu1 %1873  ;;  %v1981_v10 = vadd.f32 1e-12, %v1931_v57 }
 0x2fc   :  { %v1799_v59 = vpop.xlane.xlu0 %1798  ;;  %v2343_v36 = vadd.f32 %v5486_v1, %v2231_v6  ;;  %v2344_v58 = vadd.f32 %v5489_v24, %v2232_v19  ;;  %v1956_v45 = vadd.f32 1e-12, %v1906_v53  ;;  %v1932_v42 = vmul.f32 0.00390625, %v1874_v49 }
 0x2fd   :  { %v2877_v23 = vpack.c.bf16 %v2294_v32, %v2293_v48  ;;  %v1907_v51 = vmul.f32 0.00390625, %v1799_v59  ;;  %3345 = vrsqrt.f32 %v1981_v10 }
 0x2fe   :  { %v3338_v20 = vpop.eup %3337  ;;  %v2902_v52 = vpack.c.bf16 %v2344_v58, %v2343_v36  ;;  %3347 = vrsqrt.f32 %v1956_v45  ;;  %v1982_v22 = vadd.f32 1e-12, %v1932_v42 }
 0x2ff   :  { %v3340_v26 = vpop.eup %3339  ;;  %2677 = vst [vmem:[#allocation7 + $0x80] sm:$0xff] %v2877_v23  ;;  %v2121_v4 = vmul.f32 %v3338_v20, %v6286_v16  ;;  %v2122_v15 = vmul.f32 %v3338_v20, %v6287_v0  ;;  %v1957_v11 = vadd.f32 1e-12, %v1907_v51  ;;  %v1802_v5 = vpop.xlane.xlu1 %1801  ;;  %v6290_v16 = vld [vmem:[#allocation54_spill] sm:$0xff] }
 0x300   :  { %v1877_v63 = vpop.xlane.xlu0 %1876  ;;  %2702 = vst [vmem:[#allocation7 + $0x148] sm:$0xff] %v2902_v52  ;;  %v2071_v55 = vmul.f32 %v3340_v26, %v6288_v13  ;;  %v2072_v2 = vmul.f32 %v3340_v26, %v6289_v39  ;;  %v1908_v9 = vmul.f32 0.00390625, %v1802_v5 }
 0x301   :  { %v1933_v30 = vmul.f32 0.00390625, %v1877_v63  ;;  %v2233_v14 = vmul.f32 %v5480_v29, %v2121_v4  ;;  %v2234_v41 = vmul.f32 %v5483_v56, %v2122_v15  ;;  %3349 = vrsqrt.f32 %v1957_v11 }
 0x302   :  { %v3342_v21 = vpop.eup %3341  ;;  %v2183_v6 = vmul.f32 %v5480_v29, %v2071_v55  ;;  %v2184_v19 = vmul.f32 %v5483_v56, %v2072_v2  ;;  %3351 = vrsqrt.f32 %v1982_v22  ;;  %v1958_v45 = vadd.f32 1e-12, %v1908_v9 }
 0x303   :  { %v1983_v57 = vadd.f32 1e-12, %v1933_v30  ;;  %v2345_v53 = vadd.f32 %v5486_v1, %v2233_v14  ;;  %v2346_v48 = vadd.f32 %v5489_v24, %v2234_v41  ;;  %v2073_v32 = vmul.f32 %v3342_v21, %v5330_v18  ;;  %v1880_v36 = vpop.xlane.xlu1 %1879 }
 0x304   :  { %v2074_v59 = vmul.f32 %v3342_v21, %v5333_v50  ;;  %v1805_v49 = vpop.xlane.xlu0 %1804  ;;  %v2295_v58 = vadd.f32 %v5486_v1, %v2183_v6  ;;  %v2296_v10 = vadd.f32 %v5489_v24, %v2184_v19  ;;  %v3344_v23 = vpop.eup %3343  ;;  %v1934_v11 = vmul.f32 0.00390625, %v1880_v36 }
 0x305   :  { %3353 = vrsqrt.f32 %v1983_v57  ;;  %v2903_v51 = vpack.c.bf16 %v2346_v48, %v2345_v53  ;;  %v2185_v42 = vmul.f32 %v5480_v29, %v2073_v32  ;;  %v1909_v52 = vmul.f32 0.00390625, %v1805_v49 }
 0x306   :  { %v2186_v20 = vmul.f32 %v5483_v56, %v2074_v59  ;;  %v2878_v26 = vpack.c.bf16 %v2296_v10, %v2295_v58  ;;  %v2123_v18 = vmul.f32 %v3344_v23, %v5324_v12  ;;  %v2124_v50 = vmul.f32 %v3344_v23, %v6290_v16 }
 0x307   :  { %3355 = vrsqrt.f32 %v1958_v45  ;;  %2703 = vst [vmem:[#allocation7 + $0x150] sm:$0xff] %v2903_v51  ;;  %v2297_v4 = vadd.f32 %v5486_v1, %v2185_v42  ;;  %v1959_v15 = vadd.f32 1e-12, %v1909_v52  ;;  %v1808_v63 = vpop.xlane.xlu1 %1807  ;;  %v3346_v5 = vpop.eup %3345  ;;  %v1984_v53 = vadd.f32 1e-12, %v1934_v11 }
 0x308   :  { %v2298_v0 = vadd.f32 %v5489_v24, %v2186_v20  ;;  %2678 = vst [vmem:[#allocation7 + $0x88] sm:$0xff] %v2878_v26  ;;  %v2235_v13 = vmul.f32 %v5480_v29, %v2123_v18  ;;  %v2236_v55 = vmul.f32 %v5483_v56, %v2124_v50  ;;  %v1910_v39 = vmul.f32 0.00390625, %v1808_v63  ;;  %v3348_v2 = vpop.eup %3347 }
 0x309   :  { %v2125_v22 = vmul.f32 %v3346_v5, %v5350_v47  ;;  %v2126_v30 = vmul.f32 %v3346_v5, %v5353_v38  ;;  %3357 = vrsqrt.f32 %v1959_v15  ;;  %v2075_v9 = vmul.f32 %v3348_v2, %v5344_v3 }
 0x30a   :  { %v2879_v12 = vpack.c.bf16 %v2298_v0, %v2297_v4  ;;  %v2347_v14 = vadd.f32 %v5486_v1, %v2235_v13  ;;  %v2348_v41 = vadd.f32 %v5489_v24, %v2236_v55  ;;  %v2076_v21 = vmul.f32 %v3348_v2, %v5347_v62 }
 0x30b   :  { %v3350_v6 = vpop.eup %3349  ;;  %v2237_v19 = vmul.f32 %v5480_v29, %v2125_v22  ;;  %v2238_v57 = vmul.f32 %v5483_v56, %v2126_v30  ;;  %v1960_v48 = vadd.f32 1e-12, %v1910_v39  ;;  %v2187_v38 = vmul.f32 %v5480_v29, %v2075_v9 }
 0x30c   :  { %2679 = vst [vmem:[#allocation7 + $0x90] sm:$0xff] %v2879_v12  ;;  %v3352_v47 = vpop.eup %3351  ;;  %v2904_v32 = vpack.c.bf16 %v2348_v41, %v2347_v14  ;;  %v2188_v59 = vmul.f32 %v5483_v56, %v2076_v21  ;;  %v2077_v49 = vmul.f32 %v3350_v6, %v5370_v43  ;;  %v2078_v36 = vmul.f32 %v3350_v6, %v5373_v33  ;;  %v1811_v10 = vpop.xlane.xlu0 %1810 }
 0x30d   :  { %v2349_v3 = vadd.f32 %v5486_v1, %v2237_v19  ;;  %v2350_v62 = vadd.f32 %v5489_v24, %v2238_v57  ;;  %v2127_v58 = vmul.f32 %v3352_v47, %v5364_v17  ;;  %v2299_v23 = vadd.f32 %v5486_v1, %v2187_v38 }
 0x30e   :  { %2704 = vst [vmem:[#allocation7 + $0x158] sm:$0xff] %v2904_v32  ;;  %v2300_v51 = vadd.f32 %v5489_v24, %v2188_v59  ;;  %v2189_v42 = vmul.f32 %v5480_v29, %v2077_v49  ;;  %v2128_v20 = vmul.f32 %v3352_v47, %v5367_v37  ;;  %v1814_v43 = vpop.xlane.xlu1 %1813  ;;  %v2190_v26 = vmul.f32 %v5483_v56, %v2078_v36 }
 0x30f   :  { %v3354_v45 = vpop.eup %3353  ;;  %v2905_v52 = vpack.c.bf16 %v2350_v62, %v2349_v3  ;;  %v2239_v18 = vmul.f32 %v5480_v29, %v2127_v58  ;;  %3359 = vrsqrt.f32 %v1984_v53  ;;  %v1911_v21 = vmul.f32 0.00390625, %v1811_v10 }
 0x310   :  { %v2129_v33 = vmul.f32 %v3354_v45, %v5390_v31  ;;  %v2880_v16 = vpack.c.bf16 %v2300_v51, %v2299_v23  ;;  %v2301_v50 = vadd.f32 %v5486_v1, %v2189_v42  ;;  %v2240_v4 = vmul.f32 %v5483_v56, %v2128_v20  ;;  %v1883_v12 = vpop.xlane.xlu0 %1882 }
 0x311   :  { %v3356_v17 = vpop.eup %3355  ;;  %v2130_v0 = vmul.f32 %v3354_v45, %v5393_v34  ;;  %2705 = vst [vmem:[#allocation7 + $0x160] sm:$0xff] %v2905_v52  ;;  %v2302_v15 = vadd.f32 %v5489_v24, %v2190_v26  ;;  %v2351_v37 = vadd.f32 %v5486_v1, %v2239_v18  ;;  %3361 = vrsqrt.f32 %v1960_v48 }
 0x312   :  { %v2241_v11 = vmul.f32 %v5480_v29, %v2129_v33  ;;  %v2079_v63 = vmul.f32 %v3356_v17, %v5384_v54  ;;  %2680 = vst [vmem:[#allocation7 + $0x98] sm:$0xff] %v2880_v16  ;;  %v2352_v31 = vadd.f32 %v5489_v24, %v2240_v4  ;;  %v2080_v13 = vmul.f32 %v3356_v17, %v5387_v46  ;;  %v1886_v41 = vpop.xlane.xlu1 %1885 }
 0x313   :  { %v2242_v5 = vmul.f32 %v5483_v56, %v2130_v0  ;;  %v3358_v55 = vpop.eup %3357  ;;  %v2881_v39 = vpack.c.bf16 %v2302_v15, %v2301_v50  ;;  %v1912_v6 = vmul.f32 0.00390625, %v1814_v43  ;;  %v1935_v48 = vmul.f32 0.00390625, %v1883_v12  ;;  %v6294_v12 = vld [vmem:[#allocation57_spill] sm:$0xff] }
 0x314   :  { %v2353_v34 = vadd.f32 %v5486_v1, %v2241_v11  ;;  %v2191_v2 = vmul.f32 %v5480_v29, %v2079_v63  ;;  %v2906_v22 = vpack.c.bf16 %v2352_v31, %v2351_v37  ;;  %v2192_v54 = vmul.f32 %v5483_v56, %v2080_v13 }
 0x315   :  { %v2354_v30 = vadd.f32 %v5489_v24, %v2242_v5  ;;  %v2081_v14 = vmul.f32 %v3358_v55, %v5410_v40  ;;  %2681 = vst [vmem:[#allocation7 + $0xa0] sm:$0xff] %v2881_v39  ;;  %v2082_v9 = vmul.f32 %v3358_v55, %v5413_v28  ;;  %v1961_v32 = vadd.f32 1e-12, %v1911_v21  ;;  %v6291_v5 = vld [vmem:[#allocation55_spill] sm:$0xff] }
 0x316   :  { %v2303_v46 = vadd.f32 %v5486_v1, %v2191_v2  ;;  %2706 = vst [vmem:[#allocation7 + $0x168] sm:$0xff] %v2906_v22  ;;  %v2304_v57 = vadd.f32 %v5489_v24, %v2192_v54  ;;  %v1962_v38 = vadd.f32 1e-12, %v1912_v6  ;;  %v1936_v40 = vmul.f32 0.00390625, %v1886_v41  ;;  %v6292_v55 = vld [vmem:[#allocation59_spill] sm:$0xff] }
 0x317   :  { %v2907_v19 = vpack.c.bf16 %v2354_v30, %v2353_v34  ;;  %v2193_v53 = vmul.f32 %v5480_v29, %v2081_v14  ;;  %v2194_v47 = vmul.f32 %v5483_v56, %v2082_v9  ;;  %v1985_v3 = vadd.f32 1e-12, %v1935_v48  ;;  %v6293_v34 = vld [vmem:[#allocation56_spill] sm:$0xff] }
 0x318   :  { %v2882_v59 = vpack.c.bf16 %v2304_v57, %v2303_v46  ;;  %3363 = vrsqrt.f32 %v1961_v32  ;;  %v1986_v62 = vadd.f32 1e-12, %v1936_v40 }
 0x319   :  { %2707 = vst [vmem:[#allocation7 + $0x170] sm:$0xff] %v2907_v19  ;;  %v2305_v49 = vadd.f32 %v5486_v1, %v2193_v53  ;;  %v2306_v28 = vadd.f32 %v5489_v24, %v2194_v47  ;;  %3365 = vrsqrt.f32 %v1962_v38  ;;  %v3360_v58 = vpop.eup %3359 }
 0x31a   :  { %2682 = vst [vmem:[#allocation7 + $0xa8] sm:$0xff] %v2882_v59  ;;  %3367 = vrsqrt.f32 %v1985_v3  ;;  %v2131_v45 = vmul.f32 %v3360_v58, %v5404_v8  ;;  %v2132_v23 = vmul.f32 %v3360_v58, %v5407_v44 }
 0x31b   :  { %v2883_v36 = vpack.c.bf16 %v2306_v28, %v2305_v49  ;;  %3369 = vrsqrt.f32 %v1986_v62  ;;  %v3362_v10 = vpop.eup %3361 }
 0x31c   :  { %v2083_v51 = vmul.f32 %v3362_v10, %v5424_v61  ;;  %v2084_v42 = vmul.f32 %v3362_v10, %v5427_v25  ;;  %v2243_v20 = vmul.f32 %v5480_v29, %v2131_v45  ;;  %v2244_v43 = vmul.f32 %v5483_v56, %v2132_v23 }
 0x31d   :  { %2683 = vst [vmem:[#allocation7 + $0xb0] sm:$0xff] %v2883_v36 }
 0x31e   :  { %v2195_v52 = vmul.f32 %v5480_v29, %v2083_v51  ;;  %v2196_v26 = vmul.f32 %v5483_v56, %v2084_v42  ;;  %v2355_v18 = vadd.f32 %v5486_v1, %v2243_v20  ;;  %v2356_v33 = vadd.f32 %v5489_v24, %v2244_v43 }
 0x320   :  { %v2307_v8 = vadd.f32 %v5486_v1, %v2195_v52  ;;  %v2308_v44 = vadd.f32 %v5489_v24, %v2196_v26  ;;  %v2908_v61 = vpack.c.bf16 %v2356_v33, %v2355_v18 }
 0x322   :  { %v3364_v17 = vpop.eup %3363  ;;  %v2884_v25 = vpack.c.bf16 %v2308_v44, %v2307_v8  ;;  %2708 = vst [vmem:[#allocation7 + $0x178] sm:$0xff] %v2908_v61 }
 0x323   :  { %v3366_v16 = vpop.eup %3365  ;;  %v2085_v50 = vmul.f32 %v3364_v17, %v5440_v35  ;;  %v2086_v4 = vmul.f32 %v3364_v17, %v5443_v27 }
 0x324   :  { %v3368_v0 = vpop.eup %3367  ;;  %v2087_v15 = vmul.f32 %v3366_v16, %v5456_v60  ;;  %v2088_v37 = vmul.f32 %v3366_v16, %v5459_v7  ;;  %2684 = vst [vmem:[#allocation7 + $0xb8] sm:$0xff] %v2884_v25 }
 0x325   :  { %v3370_v11 = vpop.eup %3369  ;;  %v2197_v63 = vmul.f32 %v5480_v29, %v2085_v50  ;;  %v2198_v31 = vmul.f32 %v5483_v56, %v2086_v4  ;;  %v2133_v13 = vmul.f32 %v3368_v0, %v6291_v5  ;;  %v2134_v39 = vmul.f32 %v3368_v0, %v6292_v55 }
 0x326   :  { %v2199_v35 = vmul.f32 %v5480_v29, %v2087_v15  ;;  %v2200_v27 = vmul.f32 %v5483_v56, %v2088_v37  ;;  %v2135_v2 = vmul.f32 %v3370_v11, %v6293_v34  ;;  %v2136_v60 = vmul.f32 %v3370_v11, %v6294_v12 }
 0x327   :  { %v2309_v7 = vadd.f32 %v5486_v1, %v2197_v63  ;;  %v2310_v22 = vadd.f32 %v5489_v24, %v2198_v31  ;;  %v2245_v30 = vmul.f32 %v5480_v29, %v2133_v13  ;;  %v2246_v54 = vmul.f32 %v5483_v56, %v2134_v39 }
 0x328   :  { %v2311_v14 = vadd.f32 %v5486_v1, %v2199_v35  ;;  %v2312_v41 = vadd.f32 %v5489_v24, %v2200_v27  ;;  %v2247_v46 = vmul.f32 %v5480_v29, %v2135_v2  ;;  %v2248_v9 = vmul.f32 %v5483_v56, %v2136_v60 }
 0x329   :  { %v2885_v21 = vpack.c.bf16 %v2310_v22, %v2309_v7  ;;  %v2357_v6 = vadd.f32 %v5486_v1, %v2245_v30  ;;  %v2358_v19 = vadd.f32 %v5489_v24, %v2246_v54 }
 0x32a   :  { %v2886_v57 = vpack.c.bf16 %v2312_v41, %v2311_v14  ;;  %v2359_v53 = vadd.f32 %v5486_v1, %v2247_v46  ;;  %v2360_v48 = vadd.f32 %v5489_v24, %v2248_v9 }
 0x32b   :  { %2685 = vst [vmem:[#allocation7 + $0xc0] sm:$0xff] %v2885_v21  ;;  %v2909_v47 = vpack.c.bf16 %v2358_v19, %v2357_v6 }
 0x32c   :  { %2686 = vst [vmem:[#allocation7 + $0xc8] sm:$0xff] %v2886_v57  ;;  %v2910_v32 = vpack.c.bf16 %v2360_v48, %v2359_v53 }
 0x32d   :  { %2709 = vst [vmem:[#allocation7 + $0x180] sm:$0xff] %v2909_v47 }
 0x32e   :  { %2710 = vst [vmem:[#allocation7 + $0x188] sm:$0xff] %v2910_v32 }
 0x32f   :  { %3426 = shalt.err (!%p3423_p6)
}
 0x330   :  { %s3427_s25 = scalar_lea.hbm %s5811_s5, 6400 }
 0x331   :  { %p3428_p7 = scmp.ne.s32.totalorder %s5811_s5, %s3427_s25  ;;  %p3431_p8 = scmp.lt.u32.totalorder %s3427_s25, %s5811_s5 }
 0x333   :  { %p3433_p9 = pnand %p3431_p8, %p3428_p7 }
 0x335   :  { %3436 = shalt.err (!%p3433_p9)
}
 0x336   :  { %2722 = dma.vmem_to_hbm [thread:$0]  %s2717_s4, 6400, %s5811_s5, [#allocation4], %s3444_s28, %s3444_s28, %s3445_s29  }
 0x337   :  { %3441 = dma.done.wait [#allocation4], 6400  }
 0x338   :  { %3442 = vsyncadd [#allocation4], 4294960896 }
 0x339   :  { %2726 = vsyncpa [#allocation3], 1 }
 0x33a   :  { %2727 = vsyncpa [#allocation6], 1 }
 0x33b   :  { %2728 = vsyncpa [#allocation4], 1 }

</bundles_post_ra>
